<compile_context>
chip_gen: v7x
topology: tpu7x:2x2x1
jax: 0.10.0
libtpu: 0.0.40
codegen_flags: <defaults>
</compile_context>

<pallas_src>
import functools

import jax
import jax.numpy as jnp
from jax.experimental import pallas as pl
from jax.experimental.pallas import tpu as pltpu


def _sigmoid(x):
    # Exact sigmoid via tanh: stays on the EUP slot, no VALU divide, no inf
    # intermediates from exp(-x).
    return 0.5 * jnp.tanh(0.5 * x) + 0.5


def _bigru_kernel(gxf_ref, gxb_ref, vf_ref, vb_ref, whh_ref, bhh_ref,
                  out_f_ref, out_b_ref, hf_scr, hb_scr, *, tt, hidden):
    """One grid step = TT forward timesteps + TT backward timesteps.

    gxf_ref / gxb_ref: (TT, B, 3H) precomputed x @ W_ih^T + b_ih (fwd / bwd
                       weights; bwd block is the time-mirrored slab).
    vf_ref / vb_ref:   (TT, B, 1) validity (1.0 = real timestep).
    whh_ref:           (2, H, 3H) bf16, [fwd, bwd] recurrent weights.
    bhh_ref:           (2, 1, 3H) f32 recurrent biases.
    hf_scr / hb_scr:   (B, H) f32 hidden states carried across grid steps.
    """
    tb = pl.program_id(0)
    H = hidden

    @pl.when(tb == 0)
    def _init():
        hf_scr[...] = jnp.zeros_like(hf_scr)
        hb_scr[...] = jnp.zeros_like(hb_scr)

    # Constant blocks: load once per grid step, reused by every unrolled step.
    whh_f = whh_ref[0]                     # (H, 3H) bf16
    whh_b = whh_ref[1]
    bhh_f = bhh_ref[0]                     # (1, 3H) f32
    bhh_b = bhh_ref[1]

    def gru_step(gx, h, whh, bhh):
        # gx: (B, 3H) f32 precomputed input path; h: (B, H) f32.
        gh = jnp.dot(h.astype(whh.dtype), whh,
                     preferred_element_type=jnp.float32) + bhh     # (B, 3H)
        r = _sigmoid(gx[:, :H] + gh[:, :H])
        z = _sigmoid(gx[:, H:2 * H] + gh[:, H:2 * H])
        n = jnp.tanh(gx[:, 2 * H:] + r * gh[:, 2 * H:])
        return (1.0 - z) * n + z * h

    def body(i, carry):
        hf, hb = carry

        # ---- forward direction: within-block time index i ----
        vf = vf_ref[i]                                            # (B, 1)
        hf_new = gru_step(gxf_ref[i], hf, whh_f, bhh_f)
        hf = jnp.where(vf > 0.0, hf_new, hf)
        out_f_ref[i] = jnp.where(vf > 0.0, hf_new, 0.0).astype(out_f_ref.dtype)

        # ---- backward direction: the bwd block is the mirrored time slab,
        # so it is traversed back-to-front: within-block index tt-1-i ----
        j = tt - 1 - i
        vb = vb_ref[j]
        hb_new = gru_step(gxb_ref[j], hb, whh_b, bhh_b)
        hb = jnp.where(vb > 0.0, hb_new, hb)
        out_b_ref[j] = jnp.where(vb > 0.0, hb_new, 0.0).astype(out_b_ref.dtype)

        return hf, hb

    hf_fin, hb_fin = jax.lax.fori_loop(0, tt, body,
                                       (hf_scr[...], hb_scr[...]),
                                       unroll=True)
    hf_scr[...] = hf_fin
    hb_scr[...] = hb_fin


def rnn_forward(seq, mask, params, *, with_pre_norm=True,
                output_keep_prob=1.0, tt=8):
    """Forward of the PyTorch `RNN` module.

    seq:  (B, hidden, T) float32
    mask: (B, T) float, 1.0 for valid timesteps (prefix mask, pack_padded).
    params: PyTorch-layout GRU / LayerNorm parameters (see __main__).
    Returns (B, hidden, T) float32.
    """
    (w_ih_f, w_hh_f, b_ih_f, b_hh_f,
     w_ih_b, w_hh_b, b_ih_b, b_hh_b, gamma, beta) = params
    B, H, T = seq.shape

    # ------------- XLA-side precompute (off the serial critical path) -------
    x = jnp.transpose(seq, (2, 0, 1)).astype(jnp.float32)          # (T, B, H)
    if with_pre_norm:
        mu = jnp.mean(x, axis=-1, keepdims=True)
        var = jnp.mean((x - mu) ** 2, axis=-1, keepdims=True)
        x = (x - mu) * jax.lax.rsqrt(var + 1e-5) \
            * gamma.reshape(1, 1, H) + beta.reshape(1, 1, H)

    # Input-gate projections as one big GEMM per direction (gate order r|z|n
    # on the lane axis, PyTorch weight layout (3H, H)).
    gx_f = jnp.einsum('tbh,gh->tbg', x, w_ih_f) + b_ih_f.reshape(1, 1, 3 * H)
    gx_b = jnp.einsum('tbh,gh->tbg', x, w_ih_b) + b_ih_b.reshape(1, 1, 3 * H)

    # Time padding so the grid is a whole number of TT-step blocks.  Padded
    # timesteps are marked invalid, so state is not updated and output is 0.
    n_blk = pl.cdiv(T, tt)
    t_pad = n_blk * tt
    if t_pad != T:
        gx_f = jnp.pad(gx_f, ((0, t_pad - T), (0, 0), (0, 0)))
        gx_b = jnp.pad(gx_b, ((0, t_pad - T), (0, 0), (0, 0)))

    lengths = jnp.sum(mask, axis=1).astype(jnp.int32)              # (B,)
    valid = (jnp.arange(t_pad)[:, None] < lengths[None, :])
    valid = valid.astype(jnp.float32).reshape(t_pad, B, 1)

    # Recurrent weights: gate-fused (H, 3H), fwd/bwd stacked, bf16 operands.
    whh = jnp.stack([w_hh_f.T, w_hh_b.T]).astype(jnp.bfloat16)     # (2, H, 3H)
    bhh = jnp.stack([b_hh_f.reshape(1, 3 * H),
                     b_hh_b.reshape(1, 3 * H)]).astype(jnp.float32)  # (2,1,3H)

    # Rough VMEM need (streamed blocks double-buffered + constants + scratch).
    stream = 2 * tt * B * 3 * H * 4 + 2 * tt * B * 4 + 2 * tt * B * H * 4
    consts = 2 * H * 3 * H * 2 + 2 * 3 * H * 4
    scratch = 2 * B * H * 4
    vmem_limit = int(max(2 * (stream + consts) + scratch + (1 << 20),
                         32 * 1024 * 1024))

    kernel = functools.partial(_bigru_kernel, tt=tt, hidden=H)

    out_f, out_b = pl.pallas_call(
        kernel,
        out_shape=(jax.ShapeDtypeStruct((t_pad, B, H), jnp.float32),
                   jax.ShapeDtypeStruct((t_pad, B, H), jnp.float32)),
        grid=(n_blk,),
        in_specs=[
            pl.BlockSpec((tt, B, 3 * H), lambda i: (i, 0, 0)),             # gx fwd
            pl.BlockSpec((tt, B, 3 * H), lambda i: (n_blk - 1 - i, 0, 0)),  # gx bwd
            pl.BlockSpec((tt, B, 1), lambda i: (i, 0, 0)),                 # valid fwd
            pl.BlockSpec((tt, B, 1), lambda i: (n_blk - 1 - i, 0, 0)),      # valid bwd
            pl.BlockSpec((2, H, 3 * H), lambda i: (0, 0, 0)),              # W_hh (f,b)
            pl.BlockSpec((2, 1, 3 * H), lambda i: (0, 0, 0)),              # b_hh (f,b)
        ],
        out_specs=[
            pl.BlockSpec((tt, B, H), lambda i: (i, 0, 0)),
            pl.BlockSpec((tt, B, H), lambda i: (n_blk - 1 - i, 0, 0)),
        ],
        scratch_shapes=[pltpu.VMEM((B, H), jnp.float32),   # h forward
                        pltpu.VMEM((B, H), jnp.float32)],  # h backward
        compiler_params=pltpu.CompilerParams(
            dimension_semantics=("arbitrary",),            # true recurrence
            vmem_limit_bytes=vmem_limit),
    )(gx_f, gx_b, valid, valid, whh, bhh)

    # Sum of the two directions; XLA fuses this add into the transpose copy.
    out = (out_f + out_b)[:T]
    del output_keep_prob          # eval-mode dropout == identity
    return jnp.transpose(out, (1, 2, 0))                   # (B, H, T)


def rnn_reference(seq, mask, params, *, with_pre_norm=True):
    """Pure-JAX (f32) reference with identical packed-GRU semantics."""
    (w_ih_f, w_hh_f, b_ih_f, b_hh_f,
     w_ih_b, w_hh_b, b_ih_b, b_hh_b, gamma, beta) = params
    B, H, T = seq.shape
    lengths = jnp.sum(mask, axis=1).astype(jnp.int32)
    x = jnp.transpose(seq, (0, 2, 1)).astype(jnp.float32)          # (B, T, H)
    if with_pre_norm:
        mu = jnp.mean(x, axis=-1, keepdims=True)
        var = jnp.mean((x - mu) ** 2, axis=-1, keepdims=True)
        x = (x - mu) / jnp.sqrt(var + 1e-5) * gamma.reshape(1, 1, H) \
            + beta.reshape(1, 1, H)

    def cell(xt, h, w_ih, w_hh, b_ih, b_hh):
        gi = xt @ w_ih.T + b_ih
        gh = h @ w_hh.T + b_hh
        r = jax.nn.sigmoid(gi[:, :H] + gh[:, :H])
        z = jax.nn.sigmoid(gi[:, H:2 * H] + gh[:, H:2 * H])
        n = jnp.tanh(gi[:, 2 * H:] + r * gh[:, 2 * H:])
        return (1.0 - z) * n + z * h

    out_f = jnp.zeros((B, T, H), jnp.float32)
    h = jnp.zeros((B, H), jnp.float32)
    for t in range(T):
        h_new = cell(x[:, t], h, w_ih_f, w_hh_f, b_ih_f, b_hh_f)
        valid = (t < lengths)[:, None]
        h = jnp.where(valid, h_new, h)
        out_f = out_f.at[:, t].set(jnp.where(valid, h_new, 0.0))

    out_b = jnp.zeros((B, T, H), jnp.float32)
    h = jnp.zeros((B, H), jnp.float32)
    for t in range(T - 1, -1, -1):
        h_new = cell(x[:, t], h, w_ih_b, w_hh_b, b_ih_b, b_hh_b)
        valid = (t < lengths)[:, None]
        h = jnp.where(valid, h_new, h)
        out_b = out_b.at[:, t].set(jnp.where(valid, h_new, 0.0))

    return jnp.transpose(out_f + out_b, (0, 2, 1))                 # (B, H, T)


if __name__ == "__main__":
    B, H, T = 2, 32, 8            # batch, hidden_size, seq_len
    with_pre_norm = True
    output_keep_prob = 0.9

    key = jax.random.PRNGKey(0)
    k_seq, *k_w = jax.random.split(key, 10)

    bound = 1.0 / (H ** 0.5)      # PyTorch nn.GRU init: U(-1/sqrt(H), 1/sqrt(H))
    def uniform(k, shape):
        return jax.random.uniform(k, shape, jnp.float32, -bound, bound)

    # PyTorch layout: weight_ih_l0 is (3H, H) with gate order (r, z, n).
    w_ih_f = uniform(k_w[0], (3 * H, H)); w_hh_f = uniform(k_w[1], (3 * H, H))
    b_ih_f = uniform(k_w[2], (3 * H,));   b_hh_f = uniform(k_w[3], (3 * H,))
    w_ih_b = uniform(k_w[4], (3 * H, H)); w_hh_b = uniform(k_w[5], (3 * H, H))
    b_ih_b = uniform(k_w[6], (3 * H,));   b_hh_b = uniform(k_w[7], (3 * H,))

    gamma = jnp.ones((H,), jnp.float32)   # nn.LayerNorm default init
    beta = jnp.zeros((H,), jnp.float32)

    params = (w_ih_f, w_hh_f, b_ih_f, b_hh_f,
              w_ih_b, w_hh_b, b_ih_b, b_hh_b, gamma, beta)

    seq = jax.random.normal(k_seq, (B, H, T), dtype=jnp.float32)   # (B, hidden, T)
    lengths = jnp.array([T, 5], dtype=jnp.int32)                   # variable lengths
    mask = (jnp.arange(T)[None, :] < lengths[:, None]).astype(jnp.float32)

    out = rnn_forward(seq, mask, params, with_pre_norm=with_pre_norm,
                      output_keep_prob=output_keep_prob)
    out = jax.block_until_ready(out)

    ref = rnn_reference(seq, mask, params, with_pre_norm=with_pre_norm)

    assert out.shape == (B, H, T), (out.shape, (B, H, T))
    assert out.dtype == jnp.float32
    # packed-sequence semantics: padded timesteps of batch 1 must be exactly 0
    assert bool(jnp.all(out[1, :, 5:] == 0.0)), "padded timesteps must be zero"
    # bf16 operands on the recurrent matmul; everything else f32.
    max_err = float(jnp.max(jnp.abs(out - ref)))
    assert max_err < 2e-2, f"mismatch vs pure-JAX reference: max_err={max_err}"

    print("KERNEL_OK")
</pallas_src>

<mosaic_0001>
module attributes {stable_mosaic.version = 11 : i64} {
  func.func @_bigru_kernel(%arg0: i32, %arg1: memref<8x2x96xf32, #tpu.memory_space<vmem>>, %arg2: memref<8x2x96xf32, #tpu.memory_space<vmem>>, %arg3: memref<8x2x1xf32, #tpu.memory_space<vmem>>, %arg4: memref<8x2x1xf32, #tpu.memory_space<vmem>>, %arg5: memref<2x32x96xbf16, #tpu.memory_space<vmem>>, %arg6: memref<2x1x96xf32, #tpu.memory_space<vmem>>, %arg7: memref<8x2x32xf32, #tpu.memory_space<vmem>>, %arg8: memref<8x2x32xf32, #tpu.memory_space<vmem>>, %arg9: memref<2x32xf32, #tpu.memory_space<vmem>>, %arg10: memref<2x32xf32, #tpu.memory_space<vmem>>) attributes {dimension_semantics = [#tpu.dimension_semantics<arbitrary>], iteration_bounds = array<i64: 1>, scalar_prefetch = 0 : i64, scratch_operands = 2 : i64, tpu.core_type = #tpu.core_type<tc>, window_params = [{transform_indices = @transform_0, window_bounds = array<i64: 8, 2, 96>}, {transform_indices = @transform_1, window_bounds = array<i64: 8, 2, 96>}, {transform_indices = @transform_2, window_bounds = array<i64: 8, 2, 1>}, {transform_indices = @transform_3, window_bounds = array<i64: 8, 2, 1>}, {pipeline_mode = #tpu.pipeline_mode<synchronous>, transform_indices = @transform_4, window_bounds = array<i64: 2, 32, 96>}, {pipeline_mode = #tpu.pipeline_mode<synchronous>, transform_indices = @transform_5, window_bounds = array<i64: 2, 1, 96>}, {transform_indices = @transform_6, window_bounds = array<i64: 8, 2, 32>}, {transform_indices = @transform_7, window_bounds = array<i64: 8, 2, 32>}]} {
    %c0_i32 = arith.constant 0 : i32
    %0 = arith.cmpi eq, %arg0, %c0_i32 : i32
    %1 = arith.extui %0 : i1 to i32
    %c0_i32_0 = arith.constant 0 : i32
    %2 = arith.cmpi ne, %1, %c0_i32_0 : i32
    scf.if %2 {
      %cst_299 = arith.constant 0.000000e+00 : f32
      %903 = vector.broadcast %cst_299 : f32 to vector<2x32xf32>
      %c0_300 = arith.constant 0 : index
      %c0_301 = arith.constant 0 : index
      %904 = vector.load %arg9[%c0_300, %c0_301] : memref<2x32xf32, #tpu.memory_space<vmem>>, vector<2x32xf32>
      tpu.vector_store %arg9[%c0_300, %c0_301], %903 {strides = array<i32>} : memref<2x32xf32, #tpu.memory_space<vmem>>, vector<2x32xf32>,
      %cst_302 = arith.constant 0.000000e+00 : f32
      %905 = vector.broadcast %cst_302 : f32 to vector<2x32xf32>
      %c0_303 = arith.constant 0 : index
      %c0_304 = arith.constant 0 : index
      %906 = vector.load %arg10[%c0_303, %c0_304] : memref<2x32xf32, #tpu.memory_space<vmem>>, vector<2x32xf32>
      tpu.vector_store %arg10[%c0_303, %c0_304], %905 {strides = array<i32>} : memref<2x32xf32, #tpu.memory_space<vmem>>, vector<2x32xf32>,
    } else {
    }
    %c0 = arith.constant 0 : index
    %c0_1 = arith.constant 0 : index
    %c0_2 = arith.constant 0 : index
    %3 = vector.load %arg5[%c0, %c0_1, %c0_2] : memref<2x32x96xbf16, #tpu.memory_space<vmem>>, vector<1x32x96xbf16>
    %4 = vector.shape_cast %3 : vector<1x32x96xbf16> to vector<32x96xbf16>
    %c1 = arith.constant 1 : index
    %c0_3 = arith.constant 0 : index
    %c0_4 = arith.constant 0 : index
    %5 = vector.load %arg5[%c1, %c0_3, %c0_4] : memref<2x32x96xbf16, #tpu.memory_space<vmem>>, vector<1x32x96xbf16>
    %6 = vector.shape_cast %5 : vector<1x32x96xbf16> to vector<32x96xbf16>
    %c0_5 = arith.constant 0 : index
    %c0_6 = arith.constant 0 : index
    %c0_7 = arith.constant 0 : index
    %7 = vector.load %arg6[%c0_5, %c0_6, %c0_7] : memref<2x1x96xf32, #tpu.memory_space<vmem>>, vector<1x1x96xf32>
    %8 = vector.shape_cast %7 : vector<1x1x96xf32> to vector<1x96xf32>
    %c1_8 = arith.constant 1 : index
    %c0_9 = arith.constant 0 : index
    %c0_10 = arith.constant 0 : index
    %9 = vector.load %arg6[%c1_8, %c0_9, %c0_10] : memref<2x1x96xf32, #tpu.memory_space<vmem>>, vector<1x1x96xf32>
    %10 = vector.shape_cast %9 : vector<1x1x96xf32> to vector<1x96xf32>
    %c0_11 = arith.constant 0 : index
    %c0_12 = arith.constant 0 : index
    %11 = vector.load %arg9[%c0_11, %c0_12] : memref<2x32xf32, #tpu.memory_space<vmem>>, vector<2x32xf32>
    %c0_13 = arith.constant 0 : index
    %c0_14 = arith.constant 0 : index
    %12 = vector.load %arg10[%c0_13, %c0_14] : memref<2x32xf32, #tpu.memory_space<vmem>>, vector<2x32xf32>
    %c0_i32_15 = arith.constant 0 : i32
    %13 = arith.index_cast %c0_i32_15 : i32 to index
    %c0_16 = arith.constant 0 : index
    %c0_17 = arith.constant 0 : index
    %14 = vector.load %arg3[%13, %c0_16, %c0_17] : memref<8x2x1xf32, #tpu.memory_space<vmem>>, vector<1x2x1xf32>
    %15 = vector.shape_cast %14 : vector<1x2x1xf32> to vector<2x1xf32>
    %16 = arith.index_cast %c0_i32_15 : i32 to index
    %c0_18 = arith.constant 0 : index
    %c0_19 = arith.constant 0 : index
    %17 = vector.load %arg1[%16, %c0_18, %c0_19] : memref<8x2x96xf32, #tpu.memory_space<vmem>>, vector<1x2x96xf32>
    %18 = vector.shape_cast %17 : vector<1x2x96xf32> to vector<2x96xf32>
    %19 = arith.truncf %11 : vector<2x32xf32> to vector<2x32xbf16>
    %cst = arith.constant dense<0.000000e+00> : vector<2x96xf32>
    %20 = tpu.matmul %19, %4, %cst {dimension_numbers = #tpu.dot_dimension_numbers<[1], [0], [0], [1], [0, 0, 1, 1], [], []>} : vector<2x32xbf16>, vector<32x96xbf16>, vector<2x96xf32> -> vector<2x96xf32>
    %21 = vector.broadcast %8 : vector<1x96xf32> to vector<2x96xf32>
    %22 = arith.addf %20, %21 : vector<2x96xf32>
    %23 = vector.extract_strided_slice %18 {offsets = [0, 0], sizes = [2, 32], strides = [1, 1]} : vector<2x96xf32> to vector<2x32xf32>
    %24 = vector.extract_strided_slice %22 {offsets = [0, 0], sizes = [2, 32], strides = [1, 1]} : vector<2x96xf32> to vector<2x32xf32>
    %25 = arith.addf %23, %24 : vector<2x32xf32>
    %cst_20 = arith.constant 5.000000e-01 : f32
    %26 = vector.broadcast %cst_20 : f32 to vector<2x32xf32>
    %27 = arith.mulf %26, %25 : vector<2x32xf32>
    %28 = math.tanh %27 : vector<2x32xf32>
    %cst_21 = arith.constant 5.000000e-01 : f32
    %29 = vector.broadcast %cst_21 : f32 to vector<2x32xf32>
    %30 = arith.mulf %29, %28 : vector<2x32xf32>
    %cst_22 = arith.constant 5.000000e-01 : f32
    %31 = vector.broadcast %cst_22 : f32 to vector<2x32xf32>
    %32 = arith.addf %30, %31 : vector<2x32xf32>
    %33 = vector.extract_strided_slice %18 {offsets = [0, 32], sizes = [2, 32], strides = [1, 1]} : vector<2x96xf32> to vector<2x32xf32>
    %34 = vector.extract_strided_slice %22 {offsets = [0, 32], sizes = [2, 32], strides = [1, 1]} : vector<2x96xf32> to vector<2x32xf32>
    %35 = arith.addf %33, %34 : vector<2x32xf32>
    %cst_23 = arith.constant 5.000000e-01 : f32
    %36 = vector.broadcast %cst_23 : f32 to vector<2x32xf32>
    %37 = arith.mulf %36, %35 : vector<2x32xf32>
    %38 = math.tanh %37 : vector<2x32xf32>
    %cst_24 = arith.constant 5.000000e-01 : f32
    %39 = vector.broadcast %cst_24 : f32 to vector<2x32xf32>
    %40 = arith.mulf %39, %38 : vector<2x32xf32>
    %cst_25 = arith.constant 5.000000e-01 : f32
    %41 = vector.broadcast %cst_25 : f32 to vector<2x32xf32>
    %42 = arith.addf %40, %41 : vector<2x32xf32>
    %43 = vector.extract_strided_slice %18 {offsets = [0, 64], sizes = [2, 32], strides = [1, 1]} : vector<2x96xf32> to vector<2x32xf32>
    %44 = vector.extract_strided_slice %22 {offsets = [0, 64], sizes = [2, 32], strides = [1, 1]} : vector<2x96xf32> to vector<2x32xf32>
    %45 = arith.mulf %32, %44 : vector<2x32xf32>
    %46 = arith.addf %43, %45 : vector<2x32xf32>
    %47 = math.tanh %46 : vector<2x32xf32>
    %cst_26 = arith.constant 1.000000e+00 : f32
    %48 = vector.broadcast %cst_26 : f32 to vector<2x32xf32>
    %49 = arith.subf %48, %42 : vector<2x32xf32>
    %50 = arith.mulf %49, %47 : vector<2x32xf32>
    %51 = arith.mulf %42, %11 : vector<2x32xf32>
    %52 = arith.addf %50, %51 : vector<2x32xf32>
    %cst_27 = arith.constant 0.000000e+00 : f32
    %53 = vector.broadcast %cst_27 : f32 to vector<2x1xf32>
    %54 = arith.cmpf ogt, %15, %53 : vector<2x1xf32>
    %55 = vector.shape_cast %54 : vector<2x1xi1> to vector<2x1xi1>
    %56 = vector.broadcast %55 : vector<2x1xi1> to vector<2x32xi1>
    %57 = arith.select %56, %52, %11 : vector<2x32xi1>, vector<2x32xf32>
    %cst_28 = arith.constant 0.000000e+00 : f32
    %58 = vector.broadcast %cst_28 : f32 to vector<2x1xf32>
    %59 = arith.cmpf ogt, %15, %58 : vector<2x1xf32>
    %cst_29 = arith.constant 0.000000e+00 : f32
    %60 = vector.shape_cast %59 : vector<2x1xi1> to vector<2x1xi1>
    %61 = vector.broadcast %60 : vector<2x1xi1> to vector<2x32xi1>
    %62 = vector.broadcast %cst_29 : f32 to vector<2x32xf32>
    %63 = arith.select %61, %52, %62 : vector<2x32xi1>, vector<2x32xf32>
    %64 = arith.index_cast %c0_i32_15 : i32 to index
    %c0_30 = arith.constant 0 : index
    %c0_31 = arith.constant 0 : index
    %65 = vector.load %arg7[%64, %c0_30, %c0_31] : memref<8x2x32xf32, #tpu.memory_space<vmem>>, vector<1x2x32xf32>
    %66 = vector.shape_cast %65 : vector<1x2x32xf32> to vector<2x32xf32>
    %67 = vector.shape_cast %63 : vector<2x32xf32> to vector<1x2x32xf32>
    tpu.vector_store %arg7[%64, %c0_30, %c0_31], %67 {strides = array<i32>} : memref<8x2x32xf32, #tpu.memory_space<vmem>>, vector<1x2x32xf32>,
    %c7_i32 = arith.constant 7 : i32
    %68 = arith.subi %c7_i32, %c0_i32_15 : i32
    %69 = arith.index_cast %68 : i32 to index
    %c0_32 = arith.constant 0 : index
    %c0_33 = arith.constant 0 : index
    %70 = vector.load %arg4[%69, %c0_32, %c0_33] : memref<8x2x1xf32, #tpu.memory_space<vmem>>, vector<1x2x1xf32>
    %71 = vector.shape_cast %70 : vector<1x2x1xf32> to vector<2x1xf32>
    %72 = arith.index_cast %68 : i32 to index
    %c0_34 = arith.constant 0 : index
    %c0_35 = arith.constant 0 : index
    %73 = vector.load %arg2[%72, %c0_34, %c0_35] : memref<8x2x96xf32, #tpu.memory_space<vmem>>, vector<1x2x96xf32>
    %74 = vector.shape_cast %73 : vector<1x2x96xf32> to vector<2x96xf32>
    %75 = arith.truncf %12 : vector<2x32xf32> to vector<2x32xbf16>
    %cst_36 = arith.constant dense<0.000000e+00> : vector<2x96xf32>
    %76 = tpu.matmul %75, %6, %cst_36 {dimension_numbers = #tpu.dot_dimension_numbers<[1], [0], [0], [1], [0, 0, 1, 1], [], []>} : vector<2x32xbf16>, vector<32x96xbf16>, vector<2x96xf32> -> vector<2x96xf32>
    %77 = vector.broadcast %10 : vector<1x96xf32> to vector<2x96xf32>
    %78 = arith.addf %76, %77 : vector<2x96xf32>
    %79 = vector.extract_strided_slice %74 {offsets = [0, 0], sizes = [2, 32], strides = [1, 1]} : vector<2x96xf32> to vector<2x32xf32>
    %80 = vector.extract_strided_slice %78 {offsets = [0, 0], sizes = [2, 32], strides = [1, 1]} : vector<2x96xf32> to vector<2x32xf32>
    %81 = arith.addf %79, %80 : vector<2x32xf32>
    %cst_37 = arith.constant 5.000000e-01 : f32
    %82 = vector.broadcast %cst_37 : f32 to vector<2x32xf32>
    %83 = arith.mulf %82, %81 : vector<2x32xf32>
    %84 = math.tanh %83 : vector<2x32xf32>
    %cst_38 = arith.constant 5.000000e-01 : f32
    %85 = vector.broadcast %cst_38 : f32 to vector<2x32xf32>
    %86 = arith.mulf %85, %84 : vector<2x32xf32>
    %cst_39 = arith.constant 5.000000e-01 : f32
    %87 = vector.broadcast %cst_39 : f32 to vector<2x32xf32>
    %88 = arith.addf %86, %87 : vector<2x32xf32>
    %89 = vector.extract_strided_slice %74 {offsets = [0, 32], sizes = [2, 32], strides = [1, 1]} : vector<2x96xf32> to vector<2x32xf32>
    %90 = vector.extract_strided_slice %78 {offsets = [0, 32], sizes = [2, 32], strides = [1, 1]} : vector<2x96xf32> to vector<2x32xf32>
    %91 = arith.addf %89, %90 : vector<2x32xf32>
    %cst_40 = arith.constant 5.000000e-01 : f32
    %92 = vector.broadcast %cst_40 : f32 to vector<2x32xf32>
    %93 = arith.mulf %92, %91 : vector<2x32xf32>
    %94 = math.tanh %93 : vector<2x32xf32>
    %cst_41 = arith.constant 5.000000e-01 : f32
    %95 = vector.broadcast %cst_41 : f32 to vector<2x32xf32>
    %96 = arith.mulf %95, %94 : vector<2x32xf32>
    %cst_42 = arith.constant 5.000000e-01 : f32
    %97 = vector.broadcast %cst_42 : f32 to vector<2x32xf32>
    %98 = arith.addf %96, %97 : vector<2x32xf32>
    %99 = vector.extract_strided_slice %74 {offsets = [0, 64], sizes = [2, 32], strides = [1, 1]} : vector<2x96xf32> to vector<2x32xf32>
    %100 = vector.extract_strided_slice %78 {offsets = [0, 64], sizes = [2, 32], strides = [1, 1]} : vector<2x96xf32> to vector<2x32xf32>
    %101 = arith.mulf %88, %100 : vector<2x32xf32>
    %102 = arith.addf %99, %101 : vector<2x32xf32>
    %103 = math.tanh %102 : vector<2x32xf32>
    %cst_43 = arith.constant 1.000000e+00 : f32
    %104 = vector.broadcast %cst_43 : f32 to vector<2x32xf32>
    %105 = arith.subf %104, %98 : vector<2x32xf32>
    %106 = arith.mulf %105, %103 : vector<2x32xf32>
    %107 = arith.mulf %98, %12 : vector<2x32xf32>
    %108 = arith.addf %106, %107 : vector<2x32xf32>
    %cst_44 = arith.constant 0.000000e+00 : f32
    %109 = vector.broadcast %cst_44 : f32 to vector<2x1xf32>
    %110 = arith.cmpf ogt, %71, %109 : vector<2x1xf32>
    %111 = vector.shape_cast %110 : vector<2x1xi1> to vector<2x1xi1>
    %112 = vector.broadcast %111 : vector<2x1xi1> to vector<2x32xi1>
    %113 = arith.select %112, %108, %12 : vector<2x32xi1>, vector<2x32xf32>
    %cst_45 = arith.constant 0.000000e+00 : f32
    %114 = vector.broadcast %cst_45 : f32 to vector<2x1xf32>
    %115 = arith.cmpf ogt, %71, %114 : vector<2x1xf32>
    %cst_46 = arith.constant 0.000000e+00 : f32
    %116 = vector.shape_cast %115 : vector<2x1xi1> to vector<2x1xi1>
    %117 = vector.broadcast %116 : vector<2x1xi1> to vector<2x32xi1>
    %118 = vector.broadcast %cst_46 : f32 to vector<2x32xf32>
    %119 = arith.select %117, %108, %118 : vector<2x32xi1>, vector<2x32xf32>
    %120 = arith.index_cast %68 : i32 to index
    %c0_47 = arith.constant 0 : index
    %c0_48 = arith.constant 0 : index
    %121 = vector.load %arg8[%120, %c0_47, %c0_48] : memref<8x2x32xf32, #tpu.memory_space<vmem>>, vector<1x2x32xf32>
    %122 = vector.shape_cast %121 : vector<1x2x32xf32> to vector<2x32xf32>
    %123 = vector.shape_cast %119 : vector<2x32xf32> to vector<1x2x32xf32>
    tpu.vector_store %arg8[%120, %c0_47, %c0_48], %123 {strides = array<i32>} : memref<8x2x32xf32, #tpu.memory_space<vmem>>, vector<1x2x32xf32>,
    %c1_i32 = arith.constant 1 : i32
    %124 = arith.index_cast %c1_i32 : i32 to index
    %c0_49 = arith.constant 0 : index
    %c0_50 = arith.constant 0 : index
    %125 = vector.load %arg3[%124, %c0_49, %c0_50] : memref<8x2x1xf32, #tpu.memory_space<vmem>>, vector<1x2x1xf32>
    %126 = vector.shape_cast %125 : vector<1x2x1xf32> to vector<2x1xf32>
    %127 = arith.index_cast %c1_i32 : i32 to index
    %c0_51 = arith.constant 0 : index
    %c0_52 = arith.constant 0 : index
    %128 = vector.load %arg1[%127, %c0_51, %c0_52] : memref<8x2x96xf32, #tpu.memory_space<vmem>>, vector<1x2x96xf32>
    %129 = vector.shape_cast %128 : vector<1x2x96xf32> to vector<2x96xf32>
    %130 = arith.truncf %57 : vector<2x32xf32> to vector<2x32xbf16>
    %cst_53 = arith.constant dense<0.000000e+00> : vector<2x96xf32>
    %131 = tpu.matmul %130, %4, %cst_53 {dimension_numbers = #tpu.dot_dimension_numbers<[1], [0], [0], [1], [0, 0, 1, 1], [], []>} : vector<2x32xbf16>, vector<32x96xbf16>, vector<2x96xf32> -> vector<2x96xf32>
    %132 = vector.broadcast %8 : vector<1x96xf32> to vector<2x96xf32>
    %133 = arith.addf %131, %132 : vector<2x96xf32>
    %134 = vector.extract_strided_slice %129 {offsets = [0, 0], sizes = [2, 32], strides = [1, 1]} : vector<2x96xf32> to vector<2x32xf32>
    %135 = vector.extract_strided_slice %133 {offsets = [0, 0], sizes = [2, 32], strides = [1, 1]} : vector<2x96xf32> to vector<2x32xf32>
    %136 = arith.addf %134, %135 : vector<2x32xf32>
    %cst_54 = arith.constant 5.000000e-01 : f32
    %137 = vector.broadcast %cst_54 : f32 to vector<2x32xf32>
    %138 = arith.mulf %137, %136 : vector<2x32xf32>
    %139 = math.tanh %138 : vector<2x32xf32>
    %cst_55 = arith.constant 5.000000e-01 : f32
    %140 = vector.broadcast %cst_55 : f32 to vector<2x32xf32>
    %141 = arith.mulf %140, %139 : vector<2x32xf32>
    %cst_56 = arith.constant 5.000000e-01 : f32
    %142 = vector.broadcast %cst_56 : f32 to vector<2x32xf32>
    %143 = arith.addf %141, %142 : vector<2x32xf32>
    %144 = vector.extract_strided_slice %129 {offsets = [0, 32], sizes = [2, 32], strides = [1, 1]} : vector<2x96xf32> to vector<2x32xf32>
    %145 = vector.extract_strided_slice %133 {offsets = [0, 32], sizes = [2, 32], strides = [1, 1]} : vector<2x96xf32> to vector<2x32xf32>
    %146 = arith.addf %144, %145 : vector<2x32xf32>
    %cst_57 = arith.constant 5.000000e-01 : f32
    %147 = vector.broadcast %cst_57 : f32 to vector<2x32xf32>
    %148 = arith.mulf %147, %146 : vector<2x32xf32>
    %149 = math.tanh %148 : vector<2x32xf32>
    %cst_58 = arith.constant 5.000000e-01 : f32
    %150 = vector.broadcast %cst_58 : f32 to vector<2x32xf32>
    %151 = arith.mulf %150, %149 : vector<2x32xf32>
    %cst_59 = arith.constant 5.000000e-01 : f32
    %152 = vector.broadcast %cst_59 : f32 to vector<2x32xf32>
    %153 = arith.addf %151, %152 : vector<2x32xf32>
    %154 = vector.extract_strided_slice %129 {offsets = [0, 64], sizes = [2, 32], strides = [1, 1]} : vector<2x96xf32> to vector<2x32xf32>
    %155 = vector.extract_strided_slice %133 {offsets = [0, 64], sizes = [2, 32], strides = [1, 1]} : vector<2x96xf32> to vector<2x32xf32>
    %156 = arith.mulf %143, %155 : vector<2x32xf32>
    %157 = arith.addf %154, %156 : vector<2x32xf32>
    %158 = math.tanh %157 : vector<2x32xf32>
    %cst_60 = arith.constant 1.000000e+00 : f32
    %159 = vector.broadcast %cst_60 : f32 to vector<2x32xf32>
    %160 = arith.subf %159, %153 : vector<2x32xf32>
    %161 = arith.mulf %160, %158 : vector<2x32xf32>
    %162 = arith.mulf %153, %57 : vector<2x32xf32>
    %163 = arith.addf %161, %162 : vector<2x32xf32>
    %cst_61 = arith.constant 0.000000e+00 : f32
    %164 = vector.broadcast %cst_61 : f32 to vector<2x1xf32>
    %165 = arith.cmpf ogt, %126, %164 : vector<2x1xf32>
    %166 = vector.shape_cast %165 : vector<2x1xi1> to vector<2x1xi1>
    %167 = vector.broadcast %166 : vector<2x1xi1> to vector<2x32xi1>
    %168 = arith.select %167, %163, %57 : vector<2x32xi1>, vector<2x32xf32>
    %cst_62 = arith.constant 0.000000e+00 : f32
    %169 = vector.broadcast %cst_62 : f32 to vector<2x1xf32>
    %170 = arith.cmpf ogt, %126, %169 : vector<2x1xf32>
    %cst_63 = arith.constant 0.000000e+00 : f32
    %171 = vector.shape_cast %170 : vector<2x1xi1> to vector<2x1xi1>
    %172 = vector.broadcast %171 : vector<2x1xi1> to vector<2x32xi1>
    %173 = vector.broadcast %cst_63 : f32 to vector<2x32xf32>
    %174 = arith.select %172, %163, %173 : vector<2x32xi1>, vector<2x32xf32>
    %175 = arith.index_cast %c1_i32 : i32 to index
    %c0_64 = arith.constant 0 : index
    %c0_65 = arith.constant 0 : index
    %176 = vector.load %arg7[%175, %c0_64, %c0_65] : memref<8x2x32xf32, #tpu.memory_space<vmem>>, vector<1x2x32xf32>
    %177 = vector.shape_cast %176 : vector<1x2x32xf32> to vector<2x32xf32>
    %178 = vector.shape_cast %174 : vector<2x32xf32> to vector<1x2x32xf32>
    tpu.vector_store %arg7[%175, %c0_64, %c0_65], %178 {strides = array<i32>} : memref<8x2x32xf32, #tpu.memory_space<vmem>>, vector<1x2x32xf32>,
    %c7_i32_66 = arith.constant 7 : i32
    %179 = arith.subi %c7_i32_66, %c1_i32 : i32
    %180 = arith.index_cast %179 : i32 to index
    %c0_67 = arith.constant 0 : index
    %c0_68 = arith.constant 0 : index
    %181 = vector.load %arg4[%180, %c0_67, %c0_68] : memref<8x2x1xf32, #tpu.memory_space<vmem>>, vector<1x2x1xf32>
    %182 = vector.shape_cast %181 : vector<1x2x1xf32> to vector<2x1xf32>
    %183 = arith.index_cast %179 : i32 to index
    %c0_69 = arith.constant 0 : index
    %c0_70 = arith.constant 0 : index
    %184 = vector.load %arg2[%183, %c0_69, %c0_70] : memref<8x2x96xf32, #tpu.memory_space<vmem>>, vector<1x2x96xf32>
    %185 = vector.shape_cast %184 : vector<1x2x96xf32> to vector<2x96xf32>
    %186 = arith.truncf %113 : vector<2x32xf32> to vector<2x32xbf16>
    %cst_71 = arith.constant dense<0.000000e+00> : vector<2x96xf32>
    %187 = tpu.matmul %186, %6, %cst_71 {dimension_numbers = #tpu.dot_dimension_numbers<[1], [0], [0], [1], [0, 0, 1, 1], [], []>} : vector<2x32xbf16>, vector<32x96xbf16>, vector<2x96xf32> -> vector<2x96xf32>
    %188 = vector.broadcast %10 : vector<1x96xf32> to vector<2x96xf32>
    %189 = arith.addf %187, %188 : vector<2x96xf32>
    %190 = vector.extract_strided_slice %185 {offsets = [0, 0], sizes = [2, 32], strides = [1, 1]} : vector<2x96xf32> to vector<2x32xf32>
    %191 = vector.extract_strided_slice %189 {offsets = [0, 0], sizes = [2, 32], strides = [1, 1]} : vector<2x96xf32> to vector<2x32xf32>
    %192 = arith.addf %190, %191 : vector<2x32xf32>
    %cst_72 = arith.constant 5.000000e-01 : f32
    %193 = vector.broadcast %cst_72 : f32 to vector<2x32xf32>
    %194 = arith.mulf %193, %192 : vector<2x32xf32>
    %195 = math.tanh %194 : vector<2x32xf32>
    %cst_73 = arith.constant 5.000000e-01 : f32
    %196 = vector.broadcast %cst_73 : f32 to vector<2x32xf32>
    %197 = arith.mulf %196, %195 : vector<2x32xf32>
    %cst_74 = arith.constant 5.000000e-01 : f32
    %198 = vector.broadcast %cst_74 : f32 to vector<2x32xf32>
    %199 = arith.addf %197, %198 : vector<2x32xf32>
    %200 = vector.extract_strided_slice %185 {offsets = [0, 32], sizes = [2, 32], strides = [1, 1]} : vector<2x96xf32> to vector<2x32xf32>
    %201 = vector.extract_strided_slice %189 {offsets = [0, 32], sizes = [2, 32], strides = [1, 1]} : vector<2x96xf32> to vector<2x32xf32>
    %202 = arith.addf %200, %201 : vector<2x32xf32>
    %cst_75 = arith.constant 5.000000e-01 : f32
    %203 = vector.broadcast %cst_75 : f32 to vector<2x32xf32>
    %204 = arith.mulf %203, %202 : vector<2x32xf32>
    %205 = math.tanh %204 : vector<2x32xf32>
    %cst_76 = arith.constant 5.000000e-01 : f32
    %206 = vector.broadcast %cst_76 : f32 to vector<2x32xf32>
    %207 = arith.mulf %206, %205 : vector<2x32xf32>
    %cst_77 = arith.constant 5.000000e-01 : f32
    %208 = vector.broadcast %cst_77 : f32 to vector<2x32xf32>
    %209 = arith.addf %207, %208 : vector<2x32xf32>
    %210 = vector.extract_strided_slice %185 {offsets = [0, 64], sizes = [2, 32], strides = [1, 1]} : vector<2x96xf32> to vector<2x32xf32>
    %211 = vector.extract_strided_slice %189 {offsets = [0, 64], sizes = [2, 32], strides = [1, 1]} : vector<2x96xf32> to vector<2x32xf32>
    %212 = arith.mulf %199, %211 : vector<2x32xf32>
    %213 = arith.addf %210, %212 : vector<2x32xf32>
    %214 = math.tanh %213 : vector<2x32xf32>
    %cst_78 = arith.constant 1.000000e+00 : f32
    %215 = vector.broadcast %cst_78 : f32 to vector<2x32xf32>
    %216 = arith.subf %215, %209 : vector<2x32xf32>
    %217 = arith.mulf %216, %214 : vector<2x32xf32>
    %218 = arith.mulf %209, %113 : vector<2x32xf32>
    %219 = arith.addf %217, %218 : vector<2x32xf32>
    %cst_79 = arith.constant 0.000000e+00 : f32
    %220 = vector.broadcast %cst_79 : f32 to vector<2x1xf32>
    %221 = arith.cmpf ogt, %182, %220 : vector<2x1xf32>
    %222 = vector.shape_cast %221 : vector<2x1xi1> to vector<2x1xi1>
    %223 = vector.broadcast %222 : vector<2x1xi1> to vector<2x32xi1>
    %224 = arith.select %223, %219, %113 : vector<2x32xi1>, vector<2x32xf32>
    %cst_80 = arith.constant 0.000000e+00 : f32
    %225 = vector.broadcast %cst_80 : f32 to vector<2x1xf32>
    %226 = arith.cmpf ogt, %182, %225 : vector<2x1xf32>
    %cst_81 = arith.constant 0.000000e+00 : f32
    %227 = vector.shape_cast %226 : vector<2x1xi1> to vector<2x1xi1>
    %228 = vector.broadcast %227 : vector<2x1xi1> to vector<2x32xi1>
    %229 = vector.broadcast %cst_81 : f32 to vector<2x32xf32>
    %230 = arith.select %228, %219, %229 : vector<2x32xi1>, vector<2x32xf32>
    %231 = arith.index_cast %179 : i32 to index
    %c0_82 = arith.constant 0 : index
    %c0_83 = arith.constant 0 : index
    %232 = vector.load %arg8[%231, %c0_82, %c0_83] : memref<8x2x32xf32, #tpu.memory_space<vmem>>, vector<1x2x32xf32>
    %233 = vector.shape_cast %232 : vector<1x2x32xf32> to vector<2x32xf32>
    %234 = vector.shape_cast %230 : vector<2x32xf32> to vector<1x2x32xf32>
    tpu.vector_store %arg8[%231, %c0_82, %c0_83], %234 {strides = array<i32>} : memref<8x2x32xf32, #tpu.memory_space<vmem>>, vector<1x2x32xf32>,
    %c2_i32 = arith.constant 2 : i32
    %235 = arith.index_cast %c2_i32 : i32 to index
    %c0_84 = arith.constant 0 : index
    %c0_85 = arith.constant 0 : index
    %236 = vector.load %arg3[%235, %c0_84, %c0_85] : memref<8x2x1xf32, #tpu.memory_space<vmem>>, vector<1x2x1xf32>
    %237 = vector.shape_cast %236 : vector<1x2x1xf32> to vector<2x1xf32>
    %238 = arith.index_cast %c2_i32 : i32 to index
    %c0_86 = arith.constant 0 : index
    %c0_87 = arith.constant 0 : index
    %239 = vector.load %arg1[%238, %c0_86, %c0_87] : memref<8x2x96xf32, #tpu.memory_space<vmem>>, vector<1x2x96xf32>
    %240 = vector.shape_cast %239 : vector<1x2x96xf32> to vector<2x96xf32>
    %241 = arith.truncf %168 : vector<2x32xf32> to vector<2x32xbf16>
    %cst_88 = arith.constant dense<0.000000e+00> : vector<2x96xf32>
    %242 = tpu.matmul %241, %4, %cst_88 {dimension_numbers = #tpu.dot_dimension_numbers<[1], [0], [0], [1], [0, 0, 1, 1], [], []>} : vector<2x32xbf16>, vector<32x96xbf16>, vector<2x96xf32> -> vector<2x96xf32>
    %243 = vector.broadcast %8 : vector<1x96xf32> to vector<2x96xf32>
    %244 = arith.addf %242, %243 : vector<2x96xf32>
    %245 = vector.extract_strided_slice %240 {offsets = [0, 0], sizes = [2, 32], strides = [1, 1]} : vector<2x96xf32> to vector<2x32xf32>
    %246 = vector.extract_strided_slice %244 {offsets = [0, 0], sizes = [2, 32], strides = [1, 1]} : vector<2x96xf32> to vector<2x32xf32>
    %247 = arith.addf %245, %246 : vector<2x32xf32>
    %cst_89 = arith.constant 5.000000e-01 : f32
    %248 = vector.broadcast %cst_89 : f32 to vector<2x32xf32>
    %249 = arith.mulf %248, %247 : vector<2x32xf32>
    %250 = math.tanh %249 : vector<2x32xf32>
    %cst_90 = arith.constant 5.000000e-01 : f32
    %251 = vector.broadcast %cst_90 : f32 to vector<2x32xf32>
    %252 = arith.mulf %251, %250 : vector<2x32xf32>
    %cst_91 = arith.constant 5.000000e-01 : f32
    %253 = vector.broadcast %cst_91 : f32 to vector<2x32xf32>
    %254 = arith.addf %252, %253 : vector<2x32xf32>
    %255 = vector.extract_strided_slice %240 {offsets = [0, 32], sizes = [2, 32], strides = [1, 1]} : vector<2x96xf32> to vector<2x32xf32>
    %256 = vector.extract_strided_slice %244 {offsets = [0, 32], sizes = [2, 32], strides = [1, 1]} : vector<2x96xf32> to vector<2x32xf32>
    %257 = arith.addf %255, %256 : vector<2x32xf32>
    %cst_92 = arith.constant 5.000000e-01 : f32
    %258 = vector.broadcast %cst_92 : f32 to vector<2x32xf32>
    %259 = arith.mulf %258, %257 : vector<2x32xf32>
    %260 = math.tanh %259 : vector<2x32xf32>
    %cst_93 = arith.constant 5.000000e-01 : f32
    %261 = vector.broadcast %cst_93 : f32 to vector<2x32xf32>
    %262 = arith.mulf %261, %260 : vector<2x32xf32>
    %cst_94 = arith.constant 5.000000e-01 : f32
    %263 = vector.broadcast %cst_94 : f32 to vector<2x32xf32>
    %264 = arith.addf %262, %263 : vector<2x32xf32>
    %265 = vector.extract_strided_slice %240 {offsets = [0, 64], sizes = [2, 32], strides = [1, 1]} : vector<2x96xf32> to vector<2x32xf32>
    %266 = vector.extract_strided_slice %244 {offsets = [0, 64], sizes = [2, 32], strides = [1, 1]} : vector<2x96xf32> to vector<2x32xf32>
    %267 = arith.mulf %254, %266 : vector<2x32xf32>
    %268 = arith.addf %265, %267 : vector<2x32xf32>
    %269 = math.tanh %268 : vector<2x32xf32>
    %cst_95 = arith.constant 1.000000e+00 : f32
    %270 = vector.broadcast %cst_95 : f32 to vector<2x32xf32>
    %271 = arith.subf %270, %264 : vector<2x32xf32>
    %272 = arith.mulf %271, %269 : vector<2x32xf32>
    %273 = arith.mulf %264, %168 : vector<2x32xf32>
    %274 = arith.addf %272, %273 : vector<2x32xf32>
    %cst_96 = arith.constant 0.000000e+00 : f32
    %275 = vector.broadcast %cst_96 : f32 to vector<2x1xf32>
    %276 = arith.cmpf ogt, %237, %275 : vector<2x1xf32>
    %277 = vector.shape_cast %276 : vector<2x1xi1> to vector<2x1xi1>
    %278 = vector.broadcast %277 : vector<2x1xi1> to vector<2x32xi1>
    %279 = arith.select %278, %274, %168 : vector<2x32xi1>, vector<2x32xf32>
    %cst_97 = arith.constant 0.000000e+00 : f32
    %280 = vector.broadcast %cst_97 : f32 to vector<2x1xf32>
    %281 = arith.cmpf ogt, %237, %280 : vector<2x1xf32>
    %cst_98 = arith.constant 0.000000e+00 : f32
    %282 = vector.shape_cast %281 : vector<2x1xi1> to vector<2x1xi1>
    %283 = vector.broadcast %282 : vector<2x1xi1> to vector<2x32xi1>
    %284 = vector.broadcast %cst_98 : f32 to vector<2x32xf32>
    %285 = arith.select %283, %274, %284 : vector<2x32xi1>, vector<2x32xf32>
    %286 = arith.index_cast %c2_i32 : i32 to index
    %c0_99 = arith.constant 0 : index
    %c0_100 = arith.constant 0 : index
    %287 = vector.load %arg7[%286, %c0_99, %c0_100] : memref<8x2x32xf32, #tpu.memory_space<vmem>>, vector<1x2x32xf32>
    %288 = vector.shape_cast %287 : vector<1x2x32xf32> to vector<2x32xf32>
    %289 = vector.shape_cast %285 : vector<2x32xf32> to vector<1x2x32xf32>
    tpu.vector_store %arg7[%286, %c0_99, %c0_100], %289 {strides = array<i32>} : memref<8x2x32xf32, #tpu.memory_space<vmem>>, vector<1x2x32xf32>,
    %c7_i32_101 = arith.constant 7 : i32
    %290 = arith.subi %c7_i32_101, %c2_i32 : i32
    %291 = arith.index_cast %290 : i32 to index
    %c0_102 = arith.constant 0 : index
    %c0_103 = arith.constant 0 : index
    %292 = vector.load %arg4[%291, %c0_102, %c0_103] : memref<8x2x1xf32, #tpu.memory_space<vmem>>, vector<1x2x1xf32>
    %293 = vector.shape_cast %292 : vector<1x2x1xf32> to vector<2x1xf32>
    %294 = arith.index_cast %290 : i32 to index
    %c0_104 = arith.constant 0 : index
    %c0_105 = arith.constant 0 : index
    %295 = vector.load %arg2[%294, %c0_104, %c0_105] : memref<8x2x96xf32, #tpu.memory_space<vmem>>, vector<1x2x96xf32>
    %296 = vector.shape_cast %295 : vector<1x2x96xf32> to vector<2x96xf32>
    %297 = arith.truncf %224 : vector<2x32xf32> to vector<2x32xbf16>
    %cst_106 = arith.constant dense<0.000000e+00> : vector<2x96xf32>
    %298 = tpu.matmul %297, %6, %cst_106 {dimension_numbers = #tpu.dot_dimension_numbers<[1], [0], [0], [1], [0, 0, 1, 1], [], []>} : vector<2x32xbf16>, vector<32x96xbf16>, vector<2x96xf32> -> vector<2x96xf32>
    %299 = vector.broadcast %10 : vector<1x96xf32> to vector<2x96xf32>
    %300 = arith.addf %298, %299 : vector<2x96xf32>
    %301 = vector.extract_strided_slice %296 {offsets = [0, 0], sizes = [2, 32], strides = [1, 1]} : vector<2x96xf32> to vector<2x32xf32>
    %302 = vector.extract_strided_slice %300 {offsets = [0, 0], sizes = [2, 32], strides = [1, 1]} : vector<2x96xf32> to vector<2x32xf32>
    %303 = arith.addf %301, %302 : vector<2x32xf32>
    %cst_107 = arith.constant 5.000000e-01 : f32
    %304 = vector.broadcast %cst_107 : f32 to vector<2x32xf32>
    %305 = arith.mulf %304, %303 : vector<2x32xf32>
    %306 = math.tanh %305 : vector<2x32xf32>
    %cst_108 = arith.constant 5.000000e-01 : f32
    %307 = vector.broadcast %cst_108 : f32 to vector<2x32xf32>
    %308 = arith.mulf %307, %306 : vector<2x32xf32>
    %cst_109 = arith.constant 5.000000e-01 : f32
    %309 = vector.broadcast %cst_109 : f32 to vector<2x32xf32>
    %310 = arith.addf %308, %309 : vector<2x32xf32>
    %311 = vector.extract_strided_slice %296 {offsets = [0, 32], sizes = [2, 32], strides = [1, 1]} : vector<2x96xf32> to vector<2x32xf32>
    %312 = vector.extract_strided_slice %300 {offsets = [0, 32], sizes = [2, 32], strides = [1, 1]} : vector<2x96xf32> to vector<2x32xf32>
    %313 = arith.addf %311, %312 : vector<2x32xf32>
    %cst_110 = arith.constant 5.000000e-01 : f32
    %314 = vector.broadcast %cst_110 : f32 to vector<2x32xf32>
    %315 = arith.mulf %314, %313 : vector<2x32xf32>
    %316 = math.tanh %315 : vector<2x32xf32>
    %cst_111 = arith.constant 5.000000e-01 : f32
    %317 = vector.broadcast %cst_111 : f32 to vector<2x32xf32>
    %318 = arith.mulf %317, %316 : vector<2x32xf32>
    %cst_112 = arith.constant 5.000000e-01 : f32
    %319 = vector.broadcast %cst_112 : f32 to vector<2x32xf32>
    %320 = arith.addf %318, %319 : vector<2x32xf32>
    %321 = vector.extract_strided_slice %296 {offsets = [0, 64], sizes = [2, 32], strides = [1, 1]} : vector<2x96xf32> to vector<2x32xf32>
    %322 = vector.extract_strided_slice %300 {offsets = [0, 64], sizes = [2, 32], strides = [1, 1]} : vector<2x96xf32> to vector<2x32xf32>
    %323 = arith.mulf %310, %322 : vector<2x32xf32>
    %324 = arith.addf %321, %323 : vector<2x32xf32>
    %325 = math.tanh %324 : vector<2x32xf32>
    %cst_113 = arith.constant 1.000000e+00 : f32
    %326 = vector.broadcast %cst_113 : f32 to vector<2x32xf32>
    %327 = arith.subf %326, %320 : vector<2x32xf32>
    %328 = arith.mulf %327, %325 : vector<2x32xf32>
    %329 = arith.mulf %320, %224 : vector<2x32xf32>
    %330 = arith.addf %328, %329 : vector<2x32xf32>
    %cst_114 = arith.constant 0.000000e+00 : f32
    %331 = vector.broadcast %cst_114 : f32 to vector<2x1xf32>
    %332 = arith.cmpf ogt, %293, %331 : vector<2x1xf32>
    %333 = vector.shape_cast %332 : vector<2x1xi1> to vector<2x1xi1>
    %334 = vector.broadcast %333 : vector<2x1xi1> to vector<2x32xi1>
    %335 = arith.select %334, %330, %224 : vector<2x32xi1>, vector<2x32xf32>
    %cst_115 = arith.constant 0.000000e+00 : f32
    %336 = vector.broadcast %cst_115 : f32 to vector<2x1xf32>
    %337 = arith.cmpf ogt, %293, %336 : vector<2x1xf32>
    %cst_116 = arith.constant 0.000000e+00 : f32
    %338 = vector.shape_cast %337 : vector<2x1xi1> to vector<2x1xi1>
    %339 = vector.broadcast %338 : vector<2x1xi1> to vector<2x32xi1>
    %340 = vector.broadcast %cst_116 : f32 to vector<2x32xf32>
    %341 = arith.select %339, %330, %340 : vector<2x32xi1>, vector<2x32xf32>
    %342 = arith.index_cast %290 : i32 to index
    %c0_117 = arith.constant 0 : index
    %c0_118 = arith.constant 0 : index
    %343 = vector.load %arg8[%342, %c0_117, %c0_118] : memref<8x2x32xf32, #tpu.memory_space<vmem>>, vector<1x2x32xf32>
    %344 = vector.shape_cast %343 : vector<1x2x32xf32> to vector<2x32xf32>
    %345 = vector.shape_cast %341 : vector<2x32xf32> to vector<1x2x32xf32>
    tpu.vector_store %arg8[%342, %c0_117, %c0_118], %345 {strides = array<i32>} : memref<8x2x32xf32, #tpu.memory_space<vmem>>, vector<1x2x32xf32>,
    %c3_i32 = arith.constant 3 : i32
    %346 = arith.index_cast %c3_i32 : i32 to index
    %c0_119 = arith.constant 0 : index
    %c0_120 = arith.constant 0 : index
    %347 = vector.load %arg3[%346, %c0_119, %c0_120] : memref<8x2x1xf32, #tpu.memory_space<vmem>>, vector<1x2x1xf32>
    %348 = vector.shape_cast %347 : vector<1x2x1xf32> to vector<2x1xf32>
    %349 = arith.index_cast %c3_i32 : i32 to index
    %c0_121 = arith.constant 0 : index
    %c0_122 = arith.constant 0 : index
    %350 = vector.load %arg1[%349, %c0_121, %c0_122] : memref<8x2x96xf32, #tpu.memory_space<vmem>>, vector<1x2x96xf32>
    %351 = vector.shape_cast %350 : vector<1x2x96xf32> to vector<2x96xf32>
    %352 = arith.truncf %279 : vector<2x32xf32> to vector<2x32xbf16>
    %cst_123 = arith.constant dense<0.000000e+00> : vector<2x96xf32>
    %353 = tpu.matmul %352, %4, %cst_123 {dimension_numbers = #tpu.dot_dimension_numbers<[1], [0], [0], [1], [0, 0, 1, 1], [], []>} : vector<2x32xbf16>, vector<32x96xbf16>, vector<2x96xf32> -> vector<2x96xf32>
    %354 = vector.broadcast %8 : vector<1x96xf32> to vector<2x96xf32>
    %355 = arith.addf %353, %354 : vector<2x96xf32>
    %356 = vector.extract_strided_slice %351 {offsets = [0, 0], sizes = [2, 32], strides = [1, 1]} : vector<2x96xf32> to vector<2x32xf32>
    %357 = vector.extract_strided_slice %355 {offsets = [0, 0], sizes = [2, 32], strides = [1, 1]} : vector<2x96xf32> to vector<2x32xf32>
    %358 = arith.addf %356, %357 : vector<2x32xf32>
    %cst_124 = arith.constant 5.000000e-01 : f32
    %359 = vector.broadcast %cst_124 : f32 to vector<2x32xf32>
    %360 = arith.mulf %359, %358 : vector<2x32xf32>
    %361 = math.tanh %360 : vector<2x32xf32>
    %cst_125 = arith.constant 5.000000e-01 : f32
    %362 = vector.broadcast %cst_125 : f32 to vector<2x32xf32>
    %363 = arith.mulf %362, %361 : vector<2x32xf32>
    %cst_126 = arith.constant 5.000000e-01 : f32
    %364 = vector.broadcast %cst_126 : f32 to vector<2x32xf32>
    %365 = arith.addf %363, %364 : vector<2x32xf32>
    %366 = vector.extract_strided_slice %351 {offsets = [0, 32], sizes = [2, 32], strides = [1, 1]} : vector<2x96xf32> to vector<2x32xf32>
    %367 = vector.extract_strided_slice %355 {offsets = [0, 32], sizes = [2, 32], strides = [1, 1]} : vector<2x96xf32> to vector<2x32xf32>
    %368 = arith.addf %366, %367 : vector<2x32xf32>
    %cst_127 = arith.constant 5.000000e-01 : f32
    %369 = vector.broadcast %cst_127 : f32 to vector<2x32xf32>
    %370 = arith.mulf %369, %368 : vector<2x32xf32>
    %371 = math.tanh %370 : vector<2x32xf32>
    %cst_128 = arith.constant 5.000000e-01 : f32
    %372 = vector.broadcast %cst_128 : f32 to vector<2x32xf32>
    %373 = arith.mulf %372, %371 : vector<2x32xf32>
    %cst_129 = arith.constant 5.000000e-01 : f32
    %374 = vector.broadcast %cst_129 : f32 to vector<2x32xf32>
    %375 = arith.addf %373, %374 : vector<2x32xf32>
    %376 = vector.extract_strided_slice %351 {offsets = [0, 64], sizes = [2, 32], strides = [1, 1]} : vector<2x96xf32> to vector<2x32xf32>
    %377 = vector.extract_strided_slice %355 {offsets = [0, 64], sizes = [2, 32], strides = [1, 1]} : vector<2x96xf32> to vector<2x32xf32>
    %378 = arith.mulf %365, %377 : vector<2x32xf32>
    %379 = arith.addf %376, %378 : vector<2x32xf32>
    %380 = math.tanh %379 : vector<2x32xf32>
    %cst_130 = arith.constant 1.000000e+00 : f32
    %381 = vector.broadcast %cst_130 : f32 to vector<2x32xf32>
    %382 = arith.subf %381, %375 : vector<2x32xf32>
    %383 = arith.mulf %382, %380 : vector<2x32xf32>
    %384 = arith.mulf %375, %279 : vector<2x32xf32>
    %385 = arith.addf %383, %384 : vector<2x32xf32>
    %cst_131 = arith.constant 0.000000e+00 : f32
    %386 = vector.broadcast %cst_131 : f32 to vector<2x1xf32>
    %387 = arith.cmpf ogt, %348, %386 : vector<2x1xf32>
    %388 = vector.shape_cast %387 : vector<2x1xi1> to vector<2x1xi1>
    %389 = vector.broadcast %388 : vector<2x1xi1> to vector<2x32xi1>
    %390 = arith.select %389, %385, %279 : vector<2x32xi1>, vector<2x32xf32>
    %cst_132 = arith.constant 0.000000e+00 : f32
    %391 = vector.broadcast %cst_132 : f32 to vector<2x1xf32>
    %392 = arith.cmpf ogt, %348, %391 : vector<2x1xf32>
    %cst_133 = arith.constant 0.000000e+00 : f32
    %393 = vector.shape_cast %392 : vector<2x1xi1> to vector<2x1xi1>
    %394 = vector.broadcast %393 : vector<2x1xi1> to vector<2x32xi1>
    %395 = vector.broadcast %cst_133 : f32 to vector<2x32xf32>
    %396 = arith.select %394, %385, %395 : vector<2x32xi1>, vector<2x32xf32>
    %397 = arith.index_cast %c3_i32 : i32 to index
    %c0_134 = arith.constant 0 : index
    %c0_135 = arith.constant 0 : index
    %398 = vector.load %arg7[%397, %c0_134, %c0_135] : memref<8x2x32xf32, #tpu.memory_space<vmem>>, vector<1x2x32xf32>
    %399 = vector.shape_cast %398 : vector<1x2x32xf32> to vector<2x32xf32>
    %400 = vector.shape_cast %396 : vector<2x32xf32> to vector<1x2x32xf32>
    tpu.vector_store %arg7[%397, %c0_134, %c0_135], %400 {strides = array<i32>} : memref<8x2x32xf32, #tpu.memory_space<vmem>>, vector<1x2x32xf32>,
    %c7_i32_136 = arith.constant 7 : i32
    %401 = arith.subi %c7_i32_136, %c3_i32 : i32
    %402 = arith.index_cast %401 : i32 to index
    %c0_137 = arith.constant 0 : index
    %c0_138 = arith.constant 0 : index
    %403 = vector.load %arg4[%402, %c0_137, %c0_138] : memref<8x2x1xf32, #tpu.memory_space<vmem>>, vector<1x2x1xf32>
    %404 = vector.shape_cast %403 : vector<1x2x1xf32> to vector<2x1xf32>
    %405 = arith.index_cast %401 : i32 to index
    %c0_139 = arith.constant 0 : index
    %c0_140 = arith.constant 0 : index
    %406 = vector.load %arg2[%405, %c0_139, %c0_140] : memref<8x2x96xf32, #tpu.memory_space<vmem>>, vector<1x2x96xf32>
    %407 = vector.shape_cast %406 : vector<1x2x96xf32> to vector<2x96xf32>
    %408 = arith.truncf %335 : vector<2x32xf32> to vector<2x32xbf16>
    %cst_141 = arith.constant dense<0.000000e+00> : vector<2x96xf32>
    %409 = tpu.matmul %408, %6, %cst_141 {dimension_numbers = #tpu.dot_dimension_numbers<[1], [0], [0], [1], [0, 0, 1, 1], [], []>} : vector<2x32xbf16>, vector<32x96xbf16>, vector<2x96xf32> -> vector<2x96xf32>
    %410 = vector.broadcast %10 : vector<1x96xf32> to vector<2x96xf32>
    %411 = arith.addf %409, %410 : vector<2x96xf32>
    %412 = vector.extract_strided_slice %407 {offsets = [0, 0], sizes = [2, 32], strides = [1, 1]} : vector<2x96xf32> to vector<2x32xf32>
    %413 = vector.extract_strided_slice %411 {offsets = [0, 0], sizes = [2, 32], strides = [1, 1]} : vector<2x96xf32> to vector<2x32xf32>
    %414 = arith.addf %412, %413 : vector<2x32xf32>
    %cst_142 = arith.constant 5.000000e-01 : f32
    %415 = vector.broadcast %cst_142 : f32 to vector<2x32xf32>
    %416 = arith.mulf %415, %414 : vector<2x32xf32>
    %417 = math.tanh %416 : vector<2x32xf32>
    %cst_143 = arith.constant 5.000000e-01 : f32
    %418 = vector.broadcast %cst_143 : f32 to vector<2x32xf32>
    %419 = arith.mulf %418, %417 : vector<2x32xf32>
    %cst_144 = arith.constant 5.000000e-01 : f32
    %420 = vector.broadcast %cst_144 : f32 to vector<2x32xf32>
    %421 = arith.addf %419, %420 : vector<2x32xf32>
    %422 = vector.extract_strided_slice %407 {offsets = [0, 32], sizes = [2, 32], strides = [1, 1]} : vector<2x96xf32> to vector<2x32xf32>
    %423 = vector.extract_strided_slice %411 {offsets = [0, 32], sizes = [2, 32], strides = [1, 1]} : vector<2x96xf32> to vector<2x32xf32>
    %424 = arith.addf %422, %423 : vector<2x32xf32>
    %cst_145 = arith.constant 5.000000e-01 : f32
    %425 = vector.broadcast %cst_145 : f32 to vector<2x32xf32>
    %426 = arith.mulf %425, %424 : vector<2x32xf32>
    %427 = math.tanh %426 : vector<2x32xf32>
    %cst_146 = arith.constant 5.000000e-01 : f32
    %428 = vector.broadcast %cst_146 : f32 to vector<2x32xf32>
    %429 = arith.mulf %428, %427 : vector<2x32xf32>
    %cst_147 = arith.constant 5.000000e-01 : f32
    %430 = vector.broadcast %cst_147 : f32 to vector<2x32xf32>
    %431 = arith.addf %429, %430 : vector<2x32xf32>
    %432 = vector.extract_strided_slice %407 {offsets = [0, 64], sizes = [2, 32], strides = [1, 1]} : vector<2x96xf32> to vector<2x32xf32>
    %433 = vector.extract_strided_slice %411 {offsets = [0, 64], sizes = [2, 32], strides = [1, 1]} : vector<2x96xf32> to vector<2x32xf32>
    %434 = arith.mulf %421, %433 : vector<2x32xf32>
    %435 = arith.addf %432, %434 : vector<2x32xf32>
    %436 = math.tanh %435 : vector<2x32xf32>
    %cst_148 = arith.constant 1.000000e+00 : f32
    %437 = vector.broadcast %cst_148 : f32 to vector<2x32xf32>
    %438 = arith.subf %437, %431 : vector<2x32xf32>
    %439 = arith.mulf %438, %436 : vector<2x32xf32>
    %440 = arith.mulf %431, %335 : vector<2x32xf32>
    %441 = arith.addf %439, %440 : vector<2x32xf32>
    %cst_149 = arith.constant 0.000000e+00 : f32
    %442 = vector.broadcast %cst_149 : f32 to vector<2x1xf32>
    %443 = arith.cmpf ogt, %404, %442 : vector<2x1xf32>
    %444 = vector.shape_cast %443 : vector<2x1xi1> to vector<2x1xi1>
    %445 = vector.broadcast %444 : vector<2x1xi1> to vector<2x32xi1>
    %446 = arith.select %445, %441, %335 : vector<2x32xi1>, vector<2x32xf32>
    %cst_150 = arith.constant 0.000000e+00 : f32
    %447 = vector.broadcast %cst_150 : f32 to vector<2x1xf32>
    %448 = arith.cmpf ogt, %404, %447 : vector<2x1xf32>
    %cst_151 = arith.constant 0.000000e+00 : f32
    %449 = vector.shape_cast %448 : vector<2x1xi1> to vector<2x1xi1>
    %450 = vector.broadcast %449 : vector<2x1xi1> to vector<2x32xi1>
    %451 = vector.broadcast %cst_151 : f32 to vector<2x32xf32>
    %452 = arith.select %450, %441, %451 : vector<2x32xi1>, vector<2x32xf32>
    %453 = arith.index_cast %401 : i32 to index
    %c0_152 = arith.constant 0 : index
    %c0_153 = arith.constant 0 : index
    %454 = vector.load %arg8[%453, %c0_152, %c0_153] : memref<8x2x32xf32, #tpu.memory_space<vmem>>, vector<1x2x32xf32>
    %455 = vector.shape_cast %454 : vector<1x2x32xf32> to vector<2x32xf32>
    %456 = vector.shape_cast %452 : vector<2x32xf32> to vector<1x2x32xf32>
    tpu.vector_store %arg8[%453, %c0_152, %c0_153], %456 {strides = array<i32>} : memref<8x2x32xf32, #tpu.memory_space<vmem>>, vector<1x2x32xf32>,
    %c4_i32 = arith.constant 4 : i32
    %457 = arith.index_cast %c4_i32 : i32 to index
    %c0_154 = arith.constant 0 : index
    %c0_155 = arith.constant 0 : index
    %458 = vector.load %arg3[%457, %c0_154, %c0_155] : memref<8x2x1xf32, #tpu.memory_space<vmem>>, vector<1x2x1xf32>
    %459 = vector.shape_cast %458 : vector<1x2x1xf32> to vector<2x1xf32>
    %460 = arith.index_cast %c4_i32 : i32 to index
    %c0_156 = arith.constant 0 : index
    %c0_157 = arith.constant 0 : index
    %461 = vector.load %arg1[%460, %c0_156, %c0_157] : memref<8x2x96xf32, #tpu.memory_space<vmem>>, vector<1x2x96xf32>
    %462 = vector.shape_cast %461 : vector<1x2x96xf32> to vector<2x96xf32>
    %463 = arith.truncf %390 : vector<2x32xf32> to vector<2x32xbf16>
    %cst_158 = arith.constant dense<0.000000e+00> : vector<2x96xf32>
    %464 = tpu.matmul %463, %4, %cst_158 {dimension_numbers = #tpu.dot_dimension_numbers<[1], [0], [0], [1], [0, 0, 1, 1], [], []>} : vector<2x32xbf16>, vector<32x96xbf16>, vector<2x96xf32> -> vector<2x96xf32>
    %465 = vector.broadcast %8 : vector<1x96xf32> to vector<2x96xf32>
    %466 = arith.addf %464, %465 : vector<2x96xf32>
    %467 = vector.extract_strided_slice %462 {offsets = [0, 0], sizes = [2, 32], strides = [1, 1]} : vector<2x96xf32> to vector<2x32xf32>
    %468 = vector.extract_strided_slice %466 {offsets = [0, 0], sizes = [2, 32], strides = [1, 1]} : vector<2x96xf32> to vector<2x32xf32>
    %469 = arith.addf %467, %468 : vector<2x32xf32>
    %cst_159 = arith.constant 5.000000e-01 : f32
    %470 = vector.broadcast %cst_159 : f32 to vector<2x32xf32>
    %471 = arith.mulf %470, %469 : vector<2x32xf32>
    %472 = math.tanh %471 : vector<2x32xf32>
    %cst_160 = arith.constant 5.000000e-01 : f32
    %473 = vector.broadcast %cst_160 : f32 to vector<2x32xf32>
    %474 = arith.mulf %473, %472 : vector<2x32xf32>
    %cst_161 = arith.constant 5.000000e-01 : f32
    %475 = vector.broadcast %cst_161 : f32 to vector<2x32xf32>
    %476 = arith.addf %474, %475 : vector<2x32xf32>
    %477 = vector.extract_strided_slice %462 {offsets = [0, 32], sizes = [2, 32], strides = [1, 1]} : vector<2x96xf32> to vector<2x32xf32>
    %478 = vector.extract_strided_slice %466 {offsets = [0, 32], sizes = [2, 32], strides = [1, 1]} : vector<2x96xf32> to vector<2x32xf32>
    %479 = arith.addf %477, %478 : vector<2x32xf32>
    %cst_162 = arith.constant 5.000000e-01 : f32
    %480 = vector.broadcast %cst_162 : f32 to vector<2x32xf32>
    %481 = arith.mulf %480, %479 : vector<2x32xf32>
    %482 = math.tanh %481 : vector<2x32xf32>
    %cst_163 = arith.constant 5.000000e-01 : f32
    %483 = vector.broadcast %cst_163 : f32 to vector<2x32xf32>
    %484 = arith.mulf %483, %482 : vector<2x32xf32>
    %cst_164 = arith.constant 5.000000e-01 : f32
    %485 = vector.broadcast %cst_164 : f32 to vector<2x32xf32>
    %486 = arith.addf %484, %485 : vector<2x32xf32>
    %487 = vector.extract_strided_slice %462 {offsets = [0, 64], sizes = [2, 32], strides = [1, 1]} : vector<2x96xf32> to vector<2x32xf32>
    %488 = vector.extract_strided_slice %466 {offsets = [0, 64], sizes = [2, 32], strides = [1, 1]} : vector<2x96xf32> to vector<2x32xf32>
    %489 = arith.mulf %476, %488 : vector<2x32xf32>
    %490 = arith.addf %487, %489 : vector<2x32xf32>
    %491 = math.tanh %490 : vector<2x32xf32>
    %cst_165 = arith.constant 1.000000e+00 : f32
    %492 = vector.broadcast %cst_165 : f32 to vector<2x32xf32>
    %493 = arith.subf %492, %486 : vector<2x32xf32>
    %494 = arith.mulf %493, %491 : vector<2x32xf32>
    %495 = arith.mulf %486, %390 : vector<2x32xf32>
    %496 = arith.addf %494, %495 : vector<2x32xf32>
    %cst_166 = arith.constant 0.000000e+00 : f32
    %497 = vector.broadcast %cst_166 : f32 to vector<2x1xf32>
    %498 = arith.cmpf ogt, %459, %497 : vector<2x1xf32>
    %499 = vector.shape_cast %498 : vector<2x1xi1> to vector<2x1xi1>
    %500 = vector.broadcast %499 : vector<2x1xi1> to vector<2x32xi1>
    %501 = arith.select %500, %496, %390 : vector<2x32xi1>, vector<2x32xf32>
    %cst_167 = arith.constant 0.000000e+00 : f32
    %502 = vector.broadcast %cst_167 : f32 to vector<2x1xf32>
    %503 = arith.cmpf ogt, %459, %502 : vector<2x1xf32>
    %cst_168 = arith.constant 0.000000e+00 : f32
    %504 = vector.shape_cast %503 : vector<2x1xi1> to vector<2x1xi1>
    %505 = vector.broadcast %504 : vector<2x1xi1> to vector<2x32xi1>
    %506 = vector.broadcast %cst_168 : f32 to vector<2x32xf32>
    %507 = arith.select %505, %496, %506 : vector<2x32xi1>, vector<2x32xf32>
    %508 = arith.index_cast %c4_i32 : i32 to index
    %c0_169 = arith.constant 0 : index
    %c0_170 = arith.constant 0 : index
    %509 = vector.load %arg7[%508, %c0_169, %c0_170] : memref<8x2x32xf32, #tpu.memory_space<vmem>>, vector<1x2x32xf32>
    %510 = vector.shape_cast %509 : vector<1x2x32xf32> to vector<2x32xf32>
    %511 = vector.shape_cast %507 : vector<2x32xf32> to vector<1x2x32xf32>
    tpu.vector_store %arg7[%508, %c0_169, %c0_170], %511 {strides = array<i32>} : memref<8x2x32xf32, #tpu.memory_space<vmem>>, vector<1x2x32xf32>,
    %c7_i32_171 = arith.constant 7 : i32
    %512 = arith.subi %c7_i32_171, %c4_i32 : i32
    %513 = arith.index_cast %512 : i32 to index
    %c0_172 = arith.constant 0 : index
    %c0_173 = arith.constant 0 : index
    %514 = vector.load %arg4[%513, %c0_172, %c0_173] : memref<8x2x1xf32, #tpu.memory_space<vmem>>, vector<1x2x1xf32>
    %515 = vector.shape_cast %514 : vector<1x2x1xf32> to vector<2x1xf32>
    %516 = arith.index_cast %512 : i32 to index
    %c0_174 = arith.constant 0 : index
    %c0_175 = arith.constant 0 : index
    %517 = vector.load %arg2[%516, %c0_174, %c0_175] : memref<8x2x96xf32, #tpu.memory_space<vmem>>, vector<1x2x96xf32>
    %518 = vector.shape_cast %517 : vector<1x2x96xf32> to vector<2x96xf32>
    %519 = arith.truncf %446 : vector<2x32xf32> to vector<2x32xbf16>
    %cst_176 = arith.constant dense<0.000000e+00> : vector<2x96xf32>
    %520 = tpu.matmul %519, %6, %cst_176 {dimension_numbers = #tpu.dot_dimension_numbers<[1], [0], [0], [1], [0, 0, 1, 1], [], []>} : vector<2x32xbf16>, vector<32x96xbf16>, vector<2x96xf32> -> vector<2x96xf32>
    %521 = vector.broadcast %10 : vector<1x96xf32> to vector<2x96xf32>
    %522 = arith.addf %520, %521 : vector<2x96xf32>
    %523 = vector.extract_strided_slice %518 {offsets = [0, 0], sizes = [2, 32], strides = [1, 1]} : vector<2x96xf32> to vector<2x32xf32>
    %524 = vector.extract_strided_slice %522 {offsets = [0, 0], sizes = [2, 32], strides = [1, 1]} : vector<2x96xf32> to vector<2x32xf32>
    %525 = arith.addf %523, %524 : vector<2x32xf32>
    %cst_177 = arith.constant 5.000000e-01 : f32
    %526 = vector.broadcast %cst_177 : f32 to vector<2x32xf32>
    %527 = arith.mulf %526, %525 : vector<2x32xf32>
    %528 = math.tanh %527 : vector<2x32xf32>
    %cst_178 = arith.constant 5.000000e-01 : f32
    %529 = vector.broadcast %cst_178 : f32 to vector<2x32xf32>
    %530 = arith.mulf %529, %528 : vector<2x32xf32>
    %cst_179 = arith.constant 5.000000e-01 : f32
    %531 = vector.broadcast %cst_179 : f32 to vector<2x32xf32>
    %532 = arith.addf %530, %531 : vector<2x32xf32>
    %533 = vector.extract_strided_slice %518 {offsets = [0, 32], sizes = [2, 32], strides = [1, 1]} : vector<2x96xf32> to vector<2x32xf32>
    %534 = vector.extract_strided_slice %522 {offsets = [0, 32], sizes = [2, 32], strides = [1, 1]} : vector<2x96xf32> to vector<2x32xf32>
    %535 = arith.addf %533, %534 : vector<2x32xf32>
    %cst_180 = arith.constant 5.000000e-01 : f32
    %536 = vector.broadcast %cst_180 : f32 to vector<2x32xf32>
    %537 = arith.mulf %536, %535 : vector<2x32xf32>
    %538 = math.tanh %537 : vector<2x32xf32>
    %cst_181 = arith.constant 5.000000e-01 : f32
    %539 = vector.broadcast %cst_181 : f32 to vector<2x32xf32>
    %540 = arith.mulf %539, %538 : vector<2x32xf32>
    %cst_182 = arith.constant 5.000000e-01 : f32
    %541 = vector.broadcast %cst_182 : f32 to vector<2x32xf32>
    %542 = arith.addf %540, %541 : vector<2x32xf32>
    %543 = vector.extract_strided_slice %518 {offsets = [0, 64], sizes = [2, 32], strides = [1, 1]} : vector<2x96xf32> to vector<2x32xf32>
    %544 = vector.extract_strided_slice %522 {offsets = [0, 64], sizes = [2, 32], strides = [1, 1]} : vector<2x96xf32> to vector<2x32xf32>
    %545 = arith.mulf %532, %544 : vector<2x32xf32>
    %546 = arith.addf %543, %545 : vector<2x32xf32>
    %547 = math.tanh %546 : vector<2x32xf32>
    %cst_183 = arith.constant 1.000000e+00 : f32
    %548 = vector.broadcast %cst_183 : f32 to vector<2x32xf32>
    %549 = arith.subf %548, %542 : vector<2x32xf32>
    %550 = arith.mulf %549, %547 : vector<2x32xf32>
    %551 = arith.mulf %542, %446 : vector<2x32xf32>
    %552 = arith.addf %550, %551 : vector<2x32xf32>
    %cst_184 = arith.constant 0.000000e+00 : f32
    %553 = vector.broadcast %cst_184 : f32 to vector<2x1xf32>
    %554 = arith.cmpf ogt, %515, %553 : vector<2x1xf32>
    %555 = vector.shape_cast %554 : vector<2x1xi1> to vector<2x1xi1>
    %556 = vector.broadcast %555 : vector<2x1xi1> to vector<2x32xi1>
    %557 = arith.select %556, %552, %446 : vector<2x32xi1>, vector<2x32xf32>
    %cst_185 = arith.constant 0.000000e+00 : f32
    %558 = vector.broadcast %cst_185 : f32 to vector<2x1xf32>
    %559 = arith.cmpf ogt, %515, %558 : vector<2x1xf32>
    %cst_186 = arith.constant 0.000000e+00 : f32
    %560 = vector.shape_cast %559 : vector<2x1xi1> to vector<2x1xi1>
    %561 = vector.broadcast %560 : vector<2x1xi1> to vector<2x32xi1>
    %562 = vector.broadcast %cst_186 : f32 to vector<2x32xf32>
    %563 = arith.select %561, %552, %562 : vector<2x32xi1>, vector<2x32xf32>
    %564 = arith.index_cast %512 : i32 to index
    %c0_187 = arith.constant 0 : index
    %c0_188 = arith.constant 0 : index
    %565 = vector.load %arg8[%564, %c0_187, %c0_188] : memref<8x2x32xf32, #tpu.memory_space<vmem>>, vector<1x2x32xf32>
    %566 = vector.shape_cast %565 : vector<1x2x32xf32> to vector<2x32xf32>
    %567 = vector.shape_cast %563 : vector<2x32xf32> to vector<1x2x32xf32>
    tpu.vector_store %arg8[%564, %c0_187, %c0_188], %567 {strides = array<i32>} : memref<8x2x32xf32, #tpu.memory_space<vmem>>, vector<1x2x32xf32>,
    %c5_i32 = arith.constant 5 : i32
    %568 = arith.index_cast %c5_i32 : i32 to index
    %c0_189 = arith.constant 0 : index
    %c0_190 = arith.constant 0 : index
    %569 = vector.load %arg3[%568, %c0_189, %c0_190] : memref<8x2x1xf32, #tpu.memory_space<vmem>>, vector<1x2x1xf32>
    %570 = vector.shape_cast %569 : vector<1x2x1xf32> to vector<2x1xf32>
    %571 = arith.index_cast %c5_i32 : i32 to index
    %c0_191 = arith.constant 0 : index
    %c0_192 = arith.constant 0 : index
    %572 = vector.load %arg1[%571, %c0_191, %c0_192] : memref<8x2x96xf32, #tpu.memory_space<vmem>>, vector<1x2x96xf32>
    %573 = vector.shape_cast %572 : vector<1x2x96xf32> to vector<2x96xf32>
    %574 = arith.truncf %501 : vector<2x32xf32> to vector<2x32xbf16>
    %cst_193 = arith.constant dense<0.000000e+00> : vector<2x96xf32>
    %575 = tpu.matmul %574, %4, %cst_193 {dimension_numbers = #tpu.dot_dimension_numbers<[1], [0], [0], [1], [0, 0, 1, 1], [], []>} : vector<2x32xbf16>, vector<32x96xbf16>, vector<2x96xf32> -> vector<2x96xf32>
    %576 = vector.broadcast %8 : vector<1x96xf32> to vector<2x96xf32>
    %577 = arith.addf %575, %576 : vector<2x96xf32>
    %578 = vector.extract_strided_slice %573 {offsets = [0, 0], sizes = [2, 32], strides = [1, 1]} : vector<2x96xf32> to vector<2x32xf32>
    %579 = vector.extract_strided_slice %577 {offsets = [0, 0], sizes = [2, 32], strides = [1, 1]} : vector<2x96xf32> to vector<2x32xf32>
    %580 = arith.addf %578, %579 : vector<2x32xf32>
    %cst_194 = arith.constant 5.000000e-01 : f32
    %581 = vector.broadcast %cst_194 : f32 to vector<2x32xf32>
    %582 = arith.mulf %581, %580 : vector<2x32xf32>
    %583 = math.tanh %582 : vector<2x32xf32>
    %cst_195 = arith.constant 5.000000e-01 : f32
    %584 = vector.broadcast %cst_195 : f32 to vector<2x32xf32>
    %585 = arith.mulf %584, %583 : vector<2x32xf32>
    %cst_196 = arith.constant 5.000000e-01 : f32
    %586 = vector.broadcast %cst_196 : f32 to vector<2x32xf32>
    %587 = arith.addf %585, %586 : vector<2x32xf32>
    %588 = vector.extract_strided_slice %573 {offsets = [0, 32], sizes = [2, 32], strides = [1, 1]} : vector<2x96xf32> to vector<2x32xf32>
    %589 = vector.extract_strided_slice %577 {offsets = [0, 32], sizes = [2, 32], strides = [1, 1]} : vector<2x96xf32> to vector<2x32xf32>
    %590 = arith.addf %588, %589 : vector<2x32xf32>
    %cst_197 = arith.constant 5.000000e-01 : f32
    %591 = vector.broadcast %cst_197 : f32 to vector<2x32xf32>
    %592 = arith.mulf %591, %590 : vector<2x32xf32>
    %593 = math.tanh %592 : vector<2x32xf32>
    %cst_198 = arith.constant 5.000000e-01 : f32
    %594 = vector.broadcast %cst_198 : f32 to vector<2x32xf32>
    %595 = arith.mulf %594, %593 : vector<2x32xf32>
    %cst_199 = arith.constant 5.000000e-01 : f32
    %596 = vector.broadcast %cst_199 : f32 to vector<2x32xf32>
    %597 = arith.addf %595, %596 : vector<2x32xf32>
    %598 = vector.extract_strided_slice %573 {offsets = [0, 64], sizes = [2, 32], strides = [1, 1]} : vector<2x96xf32> to vector<2x32xf32>
    %599 = vector.extract_strided_slice %577 {offsets = [0, 64], sizes = [2, 32], strides = [1, 1]} : vector<2x96xf32> to vector<2x32xf32>
    %600 = arith.mulf %587, %599 : vector<2x32xf32>
    %601 = arith.addf %598, %600 : vector<2x32xf32>
    %602 = math.tanh %601 : vector<2x32xf32>
    %cst_200 = arith.constant 1.000000e+00 : f32
    %603 = vector.broadcast %cst_200 : f32 to vector<2x32xf32>
    %604 = arith.subf %603, %597 : vector<2x32xf32>
    %605 = arith.mulf %604, %602 : vector<2x32xf32>
    %606 = arith.mulf %597, %501 : vector<2x32xf32>
    %607 = arith.addf %605, %606 : vector<2x32xf32>
    %cst_201 = arith.constant 0.000000e+00 : f32
    %608 = vector.broadcast %cst_201 : f32 to vector<2x1xf32>
    %609 = arith.cmpf ogt, %570, %608 : vector<2x1xf32>
    %610 = vector.shape_cast %609 : vector<2x1xi1> to vector<2x1xi1>
    %611 = vector.broadcast %610 : vector<2x1xi1> to vector<2x32xi1>
    %612 = arith.select %611, %607, %501 : vector<2x32xi1>, vector<2x32xf32>
    %cst_202 = arith.constant 0.000000e+00 : f32
    %613 = vector.broadcast %cst_202 : f32 to vector<2x1xf32>
    %614 = arith.cmpf ogt, %570, %613 : vector<2x1xf32>
    %cst_203 = arith.constant 0.000000e+00 : f32
    %615 = vector.shape_cast %614 : vector<2x1xi1> to vector<2x1xi1>
    %616 = vector.broadcast %615 : vector<2x1xi1> to vector<2x32xi1>
    %617 = vector.broadcast %cst_203 : f32 to vector<2x32xf32>
    %618 = arith.select %616, %607, %617 : vector<2x32xi1>, vector<2x32xf32>
    %619 = arith.index_cast %c5_i32 : i32 to index
    %c0_204 = arith.constant 0 : index
    %c0_205 = arith.constant 0 : index
    %620 = vector.load %arg7[%619, %c0_204, %c0_205] : memref<8x2x32xf32, #tpu.memory_space<vmem>>, vector<1x2x32xf32>
    %621 = vector.shape_cast %620 : vector<1x2x32xf32> to vector<2x32xf32>
    %622 = vector.shape_cast %618 : vector<2x32xf32> to vector<1x2x32xf32>
    tpu.vector_store %arg7[%619, %c0_204, %c0_205], %622 {strides = array<i32>} : memref<8x2x32xf32, #tpu.memory_space<vmem>>, vector<1x2x32xf32>,
    %c7_i32_206 = arith.constant 7 : i32
    %623 = arith.subi %c7_i32_206, %c5_i32 : i32
    %624 = arith.index_cast %623 : i32 to index
    %c0_207 = arith.constant 0 : index
    %c0_208 = arith.constant 0 : index
    %625 = vector.load %arg4[%624, %c0_207, %c0_208] : memref<8x2x1xf32, #tpu.memory_space<vmem>>, vector<1x2x1xf32>
    %626 = vector.shape_cast %625 : vector<1x2x1xf32> to vector<2x1xf32>
    %627 = arith.index_cast %623 : i32 to index
    %c0_209 = arith.constant 0 : index
    %c0_210 = arith.constant 0 : index
    %628 = vector.load %arg2[%627, %c0_209, %c0_210] : memref<8x2x96xf32, #tpu.memory_space<vmem>>, vector<1x2x96xf32>
    %629 = vector.shape_cast %628 : vector<1x2x96xf32> to vector<2x96xf32>
    %630 = arith.truncf %557 : vector<2x32xf32> to vector<2x32xbf16>
    %cst_211 = arith.constant dense<0.000000e+00> : vector<2x96xf32>
    %631 = tpu.matmul %630, %6, %cst_211 {dimension_numbers = #tpu.dot_dimension_numbers<[1], [0], [0], [1], [0, 0, 1, 1], [], []>} : vector<2x32xbf16>, vector<32x96xbf16>, vector<2x96xf32> -> vector<2x96xf32>
    %632 = vector.broadcast %10 : vector<1x96xf32> to vector<2x96xf32>
    %633 = arith.addf %631, %632 : vector<2x96xf32>
    %634 = vector.extract_strided_slice %629 {offsets = [0, 0], sizes = [2, 32], strides = [1, 1]} : vector<2x96xf32> to vector<2x32xf32>
    %635 = vector.extract_strided_slice %633 {offsets = [0, 0], sizes = [2, 32], strides = [1, 1]} : vector<2x96xf32> to vector<2x32xf32>
    %636 = arith.addf %634, %635 : vector<2x32xf32>
    %cst_212 = arith.constant 5.000000e-01 : f32
    %637 = vector.broadcast %cst_212 : f32 to vector<2x32xf32>
    %638 = arith.mulf %637, %636 : vector<2x32xf32>
    %639 = math.tanh %638 : vector<2x32xf32>
    %cst_213 = arith.constant 5.000000e-01 : f32
    %640 = vector.broadcast %cst_213 : f32 to vector<2x32xf32>
    %641 = arith.mulf %640, %639 : vector<2x32xf32>
    %cst_214 = arith.constant 5.000000e-01 : f32
    %642 = vector.broadcast %cst_214 : f32 to vector<2x32xf32>
    %643 = arith.addf %641, %642 : vector<2x32xf32>
    %644 = vector.extract_strided_slice %629 {offsets = [0, 32], sizes = [2, 32], strides = [1, 1]} : vector<2x96xf32> to vector<2x32xf32>
    %645 = vector.extract_strided_slice %633 {offsets = [0, 32], sizes = [2, 32], strides = [1, 1]} : vector<2x96xf32> to vector<2x32xf32>
    %646 = arith.addf %644, %645 : vector<2x32xf32>
    %cst_215 = arith.constant 5.000000e-01 : f32
    %647 = vector.broadcast %cst_215 : f32 to vector<2x32xf32>
    %648 = arith.mulf %647, %646 : vector<2x32xf32>
    %649 = math.tanh %648 : vector<2x32xf32>
    %cst_216 = arith.constant 5.000000e-01 : f32
    %650 = vector.broadcast %cst_216 : f32 to vector<2x32xf32>
    %651 = arith.mulf %650, %649 : vector<2x32xf32>
    %cst_217 = arith.constant 5.000000e-01 : f32
    %652 = vector.broadcast %cst_217 : f32 to vector<2x32xf32>
    %653 = arith.addf %651, %652 : vector<2x32xf32>
    %654 = vector.extract_strided_slice %629 {offsets = [0, 64], sizes = [2, 32], strides = [1, 1]} : vector<2x96xf32> to vector<2x32xf32>
    %655 = vector.extract_strided_slice %633 {offsets = [0, 64], sizes = [2, 32], strides = [1, 1]} : vector<2x96xf32> to vector<2x32xf32>
    %656 = arith.mulf %643, %655 : vector<2x32xf32>
    %657 = arith.addf %654, %656 : vector<2x32xf32>
    %658 = math.tanh %657 : vector<2x32xf32>
    %cst_218 = arith.constant 1.000000e+00 : f32
    %659 = vector.broadcast %cst_218 : f32 to vector<2x32xf32>
    %660 = arith.subf %659, %653 : vector<2x32xf32>
    %661 = arith.mulf %660, %658 : vector<2x32xf32>
    %662 = arith.mulf %653, %557 : vector<2x32xf32>
    %663 = arith.addf %661, %662 : vector<2x32xf32>
    %cst_219 = arith.constant 0.000000e+00 : f32
    %664 = vector.broadcast %cst_219 : f32 to vector<2x1xf32>
    %665 = arith.cmpf ogt, %626, %664 : vector<2x1xf32>
    %666 = vector.shape_cast %665 : vector<2x1xi1> to vector<2x1xi1>
    %667 = vector.broadcast %666 : vector<2x1xi1> to vector<2x32xi1>
    %668 = arith.select %667, %663, %557 : vector<2x32xi1>, vector<2x32xf32>
    %cst_220 = arith.constant 0.000000e+00 : f32
    %669 = vector.broadcast %cst_220 : f32 to vector<2x1xf32>
    %670 = arith.cmpf ogt, %626, %669 : vector<2x1xf32>
    %cst_221 = arith.constant 0.000000e+00 : f32
    %671 = vector.shape_cast %670 : vector<2x1xi1> to vector<2x1xi1>
    %672 = vector.broadcast %671 : vector<2x1xi1> to vector<2x32xi1>
    %673 = vector.broadcast %cst_221 : f32 to vector<2x32xf32>
    %674 = arith.select %672, %663, %673 : vector<2x32xi1>, vector<2x32xf32>
    %675 = arith.index_cast %623 : i32 to index
    %c0_222 = arith.constant 0 : index
    %c0_223 = arith.constant 0 : index
    %676 = vector.load %arg8[%675, %c0_222, %c0_223] : memref<8x2x32xf32, #tpu.memory_space<vmem>>, vector<1x2x32xf32>
    %677 = vector.shape_cast %676 : vector<1x2x32xf32> to vector<2x32xf32>
    %678 = vector.shape_cast %674 : vector<2x32xf32> to vector<1x2x32xf32>
    tpu.vector_store %arg8[%675, %c0_222, %c0_223], %678 {strides = array<i32>} : memref<8x2x32xf32, #tpu.memory_space<vmem>>, vector<1x2x32xf32>,
    %c6_i32 = arith.constant 6 : i32
    %679 = arith.index_cast %c6_i32 : i32 to index
    %c0_224 = arith.constant 0 : index
    %c0_225 = arith.constant 0 : index
    %680 = vector.load %arg3[%679, %c0_224, %c0_225] : memref<8x2x1xf32, #tpu.memory_space<vmem>>, vector<1x2x1xf32>
    %681 = vector.shape_cast %680 : vector<1x2x1xf32> to vector<2x1xf32>
    %682 = arith.index_cast %c6_i32 : i32 to index
    %c0_226 = arith.constant 0 : index
    %c0_227 = arith.constant 0 : index
    %683 = vector.load %arg1[%682, %c0_226, %c0_227] : memref<8x2x96xf32, #tpu.memory_space<vmem>>, vector<1x2x96xf32>
    %684 = vector.shape_cast %683 : vector<1x2x96xf32> to vector<2x96xf32>
    %685 = arith.truncf %612 : vector<2x32xf32> to vector<2x32xbf16>
    %cst_228 = arith.constant dense<0.000000e+00> : vector<2x96xf32>
    %686 = tpu.matmul %685, %4, %cst_228 {dimension_numbers = #tpu.dot_dimension_numbers<[1], [0], [0], [1], [0, 0, 1, 1], [], []>} : vector<2x32xbf16>, vector<32x96xbf16>, vector<2x96xf32> -> vector<2x96xf32>
    %687 = vector.broadcast %8 : vector<1x96xf32> to vector<2x96xf32>
    %688 = arith.addf %686, %687 : vector<2x96xf32>
    %689 = vector.extract_strided_slice %684 {offsets = [0, 0], sizes = [2, 32], strides = [1, 1]} : vector<2x96xf32> to vector<2x32xf32>
    %690 = vector.extract_strided_slice %688 {offsets = [0, 0], sizes = [2, 32], strides = [1, 1]} : vector<2x96xf32> to vector<2x32xf32>
    %691 = arith.addf %689, %690 : vector<2x32xf32>
    %cst_229 = arith.constant 5.000000e-01 : f32
    %692 = vector.broadcast %cst_229 : f32 to vector<2x32xf32>
    %693 = arith.mulf %692, %691 : vector<2x32xf32>
    %694 = math.tanh %693 : vector<2x32xf32>
    %cst_230 = arith.constant 5.000000e-01 : f32
    %695 = vector.broadcast %cst_230 : f32 to vector<2x32xf32>
    %696 = arith.mulf %695, %694 : vector<2x32xf32>
    %cst_231 = arith.constant 5.000000e-01 : f32
    %697 = vector.broadcast %cst_231 : f32 to vector<2x32xf32>
    %698 = arith.addf %696, %697 : vector<2x32xf32>
    %699 = vector.extract_strided_slice %684 {offsets = [0, 32], sizes = [2, 32], strides = [1, 1]} : vector<2x96xf32> to vector<2x32xf32>
    %700 = vector.extract_strided_slice %688 {offsets = [0, 32], sizes = [2, 32], strides = [1, 1]} : vector<2x96xf32> to vector<2x32xf32>
    %701 = arith.addf %699, %700 : vector<2x32xf32>
    %cst_232 = arith.constant 5.000000e-01 : f32
    %702 = vector.broadcast %cst_232 : f32 to vector<2x32xf32>
    %703 = arith.mulf %702, %701 : vector<2x32xf32>
    %704 = math.tanh %703 : vector<2x32xf32>
    %cst_233 = arith.constant 5.000000e-01 : f32
    %705 = vector.broadcast %cst_233 : f32 to vector<2x32xf32>
    %706 = arith.mulf %705, %704 : vector<2x32xf32>
    %cst_234 = arith.constant 5.000000e-01 : f32
    %707 = vector.broadcast %cst_234 : f32 to vector<2x32xf32>
    %708 = arith.addf %706, %707 : vector<2x32xf32>
    %709 = vector.extract_strided_slice %684 {offsets = [0, 64], sizes = [2, 32], strides = [1, 1]} : vector<2x96xf32> to vector<2x32xf32>
    %710 = vector.extract_strided_slice %688 {offsets = [0, 64], sizes = [2, 32], strides = [1, 1]} : vector<2x96xf32> to vector<2x32xf32>
    %711 = arith.mulf %698, %710 : vector<2x32xf32>
    %712 = arith.addf %709, %711 : vector<2x32xf32>
    %713 = math.tanh %712 : vector<2x32xf32>
    %cst_235 = arith.constant 1.000000e+00 : f32
    %714 = vector.broadcast %cst_235 : f32 to vector<2x32xf32>
    %715 = arith.subf %714, %708 : vector<2x32xf32>
    %716 = arith.mulf %715, %713 : vector<2x32xf32>
    %717 = arith.mulf %708, %612 : vector<2x32xf32>
    %718 = arith.addf %716, %717 : vector<2x32xf32>
    %cst_236 = arith.constant 0.000000e+00 : f32
    %719 = vector.broadcast %cst_236 : f32 to vector<2x1xf32>
    %720 = arith.cmpf ogt, %681, %719 : vector<2x1xf32>
    %721 = vector.shape_cast %720 : vector<2x1xi1> to vector<2x1xi1>
    %722 = vector.broadcast %721 : vector<2x1xi1> to vector<2x32xi1>
    %723 = arith.select %722, %718, %612 : vector<2x32xi1>, vector<2x32xf32>
    %cst_237 = arith.constant 0.000000e+00 : f32
    %724 = vector.broadcast %cst_237 : f32 to vector<2x1xf32>
    %725 = arith.cmpf ogt, %681, %724 : vector<2x1xf32>
    %cst_238 = arith.constant 0.000000e+00 : f32
    %726 = vector.shape_cast %725 : vector<2x1xi1> to vector<2x1xi1>
    %727 = vector.broadcast %726 : vector<2x1xi1> to vector<2x32xi1>
    %728 = vector.broadcast %cst_238 : f32 to vector<2x32xf32>
    %729 = arith.select %727, %718, %728 : vector<2x32xi1>, vector<2x32xf32>
    %730 = arith.index_cast %c6_i32 : i32 to index
    %c0_239 = arith.constant 0 : index
    %c0_240 = arith.constant 0 : index
    %731 = vector.load %arg7[%730, %c0_239, %c0_240] : memref<8x2x32xf32, #tpu.memory_space<vmem>>, vector<1x2x32xf32>
    %732 = vector.shape_cast %731 : vector<1x2x32xf32> to vector<2x32xf32>
    %733 = vector.shape_cast %729 : vector<2x32xf32> to vector<1x2x32xf32>
    tpu.vector_store %arg7[%730, %c0_239, %c0_240], %733 {strides = array<i32>} : memref<8x2x32xf32, #tpu.memory_space<vmem>>, vector<1x2x32xf32>,
    %c7_i32_241 = arith.constant 7 : i32
    %734 = arith.subi %c7_i32_241, %c6_i32 : i32
    %735 = arith.index_cast %734 : i32 to index
    %c0_242 = arith.constant 0 : index
    %c0_243 = arith.constant 0 : index
    %736 = vector.load %arg4[%735, %c0_242, %c0_243] : memref<8x2x1xf32, #tpu.memory_space<vmem>>, vector<1x2x1xf32>
    %737 = vector.shape_cast %736 : vector<1x2x1xf32> to vector<2x1xf32>
    %738 = arith.index_cast %734 : i32 to index
    %c0_244 = arith.constant 0 : index
    %c0_245 = arith.constant 0 : index
    %739 = vector.load %arg2[%738, %c0_244, %c0_245] : memref<8x2x96xf32, #tpu.memory_space<vmem>>, vector<1x2x96xf32>
    %740 = vector.shape_cast %739 : vector<1x2x96xf32> to vector<2x96xf32>
    %741 = arith.truncf %668 : vector<2x32xf32> to vector<2x32xbf16>
    %cst_246 = arith.constant dense<0.000000e+00> : vector<2x96xf32>
    %742 = tpu.matmul %741, %6, %cst_246 {dimension_numbers = #tpu.dot_dimension_numbers<[1], [0], [0], [1], [0, 0, 1, 1], [], []>} : vector<2x32xbf16>, vector<32x96xbf16>, vector<2x96xf32> -> vector<2x96xf32>
    %743 = vector.broadcast %10 : vector<1x96xf32> to vector<2x96xf32>
    %744 = arith.addf %742, %743 : vector<2x96xf32>
    %745 = vector.extract_strided_slice %740 {offsets = [0, 0], sizes = [2, 32], strides = [1, 1]} : vector<2x96xf32> to vector<2x32xf32>
    %746 = vector.extract_strided_slice %744 {offsets = [0, 0], sizes = [2, 32], strides = [1, 1]} : vector<2x96xf32> to vector<2x32xf32>
    %747 = arith.addf %745, %746 : vector<2x32xf32>
    %cst_247 = arith.constant 5.000000e-01 : f32
    %748 = vector.broadcast %cst_247 : f32 to vector<2x32xf32>
    %749 = arith.mulf %748, %747 : vector<2x32xf32>
    %750 = math.tanh %749 : vector<2x32xf32>
    %cst_248 = arith.constant 5.000000e-01 : f32
    %751 = vector.broadcast %cst_248 : f32 to vector<2x32xf32>
    %752 = arith.mulf %751, %750 : vector<2x32xf32>
    %cst_249 = arith.constant 5.000000e-01 : f32
    %753 = vector.broadcast %cst_249 : f32 to vector<2x32xf32>
    %754 = arith.addf %752, %753 : vector<2x32xf32>
    %755 = vector.extract_strided_slice %740 {offsets = [0, 32], sizes = [2, 32], strides = [1, 1]} : vector<2x96xf32> to vector<2x32xf32>
    %756 = vector.extract_strided_slice %744 {offsets = [0, 32], sizes = [2, 32], strides = [1, 1]} : vector<2x96xf32> to vector<2x32xf32>
    %757 = arith.addf %755, %756 : vector<2x32xf32>
    %cst_250 = arith.constant 5.000000e-01 : f32
    %758 = vector.broadcast %cst_250 : f32 to vector<2x32xf32>
    %759 = arith.mulf %758, %757 : vector<2x32xf32>
    %760 = math.tanh %759 : vector<2x32xf32>
    %cst_251 = arith.constant 5.000000e-01 : f32
    %761 = vector.broadcast %cst_251 : f32 to vector<2x32xf32>
    %762 = arith.mulf %761, %760 : vector<2x32xf32>
    %cst_252 = arith.constant 5.000000e-01 : f32
    %763 = vector.broadcast %cst_252 : f32 to vector<2x32xf32>
    %764 = arith.addf %762, %763 : vector<2x32xf32>
    %765 = vector.extract_strided_slice %740 {offsets = [0, 64], sizes = [2, 32], strides = [1, 1]} : vector<2x96xf32> to vector<2x32xf32>
    %766 = vector.extract_strided_slice %744 {offsets = [0, 64], sizes = [2, 32], strides = [1, 1]} : vector<2x96xf32> to vector<2x32xf32>
    %767 = arith.mulf %754, %766 : vector<2x32xf32>
    %768 = arith.addf %765, %767 : vector<2x32xf32>
    %769 = math.tanh %768 : vector<2x32xf32>
    %cst_253 = arith.constant 1.000000e+00 : f32
    %770 = vector.broadcast %cst_253 : f32 to vector<2x32xf32>
    %771 = arith.subf %770, %764 : vector<2x32xf32>
    %772 = arith.mulf %771, %769 : vector<2x32xf32>
    %773 = arith.mulf %764, %668 : vector<2x32xf32>
    %774 = arith.addf %772, %773 : vector<2x32xf32>
    %cst_254 = arith.constant 0.000000e+00 : f32
    %775 = vector.broadcast %cst_254 : f32 to vector<2x1xf32>
    %776 = arith.cmpf ogt, %737, %775 : vector<2x1xf32>
    %777 = vector.shape_cast %776 : vector<2x1xi1> to vector<2x1xi1>
    %778 = vector.broadcast %777 : vector<2x1xi1> to vector<2x32xi1>
    %779 = arith.select %778, %774, %668 : vector<2x32xi1>, vector<2x32xf32>
    %cst_255 = arith.constant 0.000000e+00 : f32
    %780 = vector.broadcast %cst_255 : f32 to vector<2x1xf32>
    %781 = arith.cmpf ogt, %737, %780 : vector<2x1xf32>
    %cst_256 = arith.constant 0.000000e+00 : f32
    %782 = vector.shape_cast %781 : vector<2x1xi1> to vector<2x1xi1>
    %783 = vector.broadcast %782 : vector<2x1xi1> to vector<2x32xi1>
    %784 = vector.broadcast %cst_256 : f32 to vector<2x32xf32>
    %785 = arith.select %783, %774, %784 : vector<2x32xi1>, vector<2x32xf32>
    %786 = arith.index_cast %734 : i32 to index
    %c0_257 = arith.constant 0 : index
    %c0_258 = arith.constant 0 : index
    %787 = vector.load %arg8[%786, %c0_257, %c0_258] : memref<8x2x32xf32, #tpu.memory_space<vmem>>, vector<1x2x32xf32>
    %788 = vector.shape_cast %787 : vector<1x2x32xf32> to vector<2x32xf32>
    %789 = vector.shape_cast %785 : vector<2x32xf32> to vector<1x2x32xf32>
    tpu.vector_store %arg8[%786, %c0_257, %c0_258], %789 {strides = array<i32>} : memref<8x2x32xf32, #tpu.memory_space<vmem>>, vector<1x2x32xf32>,
    %c7_i32_259 = arith.constant 7 : i32
    %790 = arith.index_cast %c7_i32_259 : i32 to index
    %c0_260 = arith.constant 0 : index
    %c0_261 = arith.constant 0 : index
    %791 = vector.load %arg3[%790, %c0_260, %c0_261] : memref<8x2x1xf32, #tpu.memory_space<vmem>>, vector<1x2x1xf32>
    %792 = vector.shape_cast %791 : vector<1x2x1xf32> to vector<2x1xf32>
    %793 = arith.index_cast %c7_i32_259 : i32 to index
    %c0_262 = arith.constant 0 : index
    %c0_263 = arith.constant 0 : index
    %794 = vector.load %arg1[%793, %c0_262, %c0_263] : memref<8x2x96xf32, #tpu.memory_space<vmem>>, vector<1x2x96xf32>
    %795 = vector.shape_cast %794 : vector<1x2x96xf32> to vector<2x96xf32>
    %796 = arith.truncf %723 : vector<2x32xf32> to vector<2x32xbf16>
    %cst_264 = arith.constant dense<0.000000e+00> : vector<2x96xf32>
    %797 = tpu.matmul %796, %4, %cst_264 {dimension_numbers = #tpu.dot_dimension_numbers<[1], [0], [0], [1], [0, 0, 1, 1], [], []>} : vector<2x32xbf16>, vector<32x96xbf16>, vector<2x96xf32> -> vector<2x96xf32>
    %798 = vector.broadcast %8 : vector<1x96xf32> to vector<2x96xf32>
    %799 = arith.addf %797, %798 : vector<2x96xf32>
    %800 = vector.extract_strided_slice %795 {offsets = [0, 0], sizes = [2, 32], strides = [1, 1]} : vector<2x96xf32> to vector<2x32xf32>
    %801 = vector.extract_strided_slice %799 {offsets = [0, 0], sizes = [2, 32], strides = [1, 1]} : vector<2x96xf32> to vector<2x32xf32>
    %802 = arith.addf %800, %801 : vector<2x32xf32>
    %cst_265 = arith.constant 5.000000e-01 : f32
    %803 = vector.broadcast %cst_265 : f32 to vector<2x32xf32>
    %804 = arith.mulf %803, %802 : vector<2x32xf32>
    %805 = math.tanh %804 : vector<2x32xf32>
    %cst_266 = arith.constant 5.000000e-01 : f32
    %806 = vector.broadcast %cst_266 : f32 to vector<2x32xf32>
    %807 = arith.mulf %806, %805 : vector<2x32xf32>
    %cst_267 = arith.constant 5.000000e-01 : f32
    %808 = vector.broadcast %cst_267 : f32 to vector<2x32xf32>
    %809 = arith.addf %807, %808 : vector<2x32xf32>
    %810 = vector.extract_strided_slice %795 {offsets = [0, 32], sizes = [2, 32], strides = [1, 1]} : vector<2x96xf32> to vector<2x32xf32>
    %811 = vector.extract_strided_slice %799 {offsets = [0, 32], sizes = [2, 32], strides = [1, 1]} : vector<2x96xf32> to vector<2x32xf32>
    %812 = arith.addf %810, %811 : vector<2x32xf32>
    %cst_268 = arith.constant 5.000000e-01 : f32
    %813 = vector.broadcast %cst_268 : f32 to vector<2x32xf32>
    %814 = arith.mulf %813, %812 : vector<2x32xf32>
    %815 = math.tanh %814 : vector<2x32xf32>
    %cst_269 = arith.constant 5.000000e-01 : f32
    %816 = vector.broadcast %cst_269 : f32 to vector<2x32xf32>
    %817 = arith.mulf %816, %815 : vector<2x32xf32>
    %cst_270 = arith.constant 5.000000e-01 : f32
    %818 = vector.broadcast %cst_270 : f32 to vector<2x32xf32>
    %819 = arith.addf %817, %818 : vector<2x32xf32>
    %820 = vector.extract_strided_slice %795 {offsets = [0, 64], sizes = [2, 32], strides = [1, 1]} : vector<2x96xf32> to vector<2x32xf32>
    %821 = vector.extract_strided_slice %799 {offsets = [0, 64], sizes = [2, 32], strides = [1, 1]} : vector<2x96xf32> to vector<2x32xf32>
    %822 = arith.mulf %809, %821 : vector<2x32xf32>
    %823 = arith.addf %820, %822 : vector<2x32xf32>
    %824 = math.tanh %823 : vector<2x32xf32>
    %cst_271 = arith.constant 1.000000e+00 : f32
    %825 = vector.broadcast %cst_271 : f32 to vector<2x32xf32>
    %826 = arith.subf %825, %819 : vector<2x32xf32>
    %827 = arith.mulf %826, %824 : vector<2x32xf32>
    %828 = arith.mulf %819, %723 : vector<2x32xf32>
    %829 = arith.addf %827, %828 : vector<2x32xf32>
    %cst_272 = arith.constant 0.000000e+00 : f32
    %830 = vector.broadcast %cst_272 : f32 to vector<2x1xf32>
    %831 = arith.cmpf ogt, %792, %830 : vector<2x1xf32>
    %832 = vector.shape_cast %831 : vector<2x1xi1> to vector<2x1xi1>
    %833 = vector.broadcast %832 : vector<2x1xi1> to vector<2x32xi1>
    %834 = arith.select %833, %829, %723 : vector<2x32xi1>, vector<2x32xf32>
    %cst_273 = arith.constant 0.000000e+00 : f32
    %835 = vector.broadcast %cst_273 : f32 to vector<2x1xf32>
    %836 = arith.cmpf ogt, %792, %835 : vector<2x1xf32>
    %cst_274 = arith.constant 0.000000e+00 : f32
    %837 = vector.shape_cast %836 : vector<2x1xi1> to vector<2x1xi1>
    %838 = vector.broadcast %837 : vector<2x1xi1> to vector<2x32xi1>
    %839 = vector.broadcast %cst_274 : f32 to vector<2x32xf32>
    %840 = arith.select %838, %829, %839 : vector<2x32xi1>, vector<2x32xf32>
    %841 = arith.index_cast %c7_i32_259 : i32 to index
    %c0_275 = arith.constant 0 : index
    %c0_276 = arith.constant 0 : index
    %842 = vector.load %arg7[%841, %c0_275, %c0_276] : memref<8x2x32xf32, #tpu.memory_space<vmem>>, vector<1x2x32xf32>
    %843 = vector.shape_cast %842 : vector<1x2x32xf32> to vector<2x32xf32>
    %844 = vector.shape_cast %840 : vector<2x32xf32> to vector<1x2x32xf32>
    tpu.vector_store %arg7[%841, %c0_275, %c0_276], %844 {strides = array<i32>} : memref<8x2x32xf32, #tpu.memory_space<vmem>>, vector<1x2x32xf32>,
    %c7_i32_277 = arith.constant 7 : i32
    %845 = arith.subi %c7_i32_277, %c7_i32_259 : i32
    %846 = arith.index_cast %845 : i32 to index
    %c0_278 = arith.constant 0 : index
    %c0_279 = arith.constant 0 : index
    %847 = vector.load %arg4[%846, %c0_278, %c0_279] : memref<8x2x1xf32, #tpu.memory_space<vmem>>, vector<1x2x1xf32>
    %848 = vector.shape_cast %847 : vector<1x2x1xf32> to vector<2x1xf32>
    %849 = arith.index_cast %845 : i32 to index
    %c0_280 = arith.constant 0 : index
    %c0_281 = arith.constant 0 : index
    %850 = vector.load %arg2[%849, %c0_280, %c0_281] : memref<8x2x96xf32, #tpu.memory_space<vmem>>, vector<1x2x96xf32>
    %851 = vector.shape_cast %850 : vector<1x2x96xf32> to vector<2x96xf32>
    %852 = arith.truncf %779 : vector<2x32xf32> to vector<2x32xbf16>
    %cst_282 = arith.constant dense<0.000000e+00> : vector<2x96xf32>
    %853 = tpu.matmul %852, %6, %cst_282 {dimension_numbers = #tpu.dot_dimension_numbers<[1], [0], [0], [1], [0, 0, 1, 1], [], []>} : vector<2x32xbf16>, vector<32x96xbf16>, vector<2x96xf32> -> vector<2x96xf32>
    %854 = vector.broadcast %10 : vector<1x96xf32> to vector<2x96xf32>
    %855 = arith.addf %853, %854 : vector<2x96xf32>
    %856 = vector.extract_strided_slice %851 {offsets = [0, 0], sizes = [2, 32], strides = [1, 1]} : vector<2x96xf32> to vector<2x32xf32>
    %857 = vector.extract_strided_slice %855 {offsets = [0, 0], sizes = [2, 32], strides = [1, 1]} : vector<2x96xf32> to vector<2x32xf32>
    %858 = arith.addf %856, %857 : vector<2x32xf32>
    %cst_283 = arith.constant 5.000000e-01 : f32
    %859 = vector.broadcast %cst_283 : f32 to vector<2x32xf32>
    %860 = arith.mulf %859, %858 : vector<2x32xf32>
    %861 = math.tanh %860 : vector<2x32xf32>
    %cst_284 = arith.constant 5.000000e-01 : f32
    %862 = vector.broadcast %cst_284 : f32 to vector<2x32xf32>
    %863 = arith.mulf %862, %861 : vector<2x32xf32>
    %cst_285 = arith.constant 5.000000e-01 : f32
    %864 = vector.broadcast %cst_285 : f32 to vector<2x32xf32>
    %865 = arith.addf %863, %864 : vector<2x32xf32>
    %866 = vector.extract_strided_slice %851 {offsets = [0, 32], sizes = [2, 32], strides = [1, 1]} : vector<2x96xf32> to vector<2x32xf32>
    %867 = vector.extract_strided_slice %855 {offsets = [0, 32], sizes = [2, 32], strides = [1, 1]} : vector<2x96xf32> to vector<2x32xf32>
    %868 = arith.addf %866, %867 : vector<2x32xf32>
    %cst_286 = arith.constant 5.000000e-01 : f32
    %869 = vector.broadcast %cst_286 : f32 to vector<2x32xf32>
    %870 = arith.mulf %869, %868 : vector<2x32xf32>
    %871 = math.tanh %870 : vector<2x32xf32>
    %cst_287 = arith.constant 5.000000e-01 : f32
    %872 = vector.broadcast %cst_287 : f32 to vector<2x32xf32>
    %873 = arith.mulf %872, %871 : vector<2x32xf32>
    %cst_288 = arith.constant 5.000000e-01 : f32
    %874 = vector.broadcast %cst_288 : f32 to vector<2x32xf32>
    %875 = arith.addf %873, %874 : vector<2x32xf32>
    %876 = vector.extract_strided_slice %851 {offsets = [0, 64], sizes = [2, 32], strides = [1, 1]} : vector<2x96xf32> to vector<2x32xf32>
    %877 = vector.extract_strided_slice %855 {offsets = [0, 64], sizes = [2, 32], strides = [1, 1]} : vector<2x96xf32> to vector<2x32xf32>
    %878 = arith.mulf %865, %877 : vector<2x32xf32>
    %879 = arith.addf %876, %878 : vector<2x32xf32>
    %880 = math.tanh %879 : vector<2x32xf32>
    %cst_289 = arith.constant 1.000000e+00 : f32
    %881 = vector.broadcast %cst_289 : f32 to vector<2x32xf32>
    %882 = arith.subf %881, %875 : vector<2x32xf32>
    %883 = arith.mulf %882, %880 : vector<2x32xf32>
    %884 = arith.mulf %875, %779 : vector<2x32xf32>
    %885 = arith.addf %883, %884 : vector<2x32xf32>
    %cst_290 = arith.constant 0.000000e+00 : f32
    %886 = vector.broadcast %cst_290 : f32 to vector<2x1xf32>
    %887 = arith.cmpf ogt, %848, %886 : vector<2x1xf32>
    %888 = vector.shape_cast %887 : vector<2x1xi1> to vector<2x1xi1>
    %889 = vector.broadcast %888 : vector<2x1xi1> to vector<2x32xi1>
    %890 = arith.select %889, %885, %779 : vector<2x32xi1>, vector<2x32xf32>
    %cst_291 = arith.constant 0.000000e+00 : f32
    %891 = vector.broadcast %cst_291 : f32 to vector<2x1xf32>
    %892 = arith.cmpf ogt, %848, %891 : vector<2x1xf32>
    %cst_292 = arith.constant 0.000000e+00 : f32
    %893 = vector.shape_cast %892 : vector<2x1xi1> to vector<2x1xi1>
    %894 = vector.broadcast %893 : vector<2x1xi1> to vector<2x32xi1>
    %895 = vector.broadcast %cst_292 : f32 to vector<2x32xf32>
    %896 = arith.select %894, %885, %895 : vector<2x32xi1>, vector<2x32xf32>
    %897 = arith.index_cast %845 : i32 to index
    %c0_293 = arith.constant 0 : index
    %c0_294 = arith.constant 0 : index
    %898 = vector.load %arg8[%897, %c0_293, %c0_294] : memref<8x2x32xf32, #tpu.memory_space<vmem>>, vector<1x2x32xf32>
    %899 = vector.shape_cast %898 : vector<1x2x32xf32> to vector<2x32xf32>
    %900 = vector.shape_cast %896 : vector<2x32xf32> to vector<1x2x32xf32>
    tpu.vector_store %arg8[%897, %c0_293, %c0_294], %900 {strides = array<i32>} : memref<8x2x32xf32, #tpu.memory_space<vmem>>, vector<1x2x32xf32>,
    %c8_i32 = arith.constant 8 : i32
    %c0_295 = arith.constant 0 : index
    %c0_296 = arith.constant 0 : index
    %901 = vector.load %arg9[%c0_295, %c0_296] : memref<2x32xf32, #tpu.memory_space<vmem>>, vector<2x32xf32>
    tpu.vector_store %arg9[%c0_295, %c0_296], %834 {strides = array<i32>} : memref<2x32xf32, #tpu.memory_space<vmem>>, vector<2x32xf32>,
    %c0_297 = arith.constant 0 : index
    %c0_298 = arith.constant 0 : index
    %902 = vector.load %arg10[%c0_297, %c0_298] : memref<2x32xf32, #tpu.memory_space<vmem>>, vector<2x32xf32>
    tpu.vector_store %arg10[%c0_297, %c0_298], %890 {strides = array<i32>} : memref<2x32xf32, #tpu.memory_space<vmem>>, vector<2x32xf32>,
    return
  }
  func.func @transform_0(%arg0: i32) -> (i32, i32, i32) {
    %c0_i32 = arith.constant 0 : i32
    %c0_i32_0 = arith.constant 0 : i32
    %c0_i32_1 = arith.constant 0 : i32
    return %arg0, %c0_i32, %c0_i32_0 : i32, i32, i32
  }
  func.func @transform_1(%arg0: i32) -> (i32, i32, i32) {
    %c0_i32 = arith.constant 0 : i32
    %0 = arith.subi %c0_i32, %arg0 : i32
    %c0_i32_0 = arith.constant 0 : i32
    %c0_i32_1 = arith.constant 0 : i32
    %c0_i32_2 = arith.constant 0 : i32
    return %0, %c0_i32_0, %c0_i32_1 : i32, i32, i32
  }
  func.func @transform_2(%arg0: i32) -> (i32, i32, i32) {
    %c0_i32 = arith.constant 0 : i32
    %c0_i32_0 = arith.constant 0 : i32
    %c0_i32_1 = arith.constant 0 : i32
    return %arg0, %c0_i32, %c0_i32_0 : i32, i32, i32
  }
  func.func @transform_3(%arg0: i32) -> (i32, i32, i32) {
    %c0_i32 = arith.constant 0 : i32
    %0 = arith.subi %c0_i32, %arg0 : i32
    %c0_i32_0 = arith.constant 0 : i32
    %c0_i32_1 = arith.constant 0 : i32
    %c0_i32_2 = arith.constant 0 : i32
    return %0, %c0_i32_0, %c0_i32_1 : i32, i32, i32
  }
  func.func @transform_4(%arg0: i32) -> (i32, i32, i32) {
    %c0_i32 = arith.constant 0 : i32
    %c0_i32_0 = arith.constant 0 : i32
    %c0_i32_1 = arith.constant 0 : i32
    %c0_i32_2 = arith.constant 0 : i32
    return %c0_i32, %c0_i32_0, %c0_i32_1 : i32, i32, i32
  }
  func.func @transform_5(%arg0: i32) -> (i32, i32, i32) {
    %c0_i32 = arith.constant 0 : i32
    %c0_i32_0 = arith.constant 0 : i32
    %c0_i32_1 = arith.constant 0 : i32
    %c0_i32_2 = arith.constant 0 : i32
    return %c0_i32, %c0_i32_0, %c0_i32_1 : i32, i32, i32
  }
  func.func @transform_6(%arg0: i32) -> (i32, i32, i32) {
    %c0_i32 = arith.constant 0 : i32
    %c0_i32_0 = arith.constant 0 : i32
    %c0_i32_1 = arith.constant 0 : i32
    return %arg0, %c0_i32, %c0_i32_0 : i32, i32, i32
  }
  func.func @transform_7(%arg0: i32) -> (i32, i32, i32) {
    %c0_i32 = arith.constant 0 : i32
    %0 = arith.subi %c0_i32, %arg0 : i32
    %c0_i32_0 = arith.constant 0 : i32
    %c0_i32_1 = arith.constant 0 : i32
    %c0_i32_2 = arith.constant 0 : i32
    return %0, %c0_i32_0, %c0_i32_1 : i32, i32, i32
  }
}

</mosaic_0001>

<bundles_post_ra>
// kernel: tpu_custom_call.1
= control target key start
LH: loop header
LB: loop body
LE: loop exit
PB: predicated region body
PF: predicated region fallthrough
CT: control target
= control target key end

     0   :  { %13 = vsyncpa [#allocation5], 0  ;;  %s2581_s0 = inlined_call_operand.vmem [shape: f32[8,2,96], index: 0, kind: input, shape index: {}]   ;;  %s2582_s1 = inlined_call_operand.hbm [shape: f32[8,2,96], index: 1, kind: input, shape index: {}]   ;;  %s2583_s2 = inlined_call_operand.vmem [shape: f32[8,2,1], index: 2, kind: input, shape index: {}]   ;;  %s2584_s3 = inlined_call_operand.vmem [shape: f32[8,2,1], index: 3, kind: input, shape index: {}]   ;;  %s2585_s4 = inlined_call_operand.vmem [shape: bf16[2,32,96], index: 4, kind: input, shape index: {}]   ;;  %s2586_s5 = inlined_call_operand.vmem [shape: f32[2,1,96], index: 5, kind: input, shape index: {}]   ;;  %s2587_s6 = inlined_call_operand.hbm [shape: f32[8,2,32], index: 6, kind: output, shape index: {0}]   ;;  %s2588_s7 = inlined_call_operand.hbm [shape: f32[8,2,32], index: 7, kind: output, shape index: {1}]  }
   0x1   :  { %14 = vsyncpa [#allocation6], 0 }
   0x2   :  { %15 = vsyncpa [#allocation9], 0  ;;  %s1990_s24 = smov [#allocation4]   ;;  %s1918_s28 = scalar_lea.hbm %s2582_s1, 256 }
   0x3   :  { %s27_s25 = sshll.u32 %s1990_s24, 4  ;;  %p1919_p0 = scmp.ne.s32.totalorder %s2582_s1, %s1918_s28  ;;  %s28_s25 = int_to_ptr.vmem [resolvable:$true] %s27_s25 }
   0x4   :  { %p1922_p1 = scmp.lt.u32.totalorder %s1918_s28, %s2582_s1 }
   0x6   :  { %p1924_p2 = pnand %p1922_p1, %p1919_p0 }
   0x8   :  { %1927 = shalt.err (!%p1924_p2)
}
   0x9   :  { %s1928_s10 = scalar_lea.vmem %s28_s25, 256  ;;  %p1933_p4 = scmp.lt.s32.totalorder %s28_s25, %s28_s25 }
   0xa   :  { %p1929_p3 = scmp.ne.s32.totalorder %s28_s25, %s1928_s10  ;;  %p1934_p5 = scmp.lt.s32.totalorder %s1928_s10, %s1928_s10 }
   0xc   :  { %p1935_p6 = por %p1934_p5, %p1933_p4 }
   0xe   :  { %p1936_p7 = pnand %p1935_p6, %p1929_p3 }
  0x10   :  { %1939 = shalt.err (!%p1936_p7)
}
  0x11   :  { %s1991_s11 = smov 32   ;;  %s1992_s12 = smov 2  }
  0x12   :  { %33 = dma.hbm_to_vmem [thread:$0]  %s2582_s1, 256, %s28_s25, [#allocation5], %s1991_s11, %s1991_s11, %s1992_s12  }
  0x13   :  { %1984 = dma.done.wait [#allocation5], 256  }
  0x14   :  { %1985 = vsyncadd [#allocation5], 4294967040  ;;  %vm76_vm0 = vcmask 254976   ;;  %v1993_v0 = vmov 0.0   ;;  %vm1994_vm1 = vmmov 0   ;;  %v2068_v1 = vld [vmem:[%s2585_s4] sm:$0xff]  }
  0x15   :  { %1704 = vmatprep.subr.bf16.mxu0 %v1993_v0  ;;  %1712 = vmatprep.subr.bf16.mxu1 %v1993_v0  ;;  %77 = vst.msk [vmem:[#allocation2] sm:$0x3] %vm76_vm0, %v1993_v0  ;;  %78 = vst.msk [vmem:[#allocation3] sm:$0x3] %vm76_vm0, %v1993_v0  ;;  %v2073_v2 = vld [vmem:[%s2585_s4 + $0x10] sm:$0xff]   ;;  %v2079_v3 = vld [vmem:[%s2585_s4 + $0x8] sm:$0xff]  }
  0x16   :  { %1708 = vmatprep.mubr.msk.bf16.mxu0 %vm1994_vm1, %v1993_v0  ;;  %1716 = vmatprep.mubr.msk.bf16.mxu1 %vm1994_vm1, %v1993_v0  ;;  %v2086_v4 = vld [vmem:[%s2585_s4 + $0x18] sm:$0xff]   ;;  %vm114_vm2 = vcmask 261120   ;;  %v1995_v9 = vmov 0   ;;  %v2112_v10 = vld [vmem:[%s2586_s5] ss:$0 sm:$0xff]  ;;  %s1996_s28 = smov 64  }
  0x17   :  { %1705 = vmatpush3.bf16.msra.mxu0 %v2068_v1  ;;  %1713 = vmatpush3.bf16.msra.mxu1 %v2073_v2  ;;  %v2117_v12 = vld [vmem:[%s2586_s5 + $0x1] ss:$0 sm:$0xff]  ;;  %v203_v26 = vld [vmem:[#allocation4 + $0xe] sm:$0x3]  ;;  %v1617_v37 = vld [vmem:[%s2584_s3 + $0xe] sm:$0x3] }
  0x18   :  { %1706 = vmatprep.subr.bf16.mxu0 %v1993_v0  ;;  %1714 = vmatprep.subr.bf16.mxu1 %v1993_v0  ;;  %v93_v18 = vld [vmem:[%s2583_s2] sm:$0x3]  ;;  %vm294_vm4 = vcmp.gt.f32.partialorder %v1617_v37, 0.0  ;;  %s1997_s10 = smov 96  }
  0x19   :  { %1842 = vset.pattern.permute.xlu0 %v1995_v9  ;;  %1843 = vset.pattern.permute.xlu1 %v1995_v9  ;;  %vm186_vm3 = vcmp.gt.f32.partialorder %v93_v18, 0.0  ;;  %v94_v24 = vld [vmem:[%s2581_s0] sm:$0x3]  ;;  %v295_v41 = vsel %vm294_vm4, 1, %v1995_v9 }
  0x1a   :  { %v187_v23 = vsel %vm186_vm3, 1, %v1995_v9 }
  0x1b   :  { %1707 = vmatpush3.bf16.msra.mxu0 %v2079_v3  ;;  %1715 = vmatpush3.bf16.msra.mxu1 %v2086_v4 }
  0x1c   :  { %v91_v5 = vld [vmem:[#allocation2] sm:$0x3]  ;;  %v92_v6 = vld [vmem:[#allocation3] sm:$0x3]  ;;  %1720 = vmatprep.subr.bf16.mxu0 %v1993_v0  ;;  %1728 = vmatprep.subr.bf16.mxu1 %v1993_v0 }
  0x1d   :  { %v95_v7 = vpack.c.bf16 %v91_v5, %v91_v5  ;;  %v204_v8 = vpack.c.bf16 %v92_v6, %v92_v6 }
  0x1f   :  { %1709 = vmatmul.mubr.msk.bf16.vlgmr.msra.gmra.mrb[0].mxu0 %vm114_vm2, %v95_v7  ;;  %1717 = vmatmul.mubr.msk.bf16.vlgmr.msra.gmra.mrb[0].mxu1 %vm114_vm2, %v204_v8 }
  0x20   :  { %1721 = vmatpush3.bf16.msra.mxu0 %v2068_v1  ;;  %1729 = vmatpush3.bf16.msra.mxu1 %v2073_v2 }
  0x21   :  { %1722 = vmatprep.subr.bf16.mxu0 %v1993_v0  ;;  %1724 = vmatprep.mubr.msk.bf16.mxu0 %vm1994_vm1, %v1993_v0 }
  0x22   :  { %1730 = vmatprep.subr.bf16.mxu1 %v1993_v0  ;;  %1732 = vmatprep.mubr.msk.bf16.mxu1 %vm1994_vm1, %v1993_v0 }
  0x24   :  { %1723 = vmatpush3.bf16.msra.mxu0 %v2079_v3  ;;  %1731 = vmatpush3.bf16.msra.mxu1 %v2086_v4 }
  0x25   :  { %1736 = vmatprep.subr.bf16.mxu0 %v1993_v0  ;;  %1744 = vmatprep.subr.bf16.mxu1 %v1993_v0 }
  0xf2   :  { %v152_v11 = vpop.f32.mrb[0].mxu0  ;;  %v260_v15 = vpop.f32.mrb[0].mxu1 }
  0xf3   :  { %v153_v13 = vadd.f32 %v2112_v10, %v152_v11  ;;  %v1710_v14 = vpop.f32.mrb[1].mxu0  ;;  %v1718_v17 = vpop.f32.mrb[1].mxu1  ;;  %v261_v19 = vadd.f32 %v2117_v12, %v260_v15 }
  0xf4   :  { %v155_v16 = vpop.f32.mrb[2].mxu0  ;;  %v263_v20 = vpop.f32.mrb[2].mxu1 }
  0xf5   :  { %164 = vrot.lane.b32.xlu0 %v153_v13, %s1996_s28  ;;  %v1711_v21 = vpop.f32.mrb[3].mxu0  ;;  %v1719_v22 = vpop.f32.mrb[3].mxu1  ;;  %v158_v25 = vadd.f32 %v153_v13, %v94_v24  ;;  %v266_v28 = vadd.f32 %v261_v19, %v203_v26 }
  0xf7   :  { %v159_v27 = vmul.f32 0.5, %v158_v25  ;;  %v267_v29 = vmul.f32 0.5, %v266_v28 }
  0xf9   :  { %272 = vrot.lane.b32.xlu0 %v261_v19, %s1996_s28  ;;  %1848 = vtanh.f32 %v159_v27 }
  0xfa   :  { %1850 = vtanh.f32 %v267_v29 }
  0xfd   :  { %189 = vperm.xlu0 %1842, %v187_v23  }
 0x101   :  { %181 = vrot.lane.b32.xlu0 %v91_v5, %s1991_s11 }
 0x103   :  { %v1849_v30 = vpop.eup %1848 }
 0x104   :  { %v161_v31 = vmul.f32 0.5, %v1849_v30  ;;  %v1851_v32 = vpop.eup %1850 }
 0x105   :  { %289 = vrot.lane.b32.xlu0 %v92_v6, %s1991_s11  ;;  %v269_v34 = vmul.f32 0.5, %v1851_v32 }
 0x106   :  { %v162_v33 = vadd.f32 0.5, %v161_v31 }
 0x107   :  { %v270_v38 = vadd.f32 0.5, %v269_v34 }
 0x108   :  { %v174_v51 = vsub.f32 1.0, %v162_v33 }
 0x109   :  { %v282_v57 = vsub.f32 1.0, %v270_v38 }
 0x167   :  { %v165_v35 = vpop.permute.xlu0 %164 }
 0x168   :  { %v167_v36 = vmul.f32 %v165_v35, %v162_v33 }
 0x16a   :  { %169 = vrot.lane.b32.xlu1 %v167_v36, %s1996_s28 }
 0x16b   :  { %v273_v39 = vpop.permute.xlu0 %272 }
 0x16c   :  { %v275_v40 = vmul.f32 %v273_v39, %v270_v38 }
 0x16e   :  { %277 = vrot.lane.b32.xlu1 %v275_v40, %s1996_s28 }
 0x172   :  { %297 = vperm.xlu1 %1843, %v295_v41  }
 0x17c   :  { %v190_v48 = vpop.permute.xlu0 %189 }
 0x17d   :  { %vm191_vm5 = vcmp.eq.s32.totalorder %v190_v48, 1 }
 0x180   :  { %v182_v50 = vpop.permute.xlu0 %181 }
 0x181   :  { %v184_v53 = vmul.f32 %v182_v50, %v162_v33  ;;  %v1622_v33 = vld [vmem:[%s2583_s2 + $0x2] sm:$0x3] }
 0x182   :  { %vm383_vm7 = vcmp.gt.f32.partialorder %v1622_v33, 0.0 }
 0x183   :  { %v384_v41 = vsel %vm383_vm7, 1, %v1995_v9 }
 0x184   :  { %v290_v55 = vpop.permute.xlu0 %289 }
 0x185   :  { %v292_v59 = vmul.f32 %v290_v55, %v270_v38  ;;  %v1625_v38 = vld [vmem:[%s2584_s3 + $0xc] sm:$0x3] }
 0x186   :  { %vm472_vm8 = vcmp.gt.f32.partialorder %v1625_v38, 0.0 }
 0x1dc   :  { %v170_v42 = vpop.permute.xlu1 %169 }
 0x1dd   :  { %v172_v43 = vadd.f32 %v170_v42, %v94_v24  ;;  %v1623_v24 = vld [vmem:[%s2581_s0 + $0x2] sm:$0x3] }
 0x1df   :  { %1852 = vtanh.f32 %v172_v43  ;;  %v473_v43 = vsel %vm472_vm8, 1, %v1995_v9 }
 0x1e0   :  { %v278_v44 = vpop.permute.xlu1 %277 }
 0x1e1   :  { %v280_v45 = vadd.f32 %v278_v44, %v203_v26  ;;  %v400_v26 = vld [vmem:[#allocation4 + $0xc] sm:$0x3] }
 0x1e3   :  { %1854 = vtanh.f32 %v280_v45 }
 0x1e9   :  { %v1853_v46 = vpop.eup %1852 }
 0x1ea   :  { %176 = vrot.lane.b32.xlu1 %v1853_v46, %s1997_s10 }
 0x1ed   :  { %v1855_v47 = vpop.eup %1854 }
 0x1ee   :  { %284 = vrot.lane.b32.xlu1 %v1855_v47, %s1997_s10 }
 0x1f1   :  { %v298_v49 = vpop.permute.xlu1 %297 }
 0x1f2   :  { %vm299_vm6 = vcmp.eq.s32.totalorder %v298_v49, 1 }
 0x25c   :  { %v177_v52 = vpop.permute.xlu1 %176 }
 0x25d   :  { %v179_v54 = vmul.f32 %v177_v52, %v174_v51 }
 0x25f   :  { %v185_v56 = vadd.f32 %v184_v53, %v179_v54 }
 0x260   :  { %v285_v58 = vpop.permute.xlu1 %284 }
 0x261   :  { %v287_v60 = vmul.f32 %v285_v58, %v282_v57  ;;  %v2140_v61 = vsel %vm191_vm5, %v185_v56, %v182_v50  ;;  %v2142_v62 = vsel %vm191_vm5, %v185_v56, 0.0 }
 0x262   :  { %v312_v63 = vpack.c.bf16 %v2140_v61, %v2140_v61 }
 0x263   :  { %v293_v5 = vadd.f32 %v292_v59, %v287_v60 }
 0x264   :  { %314 = vrot.lane.b32.xlu1 %v312_v63, %s1997_s10 }
 0x265   :  { %v2147_v6 = vsel %vm299_vm6, %v293_v5, %v290_v55  ;;  %v2149_v7 = vsel %vm299_vm6, %v293_v5, 0.0 }
 0x266   :  { %v401_v8 = vpack.c.bf16 %v2147_v6, %v2147_v6 }
 0x268   :  { %403 = vrot.lane.b32.xlu0 %v401_v8, %s1997_s10 }
 0x2d6   :  { %v315_v11 = vpop.permute.xlu1 %314 }
 0x2d7   :  { %1725 = vmatmul.mubr.msk.bf16.vlgmr.msra.gmra.mrb[4].mxu0 %vm114_vm2, %v315_v11 }
 0x2d8   :  { %1737 = vmatpush3.bf16.msra.mxu0 %v2068_v1  ;;  %1740 = vmatprep.mubr.msk.bf16.mxu0 %vm1994_vm1, %v1993_v0 }
 0x2d9   :  { %1738 = vmatprep.subr.bf16.mxu0 %v1993_v0 }
 0x2da   :  { %v404_v13 = vpop.permute.xlu0 %403 }
 0x2db   :  { %1733 = vmatmul.mubr.msk.bf16.vlgmr.msra.gmra.mrb[4].mxu1 %vm114_vm2, %v404_v13 }
 0x2dc   :  { %1745 = vmatpush3.bf16.msra.mxu1 %v2073_v2  ;;  %1739 = vmatpush3.bf16.msra.mxu0 %v2079_v3 }
 0x2dd   :  { %1746 = vmatprep.subr.bf16.mxu1 %v1993_v0  ;;  %1748 = vmatprep.mubr.msk.bf16.mxu1 %vm1994_vm1, %v1993_v0 }
 0x2de   :  { %1752 = vmatprep.subr.bf16.mxu0 %v1993_v0 }
 0x2e0   :  { %1747 = vmatpush3.bf16.msra.mxu1 %v2086_v4 }
 0x2e1   :  { %1760 = vmatprep.subr.bf16.mxu1 %v1993_v0 }
 0x3aa   :  { %v353_v14 = vpop.f32.mrb[4].mxu0 }
 0x3ab   :  { %v354_v15 = vadd.f32 %v2112_v10, %v353_v14  ;;  %v1726_v16 = vpop.f32.mrb[5].mxu0 }
 0x3ac   :  { %v356_v17 = vpop.f32.mrb[6].mxu0 }
 0x3ad   :  { %365 = vrot.lane.b32.xlu1 %v354_v15, %s1996_s28  ;;  %v1727_v18 = vpop.f32.mrb[7].mxu0  ;;  %v359_v25 = vadd.f32 %v1623_v24, %v354_v15 }
 0x3ae   :  { %v442_v19 = vpop.f32.mrb[4].mxu1 }
 0x3af   :  { %v443_v20 = vadd.f32 %v2117_v12, %v442_v19  ;;  %v1734_v21 = vpop.f32.mrb[5].mxu1  ;;  %v360_v27 = vmul.f32 0.5, %v359_v25 }
 0x3b0   :  { %v445_v22 = vpop.f32.mrb[6].mxu1 }
 0x3b1   :  { %454 = vrot.lane.b32.xlu0 %v443_v20, %s1996_s28  ;;  %v1735_v23 = vpop.f32.mrb[7].mxu1  ;;  %v448_v28 = vadd.f32 %v443_v20, %v400_v26  ;;  %1856 = vtanh.f32 %v360_v27 }
 0x3b3   :  { %v449_v29 = vmul.f32 0.5, %v448_v28  ;;  %v578_v28 = vld [vmem:[#allocation4 + $0xa] sm:$0x3] }
 0x3b5   :  { %1858 = vtanh.f32 %v449_v29 }
 0x3bb   :  { %v1857_v30 = vpop.eup %1856 }
 0x3bc   :  { %v362_v31 = vmul.f32 0.5, %v1857_v30 }
 0x3be   :  { %v363_v34 = vadd.f32 0.5, %v362_v31 }
 0x3bf   :  { %v1859_v32 = vpop.eup %1858 }
 0x3c0   :  { %v451_v35 = vmul.f32 0.5, %v1859_v32  ;;  %v375_v51 = vsub.f32 1.0, %v363_v34  ;;  %v381_v54 = vmul.f32 %v363_v34, %v2140_v61 }
 0x3c2   :  { %v452_v39 = vadd.f32 0.5, %v451_v35  ;;  %v1627_v35 = vld [vmem:[%s2583_s2 + $0x4] sm:$0x3] }
 0x3c3   :  { %vm561_vm11 = vcmp.gt.f32.partialorder %v1627_v35, 0.0 }
 0x3c4   :  { %v464_v57 = vsub.f32 1.0, %v452_v39  ;;  %v470_v59 = vmul.f32 %v452_v39, %v2147_v6 }
 0x41f   :  { %v366_v36 = vpop.permute.xlu1 %365 }
 0x420   :  { %v368_v37 = vmul.f32 %v366_v36, %v363_v34 }
 0x422   :  { %370 = vrot.lane.b32.xlu1 %v368_v37, %s1996_s28 }
 0x423   :  { %v455_v40 = vpop.permute.xlu0 %454 }
 0x424   :  { %v457_v42 = vmul.f32 %v455_v40, %v452_v39  ;;  %v1630_v40 = vld [vmem:[%s2584_s3 + $0xa] sm:$0x3] }
 0x425   :  { %vm650_vm12 = vcmp.gt.f32.partialorder %v1630_v40, 0.0 }
 0x426   :  { %459 = vrot.lane.b32.xlu0 %v457_v42, %s1996_s28  ;;  %386 = vperm.xlu1 %1843, %v384_v41  }
 0x42a   :  { %475 = vperm.xlu0 %1842, %v473_v43   ;;  %v562_v43 = vsel %vm561_vm11, 1, %v1995_v9 }
 0x494   :  { %v371_v44 = vpop.permute.xlu1 %370 }
 0x495   :  { %v373_v45 = vadd.f32 %v1623_v24, %v371_v44 }
 0x497   :  { %1860 = vtanh.f32 %v373_v45  ;;  %v651_v45 = vsel %vm650_vm12, 1, %v1995_v9 }
 0x498   :  { %v460_v46 = vpop.permute.xlu0 %459 }
 0x499   :  { %v462_v47 = vadd.f32 %v460_v46, %v400_v26  ;;  %v1628_v26 = vld [vmem:[%s2581_s0 + $0x4] sm:$0x3] }
 0x49b   :  { %1862 = vtanh.f32 %v462_v47 }
 0x4a1   :  { %v1861_v48 = vpop.eup %1860 }
 0x4a2   :  { %377 = vrot.lane.b32.xlu1 %v1861_v48, %s1997_s10 }
 0x4a5   :  { %v1863_v49 = vpop.eup %1862  ;;  %v387_v50 = vpop.permute.xlu1 %386 }
 0x4a6   :  { %466 = vrot.lane.b32.xlu0 %v1863_v49, %s1997_s10  ;;  %vm388_vm9 = vcmp.eq.s32.totalorder %v387_v50, 1 }
 0x4a9   :  { %v476_v52 = vpop.permute.xlu0 %475 }
 0x4aa   :  { %vm477_vm10 = vcmp.eq.s32.totalorder %v476_v52, 1 }
 0x514   :  { %v378_v53 = vpop.permute.xlu1 %377 }
 0x515   :  { %v380_v55 = vmul.f32 %v378_v53, %v375_v51 }
 0x517   :  { %v382_v56 = vadd.f32 %v381_v54, %v380_v55 }
 0x518   :  { %v467_v58 = vpop.permute.xlu0 %466 }
 0x519   :  { %v469_v60 = vmul.f32 %v467_v58, %v464_v57  ;;  %v2190_v63 = vsel %vm388_vm9, %v382_v56, %v2140_v61  ;;  %v2192_v5 = vsel %vm388_vm9, %v382_v56, 0.0 }
 0x51a   :  { %v490_v8 = vpack.c.bf16 %v2190_v63, %v2190_v63 }
 0x51b   :  { %v471_v11 = vadd.f32 %v470_v59, %v469_v60 }
 0x51c   :  { %492 = vrot.lane.b32.xlu1 %v490_v8, %s1997_s10 }
 0x51d   :  { %v2198_v13 = vsel %vm477_vm10, %v471_v11, %v2147_v6  ;;  %v2200_v14 = vsel %vm477_vm10, %v471_v11, 0.0 }
 0x51e   :  { %v579_v15 = vpack.c.bf16 %v2198_v13, %v2198_v13 }
 0x520   :  { %581 = vrot.lane.b32.xlu0 %v579_v15, %s1997_s10 }
 0x58e   :  { %v493_v61 = vpop.permute.xlu1 %492 }
 0x58f   :  { %1741 = vmatmul.mubr.msk.bf16.vlgmr.msra.gmra.mrb[8].mxu0 %vm114_vm2, %v493_v61 }
 0x590   :  { %1753 = vmatpush3.bf16.msra.mxu0 %v2068_v1  ;;  %1756 = vmatprep.mubr.msk.bf16.mxu0 %vm1994_vm1, %v1993_v0 }
 0x591   :  { %1754 = vmatprep.subr.bf16.mxu0 %v1993_v0 }
 0x592   :  { %v582_v16 = vpop.permute.xlu0 %581 }
 0x593   :  { %1749 = vmatmul.mubr.msk.bf16.vlgmr.msra.gmra.mrb[8].mxu1 %vm114_vm2, %v582_v16 }
 0x594   :  { %1761 = vmatpush3.bf16.msra.mxu1 %v2073_v2  ;;  %1755 = vmatpush3.bf16.msra.mxu0 %v2079_v3 }
 0x595   :  { %1762 = vmatprep.subr.bf16.mxu1 %v1993_v0  ;;  %1764 = vmatprep.mubr.msk.bf16.mxu1 %vm1994_vm1, %v1993_v0 }
 0x596   :  { %1768 = vmatprep.subr.bf16.mxu0 %v1993_v0 }
 0x598   :  { %1763 = vmatpush3.bf16.msra.mxu1 %v2086_v4 }
 0x599   :  { %1776 = vmatprep.subr.bf16.mxu1 %v1993_v0 }
 0x662   :  { %v531_v6 = vpop.f32.mrb[8].mxu0 }
 0x663   :  { %v532_v17 = vadd.f32 %v2112_v10, %v531_v6  ;;  %v1742_v18 = vpop.f32.mrb[9].mxu0 }
 0x664   :  { %v534_v19 = vpop.f32.mrb[10].mxu0 }
 0x665   :  { %543 = vrot.lane.b32.xlu1 %v532_v17, %s1996_s28  ;;  %v1743_v20 = vpop.f32.mrb[11].mxu0  ;;  %v537_v27 = vadd.f32 %v1628_v26, %v532_v17 }
 0x666   :  { %v620_v21 = vpop.f32.mrb[8].mxu1 }
 0x667   :  { %v621_v22 = vadd.f32 %v2117_v12, %v620_v21  ;;  %v1750_v23 = vpop.f32.mrb[9].mxu1  ;;  %v538_v29 = vmul.f32 0.5, %v537_v27 }
 0x668   :  { %v623_v24 = vpop.f32.mrb[10].mxu1 }
 0x669   :  { %632 = vrot.lane.b32.xlu0 %v621_v22, %s1996_s28  ;;  %v1751_v25 = vpop.f32.mrb[11].mxu1  ;;  %v626_v30 = vadd.f32 %v621_v22, %v578_v28  ;;  %1864 = vtanh.f32 %v538_v29 }
 0x66b   :  { %v627_v31 = vmul.f32 0.5, %v626_v30  ;;  %v1633_v30 = vld [vmem:[%s2581_s0 + $0x6] sm:$0x3] }
 0x66d   :  { %1866 = vtanh.f32 %v627_v31 }
 0x673   :  { %v1865_v32 = vpop.eup %1864 }
 0x674   :  { %v540_v33 = vmul.f32 0.5, %v1865_v32  ;;  %v756_v32 = vld [vmem:[#allocation4 + $0x8] sm:$0x3] }
 0x676   :  { %v541_v36 = vadd.f32 0.5, %v540_v33 }
 0x677   :  { %v1867_v34 = vpop.eup %1866 }
 0x678   :  { %v629_v37 = vmul.f32 0.5, %v1867_v34  ;;  %v553_v53 = vsub.f32 1.0, %v541_v36  ;;  %v559_v56 = vmul.f32 %v541_v36, %v2190_v63 }
 0x67a   :  { %v630_v41 = vadd.f32 0.5, %v629_v37 }
 0x67c   :  { %v642_v59 = vsub.f32 1.0, %v630_v41  ;;  %v648_v8 = vmul.f32 %v630_v41, %v2198_v13 }
 0x6d7   :  { %v544_v38 = vpop.permute.xlu1 %543 }
 0x6d8   :  { %v546_v39 = vmul.f32 %v544_v38, %v541_v36 }
 0x6da   :  { %548 = vrot.lane.b32.xlu1 %v546_v39, %s1996_s28  ;;  %v1632_v39 = vld [vmem:[%s2583_s2 + $0x6] sm:$0x3] }
 0x6db   :  { %v633_v42 = vpop.permute.xlu0 %632  ;;  %vm739_vm15 = vcmp.gt.f32.partialorder %v1632_v39, 0.0 }
 0x6dc   :  { %v635_v44 = vmul.f32 %v633_v42, %v630_v41 }
 0x6de   :  { %637 = vrot.lane.b32.xlu0 %v635_v44, %s1996_s28  ;;  %564 = vperm.xlu1 %1843, %v562_v43   ;;  %v1635_v44 = vld [vmem:[%s2584_s3 + $0x8] sm:$0x3] }
 0x6df   :  { %vm828_vm3 = vcmp.gt.f32.partialorder %v1635_v44, 0.0 }
 0x6e2   :  { %653 = vperm.xlu0 %1842, %v651_v45  }
 0x74c   :  { %v549_v46 = vpop.permute.xlu1 %548 }
 0x74d   :  { %v551_v47 = vadd.f32 %v1628_v26, %v549_v46 }
 0x74f   :  { %1868 = vtanh.f32 %v551_v47  ;;  %v740_v47 = vsel %vm739_vm15, 1, %v1995_v9 }
 0x750   :  { %v638_v48 = vpop.permute.xlu0 %637 }
 0x751   :  { %v640_v49 = vadd.f32 %v638_v48, %v578_v28 }
 0x753   :  { %1870 = vtanh.f32 %v640_v49  ;;  %v829_v49 = vsel %vm828_vm3, 1, %v1995_v9 }
 0x759   :  { %v1869_v50 = vpop.eup %1868 }
 0x75a   :  { %555 = vrot.lane.b32.xlu1 %v1869_v50, %s1997_s10 }
 0x75d   :  { %v1871_v51 = vpop.eup %1870  ;;  %v565_v52 = vpop.permute.xlu1 %564 }
 0x75e   :  { %644 = vrot.lane.b32.xlu0 %v1871_v51, %s1997_s10  ;;  %vm566_vm13 = vcmp.eq.s32.totalorder %v565_v52, 1 }
 0x761   :  { %v654_v54 = vpop.permute.xlu0 %653 }
 0x762   :  { %vm655_vm14 = vcmp.eq.s32.totalorder %v654_v54, 1 }
 0x7cc   :  { %v556_v55 = vpop.permute.xlu1 %555 }
 0x7cd   :  { %v558_v57 = vmul.f32 %v556_v55, %v553_v53 }
 0x7cf   :  { %v560_v58 = vadd.f32 %v559_v56, %v558_v57 }
 0x7d0   :  { %v645_v60 = vpop.permute.xlu0 %644 }
 0x7d1   :  { %v647_v11 = vmul.f32 %v645_v60, %v642_v59  ;;  %v2241_v15 = vsel %vm566_vm13, %v560_v58, %v2190_v63  ;;  %v2243_v61 = vsel %vm566_vm13, %v560_v58, 0.0 }
 0x7d2   :  { %v668_v16 = vpack.c.bf16 %v2241_v15, %v2241_v15 }
 0x7d3   :  { %v649_v6 = vadd.f32 %v648_v8, %v647_v11 }
 0x7d4   :  { %670 = vrot.lane.b32.xlu1 %v668_v16, %s1997_s10 }
 0x7d5   :  { %v2249_v17 = vsel %vm655_vm14, %v649_v6, %v2198_v13  ;;  %v2251_v18 = vsel %vm655_vm14, %v649_v6, 0.0 }
 0x7d6   :  { %v757_v19 = vpack.c.bf16 %v2249_v17, %v2249_v17 }
 0x7d8   :  { %759 = vrot.lane.b32.xlu0 %v757_v19, %s1997_s10 }
 0x846   :  { %v671_v63 = vpop.permute.xlu1 %670 }
 0x847   :  { %1757 = vmatmul.mubr.msk.bf16.vlgmr.msra.gmra.mrb[12].mxu0 %vm114_vm2, %v671_v63 }
 0x848   :  { %1769 = vmatpush3.bf16.msra.mxu0 %v2068_v1  ;;  %1772 = vmatprep.mubr.msk.bf16.mxu0 %vm1994_vm1, %v1993_v0 }
 0x849   :  { %1770 = vmatprep.subr.bf16.mxu0 %v1993_v0 }
 0x84a   :  { %v760_v20 = vpop.permute.xlu0 %759 }
 0x84b   :  { %1765 = vmatmul.mubr.msk.bf16.vlgmr.msra.gmra.mrb[12].mxu1 %vm114_vm2, %v760_v20 }
 0x84c   :  { %1777 = vmatpush3.bf16.msra.mxu1 %v2073_v2  ;;  %1771 = vmatpush3.bf16.msra.mxu0 %v2079_v3 }
 0x84d   :  { %1778 = vmatprep.subr.bf16.mxu1 %v1993_v0  ;;  %1780 = vmatprep.mubr.msk.bf16.mxu1 %vm1994_vm1, %v1993_v0 }
 0x84e   :  { %1784 = vmatprep.subr.bf16.mxu0 %v1993_v0 }
 0x850   :  { %1779 = vmatpush3.bf16.msra.mxu1 %v2086_v4 }
 0x851   :  { %1792 = vmatprep.subr.bf16.mxu1 %v1993_v0 }
 0x91a   :  { %v709_v13 = vpop.f32.mrb[12].mxu0 }
 0x91b   :  { %v710_v21 = vadd.f32 %v2112_v10, %v709_v13  ;;  %v1758_v22 = vpop.f32.mrb[13].mxu0 }
 0x91c   :  { %v712_v23 = vpop.f32.mrb[14].mxu0 }
 0x91d   :  { %721 = vrot.lane.b32.xlu1 %v710_v21, %s1996_s28  ;;  %v1759_v24 = vpop.f32.mrb[15].mxu0  ;;  %v715_v31 = vadd.f32 %v1633_v30, %v710_v21 }
 0x91e   :  { %v798_v25 = vpop.f32.mrb[12].mxu1 }
 0x91f   :  { %v799_v26 = vadd.f32 %v2117_v12, %v798_v25  ;;  %v1766_v27 = vpop.f32.mrb[13].mxu1  ;;  %v716_v33 = vmul.f32 0.5, %v715_v31 }
 0x920   :  { %v801_v28 = vpop.f32.mrb[14].mxu1 }
 0x921   :  { %810 = vrot.lane.b32.xlu0 %v799_v26, %s1996_s28  ;;  %v1767_v29 = vpop.f32.mrb[15].mxu1  ;;  %v804_v34 = vadd.f32 %v799_v26, %v756_v32  ;;  %1872 = vtanh.f32 %v716_v33 }
 0x923   :  { %v805_v35 = vmul.f32 0.5, %v804_v34 }
 0x925   :  { %1874 = vtanh.f32 %v805_v35 }
 0x92b   :  { %v1873_v36 = vpop.eup %1872 }
 0x92c   :  { %v718_v37 = vmul.f32 0.5, %v1873_v36  ;;  %v1638_v36 = vld [vmem:[%s2581_s0 + $0x8] sm:$0x3] }
 0x92e   :  { %v719_v40 = vadd.f32 0.5, %v718_v37 }
 0x92f   :  { %v1875_v38 = vpop.eup %1874 }
 0x930   :  { %v807_v41 = vmul.f32 0.5, %v1875_v38  ;;  %v731_v57 = vsub.f32 1.0, %v719_v40  ;;  %v737_v60 = vmul.f32 %v719_v40, %v2241_v15  ;;  %v934_v38 = vld [vmem:[#allocation4 + $0x6] sm:$0x3] }
 0x932   :  { %v808_v45 = vadd.f32 0.5, %v807_v41 }
 0x934   :  { %v820_v16 = vsub.f32 1.0, %v808_v45  ;;  %v826_v19 = vmul.f32 %v808_v45, %v2249_v17 }
 0x98f   :  { %v722_v42 = vpop.permute.xlu1 %721 }
 0x990   :  { %v724_v43 = vmul.f32 %v722_v42, %v719_v40 }
 0x992   :  { %726 = vrot.lane.b32.xlu1 %v724_v43, %s1996_s28 }
 0x993   :  { %v811_v46 = vpop.permute.xlu0 %810 }
 0x994   :  { %v813_v48 = vmul.f32 %v811_v46, %v808_v45  ;;  %v1637_v45 = vld [vmem:[%s2583_s2 + $0x8] sm:$0x3] }
 0x995   :  { %vm917_vm6 = vcmp.gt.f32.partialorder %v1637_v45, 0.0 }
 0x996   :  { %815 = vrot.lane.b32.xlu0 %v813_v48, %s1996_s28  ;;  %742 = vperm.xlu1 %1843, %v740_v47  }
 0x99a   :  { %831 = vperm.xlu0 %1842, %v829_v49  }
 0xa04   :  { %v727_v50 = vpop.permute.xlu1 %726 }
 0xa05   :  { %v729_v51 = vadd.f32 %v1633_v30, %v727_v50  ;;  %v1640_v50 = vld [vmem:[%s2584_s3 + $0x6] sm:$0x3] }
 0xa06   :  { %vm1006_vm7 = vcmp.gt.f32.partialorder %v1640_v50, 0.0 }
 0xa07   :  { %1876 = vtanh.f32 %v729_v51 }
 0xa08   :  { %v816_v52 = vpop.permute.xlu0 %815 }
 0xa09   :  { %v818_v53 = vadd.f32 %v816_v52, %v756_v32 }
 0xa0b   :  { %1878 = vtanh.f32 %v818_v53  ;;  %v918_v53 = vsel %vm917_vm6, 1, %v1995_v9 }
 0xa11   :  { %v1877_v54 = vpop.eup %1876 }
 0xa12   :  { %733 = vrot.lane.b32.xlu1 %v1877_v54, %s1997_s10 }
 0xa15   :  { %v1879_v55 = vpop.eup %1878  ;;  %v743_v56 = vpop.permute.xlu1 %742 }
 0xa16   :  { %822 = vrot.lane.b32.xlu0 %v1879_v55, %s1997_s10  ;;  %vm744_vm4 = vcmp.eq.s32.totalorder %v743_v56, 1  ;;  %v1007_v55 = vsel %vm1006_vm7, 1, %v1995_v9 }
 0xa19   :  { %v832_v58 = vpop.permute.xlu0 %831 }
 0xa1a   :  { %vm833_vm5 = vcmp.eq.s32.totalorder %v832_v58, 1 }
 0xa84   :  { %v734_v59 = vpop.permute.xlu1 %733 }
 0xa85   :  { %v736_v8 = vmul.f32 %v734_v59, %v731_v57 }
 0xa87   :  { %v738_v11 = vadd.f32 %v737_v60, %v736_v8 }
 0xa88   :  { %v823_v6 = vpop.permute.xlu0 %822 }
 0xa89   :  { %v825_v63 = vmul.f32 %v823_v6, %v820_v16  ;;  %v2292_v20 = vsel %vm744_vm4, %v738_v11, %v2241_v15  ;;  %v2294_v13 = vsel %vm744_vm4, %v738_v11, 0.0 }
 0xa8a   :  { %v846_v21 = vpack.c.bf16 %v2292_v20, %v2292_v20 }
 0xa8b   :  { %v827_v22 = vadd.f32 %v826_v19, %v825_v63 }
 0xa8c   :  { %848 = vrot.lane.b32.xlu1 %v846_v21, %s1997_s10 }
 0xa8d   :  { %v2300_v23 = vsel %vm833_vm5, %v827_v22, %v2249_v17  ;;  %v2302_v24 = vsel %vm833_vm5, %v827_v22, 0.0 }
 0xa8e   :  { %v935_v25 = vpack.c.bf16 %v2300_v23, %v2300_v23 }
 0xa90   :  { %937 = vrot.lane.b32.xlu0 %v935_v25, %s1997_s10 }
 0xafe   :  { %v849_v15 = vpop.permute.xlu1 %848 }
 0xaff   :  { %1773 = vmatmul.mubr.msk.bf16.vlgmr.msra.gmra.mrb[16].mxu0 %vm114_vm2, %v849_v15 }
 0xb00   :  { %1785 = vmatpush3.bf16.msra.mxu0 %v2068_v1  ;;  %1788 = vmatprep.mubr.msk.bf16.mxu0 %vm1994_vm1, %v1993_v0 }
 0xb01   :  { %1786 = vmatprep.subr.bf16.mxu0 %v1993_v0 }
 0xb02   :  { %v938_v26 = vpop.permute.xlu0 %937 }
 0xb03   :  { %1781 = vmatmul.mubr.msk.bf16.vlgmr.msra.gmra.mrb[16].mxu1 %vm114_vm2, %v938_v26 }
 0xb04   :  { %1793 = vmatpush3.bf16.msra.mxu1 %v2073_v2  ;;  %1787 = vmatpush3.bf16.msra.mxu0 %v2079_v3 }
 0xb05   :  { %1794 = vmatprep.subr.bf16.mxu1 %v1993_v0  ;;  %1796 = vmatprep.mubr.msk.bf16.mxu1 %vm1994_vm1, %v1993_v0 }
 0xb06   :  { %1800 = vmatprep.subr.bf16.mxu0 %v1993_v0 }
 0xb08   :  { %1795 = vmatpush3.bf16.msra.mxu1 %v2086_v4 }
 0xb09   :  { %1808 = vmatprep.subr.bf16.mxu1 %v1993_v0 }
 0xbd2   :  { %v887_v17 = vpop.f32.mrb[16].mxu0 }
 0xbd3   :  { %v888_v27 = vadd.f32 %v2112_v10, %v887_v17  ;;  %v1774_v28 = vpop.f32.mrb[17].mxu0 }
 0xbd4   :  { %v890_v29 = vpop.f32.mrb[18].mxu0 }
 0xbd5   :  { %899 = vrot.lane.b32.xlu1 %v888_v27, %s1996_s28  ;;  %v1775_v30 = vpop.f32.mrb[19].mxu0  ;;  %v893_v37 = vadd.f32 %v1638_v36, %v888_v27 }
 0xbd6   :  { %v976_v31 = vpop.f32.mrb[16].mxu1 }
 0xbd7   :  { %v977_v32 = vadd.f32 %v2117_v12, %v976_v31  ;;  %v1782_v33 = vpop.f32.mrb[17].mxu1  ;;  %v894_v39 = vmul.f32 0.5, %v893_v37 }
 0xbd8   :  { %v979_v34 = vpop.f32.mrb[18].mxu1 }
 0xbd9   :  { %988 = vrot.lane.b32.xlu0 %v977_v32, %s1996_s28  ;;  %v1783_v35 = vpop.f32.mrb[19].mxu1  ;;  %v982_v40 = vadd.f32 %v977_v32, %v934_v38  ;;  %1880 = vtanh.f32 %v894_v39 }
 0xbdb   :  { %v983_v41 = vmul.f32 0.5, %v982_v40 }
 0xbdd   :  { %1882 = vtanh.f32 %v983_v41 }
 0xbe3   :  { %v1881_v42 = vpop.eup %1880 }
 0xbe4   :  { %v896_v43 = vmul.f32 0.5, %v1881_v42  ;;  %v1112_v42 = vld [vmem:[#allocation4 + $0x4] sm:$0x3] }
 0xbe6   :  { %v897_v46 = vadd.f32 0.5, %v896_v43 }
 0xbe7   :  { %v1883_v44 = vpop.eup %1882 }
 0xbe8   :  { %v985_v47 = vmul.f32 0.5, %v1883_v44  ;;  %v909_v16 = vsub.f32 1.0, %v897_v46  ;;  %v915_v63 = vmul.f32 %v897_v46, %v2292_v20 }
 0xbea   :  { %v986_v51 = vadd.f32 0.5, %v985_v47 }
 0xbec   :  { %v998_v25 = vsub.f32 1.0, %v986_v51  ;;  %v1004_v26 = vmul.f32 %v986_v51, %v2300_v23 }
 0xc47   :  { %v900_v48 = vpop.permute.xlu1 %899 }
 0xc48   :  { %v902_v49 = vmul.f32 %v900_v48, %v897_v46 }
 0xc4a   :  { %904 = vrot.lane.b32.xlu1 %v902_v49, %s1996_s28 }
 0xc4b   :  { %v989_v52 = vpop.permute.xlu0 %988 }
 0xc4c   :  { %v991_v54 = vmul.f32 %v989_v52, %v986_v51  ;;  %v1645_v52 = vld [vmem:[%s2584_s3 + $0x4] sm:$0x3] }
 0xc4d   :  { %vm1184_vm11 = vcmp.gt.f32.partialorder %v1645_v52, 0.0 }
 0xc4e   :  { %993 = vrot.lane.b32.xlu0 %v991_v54, %s1996_s28  ;;  %920 = vperm.xlu1 %1843, %v918_v53  }
 0xc52   :  { %1009 = vperm.xlu0 %1842, %v1007_v55  }
 0xcbc   :  { %v905_v56 = vpop.permute.xlu1 %904 }
 0xcbd   :  { %v907_v57 = vadd.f32 %v1638_v36, %v905_v56 }
 0xcbf   :  { %1884 = vtanh.f32 %v907_v57  ;;  %v1185_v57 = vsel %vm1184_vm11, 1, %v1995_v9 }
 0xcc0   :  { %v994_v58 = vpop.permute.xlu0 %993 }
 0xcc1   :  { %v996_v59 = vadd.f32 %v994_v58, %v934_v38 }
 0xcc3   :  { %1886 = vtanh.f32 %v996_v59 }
 0xcc9   :  { %v1885_v60 = vpop.eup %1884 }
 0xcca   :  { %911 = vrot.lane.b32.xlu1 %v1885_v60, %s1997_s10 }
 0xccd   :  { %v1887_v8 = vpop.eup %1886  ;;  %v921_v11 = vpop.permute.xlu1 %920 }
 0xcce   :  { %1000 = vrot.lane.b32.xlu0 %v1887_v8, %s1997_s10  ;;  %vm922_vm8 = vcmp.eq.s32.totalorder %v921_v11, 1 }
 0xcd1   :  { %v1010_v6 = vpop.permute.xlu0 %1009 }
 0xcd2   :  { %vm1011_vm9 = vcmp.eq.s32.totalorder %v1010_v6, 1 }
 0xd3c   :  { %v912_v19 = vpop.permute.xlu1 %911 }
 0xd3d   :  { %v914_v21 = vmul.f32 %v912_v19, %v909_v16 }
 0xd3f   :  { %v916_v22 = vadd.f32 %v915_v63, %v914_v21 }
 0xd40   :  { %v1001_v15 = vpop.permute.xlu0 %1000 }
 0xd41   :  { %v1003_v17 = vmul.f32 %v1001_v15, %v998_v25  ;;  %v2343_v27 = vsel %vm922_vm8, %v916_v22, %v2292_v20  ;;  %v2345_v28 = vsel %vm922_vm8, %v916_v22, 0.0 }
 0xd42   :  { %v1024_v29 = vpack.c.bf16 %v2343_v27, %v2343_v27 }
 0xd43   :  { %v1005_v30 = vadd.f32 %v1004_v26, %v1003_v17 }
 0xd44   :  { %1026 = vrot.lane.b32.xlu1 %v1024_v29, %s1997_s10 }
 0xd45   :  { %v2351_v31 = vsel %vm1011_vm9, %v1005_v30, %v2300_v23  ;;  %v2353_v32 = vsel %vm1011_vm9, %v1005_v30, 0.0 }
 0xd46   :  { %v1113_v33 = vpack.c.bf16 %v2351_v31, %v2351_v31 }
 0xd48   :  { %1115 = vrot.lane.b32.xlu0 %v1113_v33, %s1997_s10 }
 0xdb6   :  { %v1027_v20 = vpop.permute.xlu1 %1026 }
 0xdb7   :  { %1789 = vmatmul.mubr.msk.bf16.vlgmr.msra.gmra.mrb[20].mxu0 %vm114_vm2, %v1027_v20 }
 0xdb8   :  { %1801 = vmatpush3.bf16.msra.mxu0 %v2068_v1  ;;  %1804 = vmatprep.mubr.msk.bf16.mxu0 %vm1994_vm1, %v1993_v0 }
 0xdb9   :  { %1802 = vmatprep.subr.bf16.mxu0 %v1993_v0 }
 0xdba   :  { %v1116_v34 = vpop.permute.xlu0 %1115 }
 0xdbb   :  { %1797 = vmatmul.mubr.msk.bf16.vlgmr.msra.gmra.mrb[20].mxu1 %vm114_vm2, %v1116_v34 }
 0xdbc   :  { %1809 = vmatpush3.bf16.msra.mxu1 %v2073_v2  ;;  %1803 = vmatpush3.bf16.msra.mxu0 %v2079_v3 }
 0xdbd   :  { %1810 = vmatprep.subr.bf16.mxu1 %v1993_v0  ;;  %1812 = vmatprep.mubr.msk.bf16.mxu1 %vm1994_vm1, %v1993_v0 }
 0xdbe   :  { %1816 = vmatprep.subr.bf16.mxu0 %v1993_v0 }
 0xdc0   :  { %1811 = vmatpush3.bf16.msra.mxu1 %v2086_v4  ;;  %v1643_v4 = vld [vmem:[%s2581_s0 + $0xa] sm:$0x3] }
 0xdc1   :  { %1824 = vmatprep.subr.bf16.mxu1 %v1993_v0 }
 0xe8a   :  { %v1065_v1 = vpop.f32.mrb[20].mxu0 }
 0xe8b   :  { %v1066_v23 = vadd.f32 %v2112_v10, %v1065_v1  ;;  %v1790_v35 = vpop.f32.mrb[21].mxu0 }
 0xe8c   :  { %v1068_v36 = vpop.f32.mrb[22].mxu0 }
 0xe8d   :  { %1077 = vrot.lane.b32.xlu1 %v1066_v23, %s1996_s28  ;;  %v1791_v2 = vpop.f32.mrb[23].mxu0  ;;  %v1071_v41 = vadd.f32 %v1643_v4, %v1066_v23 }
 0xe8e   :  { %v1154_v3 = vpop.f32.mrb[20].mxu1  ;;  %v1912_v2 = vld [vmem:[%s2585_s4] sm:$0xff]  }
 0xe8f   :  { %v1155_v37 = vadd.f32 %v2117_v12, %v1154_v3  ;;  %v1798_v38 = vpop.f32.mrb[21].mxu1  ;;  %v1072_v10 = vmul.f32 0.5, %v1071_v41  ;;  %v1642_v12 = vld [vmem:[%s2583_s2 + $0xa] sm:$0x3]  ;;  %v1913_v3 = vld [vmem:[%s2585_s4 + $0x10] sm:$0xff]  }
 0xe90   :  { %v1157_v39 = vpop.f32.mrb[22].mxu1  ;;  %vm1095_vm10 = vcmp.gt.f32.partialorder %v1642_v12, 0.0  ;;  %v1915_v38 = vld [vmem:[%s2585_s4 + $0x18] sm:$0xff]   ;;  %v1648_v12 = vld [vmem:[%s2581_s0 + $0xc] sm:$0x3] }
 0xe91   :  { %1166 = vrot.lane.b32.xlu0 %v1155_v37, %s1996_s28  ;;  %v1799_v40 = vpop.f32.mrb[23].mxu1  ;;  %v1160_v43 = vadd.f32 %v1155_v37, %v1112_v42  ;;  %1888 = vtanh.f32 %v1072_v10  ;;  %v1096_v55 = vsel %vm1095_vm10, 1, %v1995_v9  ;;  %v1914_v37 = vld [vmem:[%s2585_s4 + $0x8] sm:$0xff]  }
 0xe92   :  { %v2432_v40 = vld [vmem:[%s2586_s5] ss:$0 sm:$0xff] }
 0xe93   :  { %v1161_v44 = vmul.f32 0.5, %v1160_v43 }
 0xe95   :  { %1890 = vtanh.f32 %v1161_v44 }
 0xe9b   :  { %v1889_v45 = vpop.eup %1888 }
 0xe9c   :  { %v1074_v46 = vmul.f32 0.5, %v1889_v45 }
 0xe9e   :  { %v1075_v48 = vadd.f32 0.5, %v1074_v46 }
 0xe9f   :  { %v1891_v47 = vpop.eup %1890 }
 0xea0   :  { %v1163_v49 = vmul.f32 0.5, %v1891_v47  ;;  %v1087_v19 = vsub.f32 1.0, %v1075_v48  ;;  %v1093_v22 = vmul.f32 %v1075_v48, %v2343_v27 }
 0xea2   :  { %v1164_v53 = vadd.f32 0.5, %v1163_v49  ;;  %v1290_v49 = vld [vmem:[#allocation4 + $0x2] sm:$0x3] }
 0xea4   :  { %v1176_v26 = vsub.f32 1.0, %v1164_v53  ;;  %v1182_v29 = vmul.f32 %v1164_v53, %v2351_v31 }
 0xeff   :  { %v1078_v50 = vpop.permute.xlu1 %1077 }
 0xf00   :  { %v1080_v51 = vmul.f32 %v1078_v50, %v1075_v48 }
 0xf02   :  { %1082 = vrot.lane.b32.xlu1 %v1080_v51, %s1996_s28 }
 0xf03   :  { %v1167_v54 = vpop.permute.xlu0 %1166 }
 0xf04   :  { %v1169_v56 = vmul.f32 %v1167_v54, %v1164_v53 }
 0xf06   :  { %1171 = vrot.lane.b32.xlu0 %v1169_v56, %s1996_s28  ;;  %1098 = vperm.xlu1 %1843, %v1096_v55   ;;  %v1647_v56 = vld [vmem:[%s2583_s2 + $0xc] sm:$0x3] }
 0xf0a   :  { %1187 = vperm.xlu0 %1842, %v1185_v57  }
 0xf74   :  { %v1083_v58 = vpop.permute.xlu1 %1082 }
 0xf75   :  { %v1085_v59 = vadd.f32 %v1643_v4, %v1083_v58 }
 0xf77   :  { %1892 = vtanh.f32 %v1085_v59 }
 0xf78   :  { %v1172_v60 = vpop.permute.xlu0 %1171 }
 0xf79   :  { %v1174_v8 = vadd.f32 %v1172_v60, %v1112_v42 }
 0xf7b   :  { %1894 = vtanh.f32 %v1174_v8  ;;  %v1650_v8 = vld [vmem:[%s2584_s3 + $0x2] sm:$0x3] }
 0xf7c   :  { %vm1362_vm14 = vcmp.gt.f32.partialorder %v1650_v8, 0.0 }
 0xf81   :  { %v1893_v11 = vpop.eup %1892 }
 0xf82   :  { %1089 = vrot.lane.b32.xlu1 %v1893_v11, %s1997_s10 }
 0xf85   :  { %v1895_v16 = vpop.eup %1894  ;;  %v1099_v6 = vpop.permute.xlu1 %1098 }
 0xf86   :  { %1178 = vrot.lane.b32.xlu0 %v1895_v16, %s1997_s10  ;;  %vm1100_vm12 = vcmp.eq.s32.totalorder %v1099_v6, 1 }
 0xf89   :  { %v1188_v63 = vpop.permute.xlu0 %1187 }
 0xf8a   :  { %vm1189_vm13 = vcmp.eq.s32.totalorder %v1188_v63, 1  ;;  %v1363_v63 = vsel %vm1362_vm14, 1, %v1995_v9 }
 0xff4   :  { %v1090_v21 = vpop.permute.xlu1 %1089 }
 0xff5   :  { %v1092_v25 = vmul.f32 %v1090_v21, %v1087_v19 }
 0xff7   :  { %v1094_v15 = vadd.f32 %v1093_v22, %v1092_v25 }
 0xff8   :  { %v1179_v17 = vpop.permute.xlu0 %1178 }
 0xff9   :  { %v1181_v30 = vmul.f32 %v1179_v17, %v1176_v26  ;;  %v2394_v33 = vsel %vm1100_vm12, %v1094_v15, %v2343_v27  ;;  %v2396_v20 = vsel %vm1100_vm12, %v1094_v15, 0.0 }
 0xffa   :  { %v1202_v34 = vpack.c.bf16 %v2394_v33, %v2394_v33 }
 0xffb   :  { %v1183_v1 = vadd.f32 %v1182_v29, %v1181_v30 }
 0xffc   :  { %1204 = vrot.lane.b32.xlu1 %v1202_v34, %s1997_s10 }
 0xffd   :  { %v2402_v23 = vsel %vm1189_vm13, %v1183_v1, %v2351_v31  ;;  %v2404_v35 = vsel %vm1189_vm13, %v1183_v1, 0.0 }
 0xffe   :  { %v1291_v36 = vpack.c.bf16 %v2402_v23, %v2402_v23 }
0x1000   :  { %1293 = vrot.lane.b32.xlu0 %v1291_v36, %s1997_s10 }
0x106e   :  { %v1205_v27 = vpop.permute.xlu1 %1204 }
0x106f   :  { %1805 = vmatmul.mubr.msk.bf16.vlgmr.msra.gmra.mrb[24].mxu0 %vm114_vm2, %v1205_v27 }
0x1070   :  { %1817 = vmatpush3.bf16.msra.mxu0 %v1912_v2  ;;  %1820 = vmatprep.mubr.msk.bf16.mxu0 %vm1994_vm1, %v1993_v0 }
0x1071   :  { %1818 = vmatprep.subr.bf16.mxu0 %v1993_v0 }
0x1072   :  { %v1294_v31 = vpop.permute.xlu0 %1293 }
0x1073   :  { %1813 = vmatmul.mubr.msk.bf16.vlgmr.msra.gmra.mrb[24].mxu1 %vm114_vm2, %v1294_v31 }
0x1074   :  { %1825 = vmatpush3.bf16.msra.mxu1 %v1913_v3  ;;  %1819 = vmatpush3.bf16.msra.mxu0 %v1914_v37 }
0x1075   :  { %1826 = vmatprep.subr.bf16.mxu1 %v1993_v0  ;;  %1828 = vmatprep.mubr.msk.bf16.mxu1 %vm1994_vm1, %v1993_v0  ;;  %v2439_v0 = vld [vmem:[%s2586_s5 + $0x1] ss:$0 sm:$0xff]  ;;  %vm1273_vm1 = vcmp.gt.f32.partialorder %v1647_v56, 0.0  ;;  %v1466_v56 = vld [vmem:[#allocation4] sm:$0x3] }
0x1076   :  { %v1274_v6 = vsel %vm1273_vm1, 1, %v1995_v9 }
0x1078   :  { %1827 = vmatpush3.bf16.msra.mxu1 %v1915_v38 }
0x1142   :  { %v1243_v39 = vpop.f32.mrb[24].mxu0 }
0x1143   :  { %v1244_v4 = vadd.f32 %v2432_v40, %v1243_v39  ;;  %v1806_v41 = vpop.f32.mrb[25].mxu0 }
0x1144   :  { %v1246_v42 = vpop.f32.mrb[26].mxu0 }
0x1145   :  { %1255 = vrot.lane.b32.xlu1 %v1244_v4, %s1996_s28  ;;  %v1807_v10 = vpop.f32.mrb[27].mxu0  ;;  %v1249_v48 = vadd.f32 %v1648_v12, %v1244_v4 }
0x1146   :  { %v1332_v43 = vpop.f32.mrb[24].mxu1 }
0x1147   :  { %v1333_v44 = vadd.f32 %v2439_v0, %v1332_v43  ;;  %v1814_v45 = vpop.f32.mrb[25].mxu1  ;;  %v1250_v50 = vmul.f32 0.5, %v1249_v48 }
0x1148   :  { %v1335_v46 = vpop.f32.mrb[26].mxu1 }
0x1149   :  { %1344 = vrot.lane.b32.xlu0 %v1333_v44, %s1996_s28  ;;  %v1815_v47 = vpop.f32.mrb[27].mxu1  ;;  %v1338_v51 = vadd.f32 %v1333_v44, %v1290_v49  ;;  %1896 = vtanh.f32 %v1250_v50 }
0x114b   :  { %v1339_v52 = vmul.f32 0.5, %v1338_v51 }
0x114d   :  { %1898 = vtanh.f32 %v1339_v52 }
0x1153   :  { %v1897_v53 = vpop.eup %1896 }
0x1154   :  { %v1252_v54 = vmul.f32 0.5, %v1897_v53 }
0x1156   :  { %v1253_v57 = vadd.f32 0.5, %v1252_v54  ;;  %v1653_v54 = vld [vmem:[%s2581_s0 + $0xe] sm:$0x3] }
0x1157   :  { %v1899_v55 = vpop.eup %1898 }
0x1158   :  { %v1341_v58 = vmul.f32 0.5, %v1899_v55  ;;  %v1265_v30 = vsub.f32 1.0, %v1253_v57  ;;  %v1271_v36 = vmul.f32 %v1253_v57, %v2394_v33 }
0x115a   :  { %v1342_v11 = vadd.f32 0.5, %v1341_v58 }
0x115c   :  { %v1354_v31 = vsub.f32 1.0, %v1342_v11  ;;  %v1360_v37 = vmul.f32 %v1342_v11, %v2402_v23 }
0x11b7   :  { %v1256_v59 = vpop.permute.xlu1 %1255 }
0x11b8   :  { %v1258_v60 = vmul.f32 %v1256_v59, %v1253_v57 }
0x11ba   :  { %1260 = vrot.lane.b32.xlu1 %v1258_v60, %s1996_s28 }
0x11bb   :  { %v1345_v16 = vpop.permute.xlu0 %1344 }
0x11bc   :  { %v1347_v19 = vmul.f32 %v1345_v16, %v1342_v11 }
0x11be   :  { %1349 = vrot.lane.b32.xlu0 %v1347_v19, %s1996_s28  ;;  %1276 = vperm.xlu1 %1843, %v1274_v6  }
0x11c2   :  { %1365 = vperm.xlu0 %1842, %v1363_v63   ;;  %v1465_v63 = vld [vmem:[%s2584_s3] sm:$0x3] }
0x11c3   :  { %vm1538_vm4 = vcmp.gt.f32.partialorder %v1465_v63, 0.0 }
0x122c   :  { %v1261_v21 = vpop.permute.xlu1 %1260 }
0x122d   :  { %v1263_v22 = vadd.f32 %v1648_v12, %v1261_v21 }
0x122f   :  { %1900 = vtanh.f32 %v1263_v22 }
0x1230   :  { %v1350_v25 = vpop.permute.xlu0 %1349 }
0x1231   :  { %v1352_v15 = vadd.f32 %v1350_v25, %v1290_v49 }
0x1233   :  { %1902 = vtanh.f32 %v1352_v15 }
0x1239   :  { %v1901_v26 = vpop.eup %1900 }
0x123a   :  { %1267 = vrot.lane.b32.xlu1 %v1901_v26, %s1997_s10  ;;  %v1539_v26 = vsel %vm1538_vm4, 1, %v1995_v9 }
0x123d   :  { %v1903_v17 = vpop.eup %1902  ;;  %v1277_v29 = vpop.permute.xlu1 %1276 }
0x123e   :  { %1356 = vrot.lane.b32.xlu0 %v1903_v17, %s1997_s10  ;;  %vm1278_vm15 = vcmp.eq.s32.totalorder %v1277_v29, 1 }
0x1241   :  { %v1366_v34 = vpop.permute.xlu0 %1365 }
0x1242   :  { %vm1367_vm3 = vcmp.eq.s32.totalorder %v1366_v34, 1 }
0x12ac   :  { %v1268_v1 = vpop.permute.xlu1 %1267 }
0x12ad   :  { %v1270_v27 = vmul.f32 %v1268_v1, %v1265_v30 }
0x12af   :  { %v1272_v2 = vadd.f32 %v1271_v36, %v1270_v27 }
0x12b0   :  { %v1357_v3 = vpop.permute.xlu0 %1356 }
0x12b1   :  { %v1359_v38 = vmul.f32 %v1357_v3, %v1354_v31  ;;  %v2461_v39 = vsel %vm1278_vm15, %v1272_v2, %v2394_v33  ;;  %v2463_v4 = vsel %vm1278_vm15, %v1272_v2, 0.0 }
0x12b2   :  { %v1380_v41 = vpack.c.bf16 %v2461_v39, %v2461_v39 }
0x12b3   :  { %v1361_v42 = vadd.f32 %v1360_v37, %v1359_v38 }
0x12b4   :  { %1382 = vrot.lane.b32.xlu1 %v1380_v41, %s1997_s10 }
0x12b5   :  { %v2469_v10 = vsel %vm1367_vm3, %v1361_v42, %v2402_v23  ;;  %v2471_v43 = vsel %vm1367_vm3, %v1361_v42, 0.0 }
0x12b6   :  { %v1467_v44 = vpack.c.bf16 %v2469_v10, %v2469_v10 }
0x12b8   :  { %1469 = vrot.lane.b32.xlu0 %v1467_v44, %s1997_s10 }
0x1326   :  { %v1383_v33 = vpop.permute.xlu1 %1382 }
0x1327   :  { %1821 = vmatmul.mubr.msk.bf16.vlgmr.msra.gmra.mrb[28].mxu0 %vm114_vm2, %v1383_v33 }
0x132a   :  { %v1470_v45 = vpop.permute.xlu0 %1469 }
0x132b   :  { %1829 = vmatmul.mubr.msk.bf16.vlgmr.msra.gmra.mrb[28].mxu1 %vm114_vm2, %v1470_v45 }
0x13fa   :  { %v1421_v46 = vpop.f32.mrb[28].mxu0 }
0x13fb   :  { %v1422_v47 = vadd.f32 %v2432_v40, %v1421_v46  ;;  %v1822_v12 = vpop.f32.mrb[29].mxu0 }
0x13fc   :  { %v1424_v48 = vpop.f32.mrb[30].mxu0 }
0x13fd   :  { %1433 = vrot.lane.b32.xlu1 %v1422_v47, %s1996_s28  ;;  %v1823_v23 = vpop.f32.mrb[31].mxu0  ;;  %v1427_v55 = vadd.f32 %v1653_v54, %v1422_v47 }
0x13fe   :  { %v1508_v49 = vpop.f32.mrb[28].mxu1 }
0x13ff   :  { %v1509_v50 = vadd.f32 %v2439_v0, %v1508_v49  ;;  %v1830_v51 = vpop.f32.mrb[29].mxu1  ;;  %v1428_v40 = vmul.f32 0.5, %v1427_v55  ;;  %v1652_v0 = vld [vmem:[%s2583_s2 + $0xe] sm:$0x3]  ;;  %s1998_s2 = smov [#allocation7]  }
0x1400   :  { %v1511_v52 = vpop.f32.mrb[30].mxu1  ;;  %vm1451_vm2 = vcmp.gt.f32.partialorder %v1652_v0, 0.0  ;;  %s1566_s3 = sshll.u32 %s1998_s2, 4  ;;  %s1567_s3 = int_to_ptr.vmem [resolvable:$true] %s1566_s3 }
0x1401   :  { %1520 = vrot.lane.b32.xlu0 %v1509_v50, %s1996_s28  ;;  %v1831_v53 = vpop.f32.mrb[31].mxu1  ;;  %v1514_v57 = vadd.f32 %v1509_v50, %v1466_v56  ;;  %1904 = vtanh.f32 %v1428_v40  ;;  %v1452_v25 = vsel %vm1451_vm2, 1, %v1995_v9  ;;  %s1940_s23 = scalar_lea.vmem %s1567_s3, 256  ;;  %p1945_p9 = scmp.lt.s32.totalorder %s1567_s3, %s1567_s3 }
0x1402   :  { %p1941_p8 = scmp.ne.s32.totalorder %s1567_s3, %s1940_s23  ;;  %p1946_p10 = scmp.lt.s32.totalorder %s1940_s23, %s1940_s23 }
0x1403   :  { %v1515_v58 = vmul.f32 0.5, %v1514_v57 }
0x1404   :  { %p1947_p11 = por %p1946_p10, %p1945_p9 }
0x1405   :  { %1906 = vtanh.f32 %v1515_v58 }
0x1406   :  { %p1948_p12 = pnand %p1947_p11, %p1941_p8 }
0x140b   :  { %v1905_v59 = vpop.eup %1904 }
0x140c   :  { %v1430_v60 = vmul.f32 0.5, %v1905_v59 }
0x140e   :  { %v1431_v11 = vadd.f32 0.5, %v1430_v60 }
0x140f   :  { %v1907_v8 = vpop.eup %1906 }
0x1410   :  { %v1517_v16 = vmul.f32 0.5, %v1907_v8 }
0x1412   :  { %v1518_v21 = vadd.f32 0.5, %v1517_v16 }
0x146f   :  { %v1434_v6 = vpop.permute.xlu1 %1433 }
0x1470   :  { %v1436_v19 = vmul.f32 %v1434_v6, %v1431_v11 }
0x1472   :  { %1438 = vrot.lane.b32.xlu1 %v1436_v19, %s1996_s28 }
0x1473   :  { %v1521_v22 = vpop.permute.xlu0 %1520 }
0x1474   :  { %v1523_v15 = vmul.f32 %v1521_v22, %v1518_v21 }
0x1476   :  { %1525 = vrot.lane.b32.xlu0 %v1523_v15, %s1996_s28  ;;  %1454 = vperm.xlu1 %1843, %v1452_v25   ;;  %s1999_s28 = smov [#allocation8]  }
0x147a   :  { %1541 = vperm.xlu0 %1842, %v1539_v26  }
0x14e4   :  { %v1439_v17 = vpop.permute.xlu1 %1438 }
0x14e5   :  { %v1441_v29 = vadd.f32 %v1653_v54, %v1439_v17 }
0x14e7   :  { %1908 = vtanh.f32 %v1441_v29 }
0x14e8   :  { %v1526_v30 = vpop.permute.xlu0 %1525 }
0x14e9   :  { %v1528_v34 = vadd.f32 %v1526_v30, %v1466_v56 }
0x14eb   :  { %1910 = vtanh.f32 %v1528_v34 }
0x14f1   :  { %v1909_v1 = vpop.eup %1908 }
0x14f2   :  { %1445 = vrot.lane.b32.xlu1 %v1909_v1, %s1997_s10 }
0x14f5   :  { %v1911_v36 = vpop.eup %1910  ;;  %v1455_v9 = vpop.permute.xlu1 %1454 }
0x14f6   :  { %1532 = vrot.lane.b32.xlu0 %v1911_v36, %s1997_s10  ;;  %195 = vrot.lane.b32.xlu1 %v2142_v62, %s1997_s10  ;;  %v1443_v62 = vsub.f32 1.0, %v1431_v11  ;;  %vm1456_vm5 = vcmp.eq.s32.totalorder %v1455_v9, 1 }
0x14fa   :  { %303 = vrot.lane.b32.xlu0 %v2149_v7, %s1997_s10  ;;  %392 = vrot.lane.b32.xlu1 %v2192_v5, %s1997_s10  ;;  %v1542_v7 = vpop.permute.xlu0 %1541 }
0x14fb   :  { %vm1543_vm6 = vcmp.eq.s32.totalorder %v1542_v7, 1 }
0x14fe   :  { %481 = vrot.lane.b32.xlu0 %v2200_v14, %s1997_s10  ;;  %570 = vrot.lane.b32.xlu1 %v2243_v61, %s1997_s10  ;;  %v1449_v14 = vmul.f32 %v1431_v11, %v2461_v39 }
0x1502   :  { %659 = vrot.lane.b32.xlu0 %v2251_v18, %s1997_s10  ;;  %748 = vrot.lane.b32.xlu1 %v2294_v13, %s1997_s10  ;;  %v1530_v13 = vsub.f32 1.0, %v1518_v21 }
0x1506   :  { %837 = vrot.lane.b32.xlu0 %v2302_v24, %s1997_s10  ;;  %926 = vrot.lane.b32.xlu1 %v2345_v28, %s1997_s10 }
0x150a   :  { %1015 = vrot.lane.b32.xlu0 %v2353_v32, %s1997_s10  ;;  %1104 = vrot.lane.b32.xlu1 %v2396_v20, %s1997_s10  ;;  %v1536_v32 = vmul.f32 %v1518_v21, %v2469_v10 }
0x150e   :  { %1193 = vrot.lane.b32.xlu0 %v2404_v35, %s1997_s10  ;;  %1282 = vrot.lane.b32.xlu1 %v2463_v4, %s1997_s10 }
0x1512   :  { %1371 = vrot.lane.b32.xlu0 %v2471_v43, %s1997_s10 }
0x1564   :  { %v1446_v5 = vpop.permute.xlu1 %1445 }
0x1565   :  { %v1448_v61 = vmul.f32 %v1446_v5, %v1443_v62 }
0x1567   :  { %v1450_v18 = vadd.f32 %v1449_v14, %v1448_v61 }
0x1568   :  { %v1533_v24 = vpop.permute.xlu0 %1532  ;;  %v196_v28 = vpop.permute.xlu1 %195 }
0x1569   :  { %v1535_v20 = vmul.f32 %v1533_v24, %v1530_v13  ;;  %199 = vst.msk [vmem:[#allocation7] sm:$0x3] %vm76_vm0, %v196_v28  ;;  %v1458_v35 = vsel %vm1456_vm5, %v1450_v18, 0.0  ;;  %v1457_v37 = vsel %vm1456_vm5, %v1450_v18, %v2461_v39 }
0x156a   :  { %1460 = vrot.lane.b32.xlu1 %v1458_v35, %s1997_s10 }
0x156b   :  { %v1537_v27 = vadd.f32 %v1536_v32, %v1535_v20 }
0x156c   :  { %v304_v2 = vpop.permute.xlu0 %303  ;;  %v393_v31 = vpop.permute.xlu1 %392 }
0x156d   :  { %307 = vst.msk [vmem:[#allocation8 + $0xe] sm:$0x3] %vm76_vm0, %v304_v2  ;;  %396 = vst.msk [vmem:[#allocation7 + $0x2] sm:$0x3] %vm76_vm0, %v393_v31  ;;  %v1545_v3 = vsel %vm1543_vm6, %v1537_v27, 0.0  ;;  %v1544_v41 = vsel %vm1543_vm6, %v1537_v27, %v2469_v10 }
0x156e   :  { %1547 = vrot.lane.b32.xlu0 %v1545_v3, %s1997_s10  ;;  %1552 = vrot.lane.b32.xlu1 %v1457_v37, %s1997_s10 }
0x1570   :  { %v482_v38 = vpop.permute.xlu0 %481  ;;  %v571_v4 = vpop.permute.xlu1 %570 }
0x1571   :  { %485 = vst.msk [vmem:[#allocation8 + $0xc] sm:$0x3] %vm76_vm0, %v482_v38  ;;  %574 = vst.msk [vmem:[#allocation7 + $0x4] sm:$0x3] %vm76_vm0, %v571_v4 }
0x1572   :  { %1557 = vrot.lane.b32.xlu0 %v1544_v41, %s1997_s10  ;;  %s1582_s10 = sshll.u32 %s1999_s28, 4  ;;  %s1583_s10 = int_to_ptr.vmem [resolvable:$true] %s1582_s10 }
0x1574   :  { %v660_v42 = vpop.permute.xlu0 %659  ;;  %v749_v43 = vpop.permute.xlu1 %748 }
0x1575   :  { %663 = vst.msk [vmem:[#allocation8 + $0xa] sm:$0x3] %vm76_vm0, %v660_v42  ;;  %752 = vst.msk [vmem:[#allocation7 + $0x6] sm:$0x3] %vm76_vm0, %v749_v43 }
0x1578   :  { %v838_v39 = vpop.permute.xlu0 %837  ;;  %v927_v44 = vpop.permute.xlu1 %926 }
0x1579   :  { %841 = vst.msk [vmem:[#allocation8 + $0x8] sm:$0x3] %vm76_vm0, %v838_v39  ;;  %930 = vst.msk [vmem:[#allocation7 + $0x8] sm:$0x3] %vm76_vm0, %v927_v44 }
0x157c   :  { %v1016_v33 = vpop.permute.xlu0 %1015  ;;  %v1105_v45 = vpop.permute.xlu1 %1104 }
0x157d   :  { %1019 = vst.msk [vmem:[#allocation8 + $0x6] sm:$0x3] %vm76_vm0, %v1016_v33  ;;  %1108 = vst.msk [vmem:[#allocation7 + $0xa] sm:$0x3] %vm76_vm0, %v1105_v45 }
0x1580   :  { %v1194_v10 = vpop.permute.xlu0 %1193  ;;  %v1283_v46 = vpop.permute.xlu1 %1282 }
0x1581   :  { %1197 = vst.msk [vmem:[#allocation8 + $0x4] sm:$0x3] %vm76_vm0, %v1194_v10  ;;  %1286 = vst.msk [vmem:[#allocation7 + $0xc] sm:$0x3] %vm76_vm0, %v1283_v46 }
0x1584   :  { %v1372_v47 = vpop.permute.xlu0 %1371 }
0x1585   :  { %1375 = vst.msk [vmem:[#allocation8 + $0x2] sm:$0x3] %vm76_vm0, %v1372_v47 }
0x15dc   :  { %v1461_v12 = vpop.permute.xlu1 %1460 }
0x15dd   :  { %1464 = vst.msk [vmem:[#allocation7 + $0xe] sm:$0x3] %vm76_vm0, %v1461_v12 }
0x15de   :  { %1951 = shalt.err (!%p1948_p12)
}
0x15df   :  { %s1952_s26 = scalar_lea.hbm %s2587_s6, 256 }
0x15e0   :  { %p1953_p13 = scmp.ne.s32.totalorder %s2587_s6, %s1952_s26  ;;  %p1956_p0 = scmp.lt.u32.totalorder %s1952_s26, %s2587_s6 }
0x15e2   :  { %p1958_p1 = pnand %p1956_p0, %p1953_p13 }
0x15e4   :  { %1961 = shalt.err (!%p1958_p1)
}
0x15e5   :  { %1572 = dma.vmem_to_hbm [thread:$0]  %s1567_s3, 256, %s2587_s6, [#allocation6], %s1991_s11, %s1991_s11, %s1992_s12   ;;  %v1548_v48 = vpop.permute.xlu0 %1547  ;;  %v1553_v23 = vpop.permute.xlu1 %1552 }
0x15e6   :  { %1550 = vst.msk [vmem:[#allocation8] sm:$0x3] %vm76_vm0, %v1548_v48  ;;  %1555 = vst.msk [vmem:[#allocation2] sm:$0x3] %vm76_vm0, %v1553_v23  ;;  %s1962_s14 = scalar_lea.vmem %s1583_s10, 256  ;;  %p1967_p3 = scmp.lt.s32.totalorder %s1583_s10, %s1583_s10 }
0x15e7   :  { %p1963_p2 = scmp.ne.s32.totalorder %s1583_s10, %s1962_s14  ;;  %p1968_p4 = scmp.lt.s32.totalorder %s1962_s14, %s1962_s14 }
0x15e9   :  { %p1969_p5 = por %p1968_p4, %p1967_p3 }
0x15eb   :  { %p1970_p6 = pnand %p1969_p5, %p1963_p2 }
0x15ed   :  { %1973 = shalt.err (!%p1970_p6)
}
0x15ee   :  { %s1974_s5 = scalar_lea.hbm %s2588_s7, 256 }
0x15ef   :  { %p1975_p7 = scmp.ne.s32.totalorder %s2588_s7, %s1974_s5  ;;  %p1978_p8 = scmp.lt.u32.totalorder %s1974_s5, %s2588_s7 }
0x15f1   :  { %p1980_p9 = pnand %p1978_p8, %p1975_p7 }
0x15f3   :  { %1983 = shalt.err (!%p1980_p9)
}
0x15f4   :  { %1588 = dma.vmem_to_hbm [thread:$0]  %s1583_s10, 256, %s2588_s7, [#allocation9], %s1991_s11, %s1991_s11, %s1992_s12   ;;  %v1558_v49 = vpop.permute.xlu0 %1557 }
0x15f5   :  { %1560 = vst.msk [vmem:[#allocation3] sm:$0x3] %vm76_vm0, %v1558_v49 }
0x15f6   :  { %1986 = dma.done.wait [#allocation6], 256  }
0x15f7   :  { %1987 = vsyncadd [#allocation6], 4294967040 }
0x15f8   :  { %1988 = dma.done.wait [#allocation9], 256  }
0x15f9   :  { %1989 = vsyncadd [#allocation9], 4294967040 }
0x15fa   :  { %1595 = vsyncpa [#allocation5], 1 }
0x15fb   :  { %1596 = vsyncpa [#allocation6], 1 }
0x15fc   :  { %1597 = vsyncpa [#allocation9], 1 }

</bundles_post_ra>
